<compile_context>
chip_gen: v5e
topology: v5e:2x2
jax: 0.10.0
libtpu: 0.0.40
codegen_flags: <defaults>
</compile_context>

<pallas_src>
import functools

import jax
import jax.numpy as jnp
from jax import lax
from jax.experimental import pallas as pl
from jax.experimental.pallas import tpu as pltpu


# ---------------------------------------------------------------------------
# Hardware-aware grid sizing
# ---------------------------------------------------------------------------
def _two_tensorcores():
    """True only on chips with 2 TensorCores (v7x); v5e/v6e have 1 TC per chip."""
    try:
        kind = jax.devices()[0].device_kind.lower()
    except Exception:  # pragma: no cover - defensive
        return False
    return "v7" in kind


# ---------------------------------------------------------------------------
# Pallas kernel: fused separate-head MLPs + inverse_sigmoid / sigmoid / pc_range
# ---------------------------------------------------------------------------
def _head_kernel(x_ref, ref_ref, w1_ref, b1_ref, w2_ref, b2_ref, out_ref, *,
                 pc_range, reps):
    # x_ref  : (row_blk, C)     flattened decoder features (rows = layers*batch*queries), bf16
    # ref_ref: (B*Q, 3)         reference points in [0, 1] (f32), shared by every row block
    # w1_ref : (C, Hp)          all heads' first Conv1d(k=1), zero-padded lane-dense, bf16
    # b1_ref : (1, Hp)          f32
    # w2_ref : (Hp, Tp)         block-diagonal second Conv1d(k=1), zero-padded lane-dense, bf16
    # b2_ref : (1, Tp)          f32
    # out_ref: (row_blk, Tp)    lane-dense f32 output; columns >= T are zero by construction
    sx, ox = pc_range[3] - pc_range[0], pc_range[0]
    sy, oy = pc_range[4] - pc_range[1], pc_range[1]
    sz, oz = pc_range[5] - pc_range[2], pc_range[2]

    # --- fused multi-head MLP: two MXU matmuls with f32 accumulation ---------------------
    x = x_ref[...]
    h = jnp.dot(x, w1_ref[...], preferred_element_type=jnp.float32) + b1_ref[...]
    h = jnp.maximum(h, 0.0)                                   # ConvModule ReLU
    y = jnp.dot(h.astype(w2_ref.dtype), w2_ref[...],
                preferred_element_type=jnp.float32) + b2_ref[...]        # (row_blk, Tp)

    # --- inverse_sigmoid(reference_points), eps = 1e-5 (mmdet convention) -----------------
    eps = 1e-5
    r = jnp.clip(ref_ref[...], 0.0, 1.0)                                 # (B*Q, 3)
    inv = jnp.log(jnp.maximum(r, eps) / jnp.maximum(1.0 - r, eps))       # (B*Q, 3)

    tp = y.shape[-1]
    # Lane-pad to Tp columns (ref columns 0..2 align with y columns 0..2).
    inv_full = jnp.concatenate(
        [inv, jnp.zeros((inv.shape[0], tp - 3), jnp.float32)], axis=-1)  # (B*Q, Tp)
    if reps > 1:  # one row block spans `reps` decoder layers -> replicate along rows
        inv_full = jnp.concatenate([inv_full] * reps, axis=0)            # (row_blk, Tp)

    # --- sigmoid + pc_range scale/shift on the first 3 columns, passthrough elsewhere -----
    # Column layout: [center_x, center_y, height_z | dim(3) | rot(2) | vel(2) | cls | pad]
    col = lax.broadcasted_iota(jnp.int32, (1, tp), 1)
    scale = jnp.where(col == 0, sx, jnp.where(col == 1, sy, sz)).astype(jnp.float32)
    shift = jnp.where(col == 0, ox, jnp.where(col == 1, oy, oz)).astype(jnp.float32)

    sig = jax.nn.sigmoid(y + inv_full)
    out_ref[...] = jnp.where(col < 3, sig * scale + shift, y)


# ---------------------------------------------------------------------------
# One-time parameter preparation (hoisted out of the per-call path)
# ---------------------------------------------------------------------------
def prepare_head_params(w1, b1, w2, b2, use_bf16=True):
    """Pad weights lane-dense and pre-cast matmul operands to bf16, once."""
    C, Hall = w1.shape
    T = w2.shape[1]
    Hp = pl.cdiv(Hall, 128) * 128                 # lane-dense intermediate width (192 -> 256)
    Tp = max(128, pl.cdiv(T, 128) * 128)          # lane-dense output width (12 -> 128)

    w1p = jnp.pad(w1, ((0, 0), (0, Hp - Hall)))
    b1p = jnp.pad(b1, ((0, 0), (0, Hp - Hall)))
    w2p = jnp.pad(w2, ((0, Hp - Hall), (0, Tp - T)))
    b2p = jnp.pad(b2, ((0, 0), (0, Tp - T)))

    wdt = jnp.bfloat16 if use_bf16 else jnp.float32
    return dict(w1=w1p.astype(wdt), b1=b1p.astype(jnp.float32),
                w2=w2p.astype(wdt), b2=b2p.astype(jnp.float32),
                T=T, Tp=Tp, Hp=Hp, use_bf16=use_bf16)


# ---------------------------------------------------------------------------
# Pallas wrapper
# ---------------------------------------------------------------------------
def cmt_lidar_head_pallas(outs_dec, reference_points, head_params, pc_range):
    """outs_dec: (N_dec, B, Q, C), reference_points: (B, Q, 3) f32.

    Returns the padded fused head output (N_dec, B, Q, Tp); per-head slices read columns < T.
    """
    w1p, b1p, w2p, b2p = (head_params['w1'], head_params['b1'],
                          head_params['w2'], head_params['b2'])
    Tp, Hp = head_params['Tp'], head_params['Hp']
    N, B, Q, C = outs_dec.shape
    R = N * B * Q
    rows_ref = B * Q

    x = outs_dec.reshape(R, C)
    ref = reference_points.reshape(rows_ref, 3).astype(jnp.float32)

    # 2 row blocks only where there is a second TensorCore to feed (v7x); 1 otherwise,
    # since every extra grid step here is pure per-step overhead (~0.35 us) on a ~1 us kernel.
    n_blk = 1
    if _two_tensorcores() and N % 2 == 0 and ((R // 2) % 8 == 0):
        n_blk = 2
    row_blk = R // n_blk
    reps = row_blk // rows_ref          # decoder layers covered by one row block

    kernel = functools.partial(
        _head_kernel,
        pc_range=tuple(float(v) for v in pc_range),
        reps=reps)

    out = pl.pallas_call(
        kernel,
        out_shape=jax.ShapeDtypeStruct((R, Tp), jnp.float32),
        grid=(n_blk,),
        in_specs=[
            pl.BlockSpec((row_blk, C), lambda i: (i, 0)),
            pl.BlockSpec((rows_ref, 3), lambda i: (0, 0)),
            pl.BlockSpec((C, Hp), lambda i: (0, 0)),
            pl.BlockSpec((1, Hp), lambda i: (0, 0)),
            pl.BlockSpec((Hp, Tp), lambda i: (0, 0)),
            pl.BlockSpec((1, Tp), lambda i: (0, 0)),
        ],
        out_specs=pl.BlockSpec((row_blk, Tp), lambda i: (i, 0)),
        compiler_params=pltpu.CompilerParams(dimension_semantics=("parallel",)),
    )(x, ref, w1p, b1p, w2p, b2p)

    return out.reshape(N, B, Q, Tp)


# ---------------------------------------------------------------------------
# Surrogate for cmt_l.forward_train (plain JAX glue; see TODO above)
# ---------------------------------------------------------------------------
def synthetic_cmt_encoder(voxel_features, voxel_coords, voxel_num_points,
                          enc_params, batch_size, use_bf16=True):
    W_b, query_embed, layer_embed, W_ref, b_ref = enc_params

    npts = jnp.maximum(voxel_num_points.astype(jnp.float32), 1.0)[:, None]
    vox_mean = voxel_features.sum(axis=1) / npts                       # (V, Cpt)
    batch_ids = voxel_coords[:, 0].astype(jnp.int32)
    seg_sum = jax.ops.segment_sum(vox_mean, batch_ids, num_segments=batch_size)
    counts = jax.ops.segment_sum(jnp.ones((vox_mean.shape[0],), jnp.float32),
                                 batch_ids, num_segments=batch_size)
    batch_pool = seg_sum / jnp.maximum(counts, 1.0)[:, None]           # (B, Cpt)
    batch_feat = jnp.tanh(batch_pool @ W_b)                            # (B, C)

    outs_dec = jnp.tanh(layer_embed[:, None, None, :]
                        + batch_feat[None, :, None, :]
                        + query_embed[None, None, :, :])               # (N, B, Q, C)
    reference_points = jax.nn.sigmoid(
        (query_embed[None, :, :] + batch_feat[:, None, :]) @ W_ref + b_ref)  # (B, Q, 3)

    out_dt = jnp.bfloat16 if use_bf16 else jnp.float32
    return outs_dec.astype(out_dt), reference_points.astype(jnp.float32)


# ---------------------------------------------------------------------------
# Full module-equivalent forward (training path, test_flag=False)
# ---------------------------------------------------------------------------
def cmt_lidar_forward(batch, params, pc_range, head_layout, batch_size, use_bf16=True):
    vf = batch['inputs_m1']['voxel_features']
    vc = batch['inputs_m1']['voxel_coords']
    vn = batch['inputs_m1']['voxel_num_points']

    outs_dec, reference_points = synthetic_cmt_encoder(
        vf, vc, vn, params['encoder'], batch_size, use_bf16=use_bf16)

    fused = cmt_lidar_head_pallas(outs_dec, reference_points, params['head'], pc_range)

    # Per-head views read directly from the lane-padded output (all offsets < T).
    ret = {}
    off = 0
    for name, oc in head_layout:
        ret[name] = fused[..., off:off + oc]
        off += oc
    return {'single_ego_ret_dicts': [ret]}, outs_dec, reference_points, fused


# ---------------------------------------------------------------------------
# Pure-JAX reference of the head (for correctness check)
# ---------------------------------------------------------------------------
def head_reference(outs_dec, ref, w1, b1, w2, b2, pc_range, use_bf16=True):
    dt = jnp.bfloat16 if use_bf16 else jnp.float32
    x = outs_dec.astype(dt)
    h = jnp.einsum('nbqc,ch->nbqh', x, w1.astype(dt),
                   preferred_element_type=jnp.float32) + b1[0]
    h = jnp.maximum(h, 0.0)
    y = jnp.einsum('nbqh,ht->nbqt', h.astype(dt), w2.astype(dt),
                   preferred_element_type=jnp.float32) + b2[0]
    r = jnp.clip(ref, 0.0, 1.0)
    inv = jnp.log(jnp.maximum(r, 1e-5) / jnp.maximum(1.0 - r, 1e-5))
    center = jax.nn.sigmoid(y[..., 0:2] + inv[None, :, :, 0:2])
    height = jax.nn.sigmoid(y[..., 2:3] + inv[None, :, :, 2:3])
    cx = center[..., 0:1] * (pc_range[3] - pc_range[0]) + pc_range[0]
    cy = center[..., 1:2] * (pc_range[4] - pc_range[1]) + pc_range[1]
    hz = height * (pc_range[5] - pc_range[2]) + pc_range[2]
    return jnp.concatenate([cx, cy, hz, y[..., 3:]], axis=-1)


if __name__ == "__main__":
    key = jax.random.PRNGKey(0)

    # ---- small, module-consistent shapes -------------------------------------------------
    B = 2                 # batch size
    V, P, Cpt = 64, 8, 4  # voxels, max points per voxel, point feature dim
    N_dec, Q, C = 2, 128, 64   # decoder layers, queries, embed dims
    head_conv = 32
    num_cls = 2
    pc_range = (-54.0, -54.0, -5.0, 54.0, 54.0, 3.0)

    # head layout mirrors common_heads + cls_logits from __init__
    head_layout = [("center", 2), ("height", 1), ("dim", 3),
                   ("rot", 2), ("vel", 2), ("cls_logits", num_cls)]
    nh = len(head_layout)
    T = sum(oc for _, oc in head_layout)

    ks = jax.random.split(key, 8)

    # ---- deterministic example inputs ----------------------------------------------------
    voxel_features = jax.random.normal(ks[0], (V, P, Cpt), jnp.float32)
    voxel_num_points = jax.random.randint(ks[1], (V,), 1, P + 1)
    batch_idx = jnp.concatenate([jnp.zeros(V // 2, jnp.int32),
                                 jnp.ones(V - V // 2, jnp.int32)])
    spatial = jax.random.randint(ks[2], (V, 3), 0, 16)
    voxel_coords = jnp.concatenate([batch_idx[:, None], spatial], axis=1)

    batch = {'inputs_m1': {'voxel_features': voxel_features,
                           'voxel_coords': voxel_coords,
                           'voxel_num_points': voxel_num_points}}

    # ---- deterministic parameters ---------------------------------------------------------
    W_b = 0.5 * jax.random.normal(ks[3], (Cpt, C), jnp.float32)
    query_embed = 0.5 * jax.random.normal(ks[4], (Q, C), jnp.float32)
    layer_embed = 0.5 * jax.random.normal(ks[5], (N_dec, C), jnp.float32)
    W_ref = 0.3 * jax.random.normal(ks[6], (C, 3), jnp.float32)
    b_ref = jnp.zeros((3,), jnp.float32)

    w1_list, b1_list = [], []
    w2 = jnp.zeros((nh * head_conv, T), jnp.float32)
    b2 = jnp.zeros((T,), jnp.float32)
    off = 0
    for hi, (name, oc) in enumerate(head_layout):
        kk = jax.random.fold_in(ks[7], hi)
        k1, k2, k3, k4 = jax.random.split(kk, 4)
        w1_list.append(0.1 * jax.random.normal(k1, (C, head_conv), jnp.float32))
        b1_list.append(0.1 * jax.random.normal(k2, (head_conv,), jnp.float32))
        w2 = w2.at[hi * head_conv:(hi + 1) * head_conv, off:off + oc].set(
            0.1 * jax.random.normal(k3, (head_conv, oc), jnp.float32))
        b2 = b2.at[off:off + oc].set(0.1 * jax.random.normal(k4, (oc,), jnp.float32))
        off += oc
    w1 = jnp.concatenate(w1_list, axis=1)           # (C, nh*head_conv)
    b1 = jnp.concatenate(b1_list)[None, :]          # (1, nh*head_conv)
    b2 = b2[None, :]                                # (1, T)

    # One-time weight padding / bf16 pre-cast (hoisted out of the per-call path).
    head_params = prepare_head_params(w1, b1, w2, b2, use_bf16=True)
    params = {'encoder': (W_b, query_embed, layer_embed, W_ref, b_ref),
              'head': head_params}

    # ---- run ------------------------------------------------------------------------------
    ret_dicts, outs_dec, reference_points, fused = cmt_lidar_forward(
        batch, params, pc_range, head_layout, batch_size=B, use_bf16=True)
    jax.block_until_ready(fused)

    # ---- correctness checks ---------------------------------------------------------------
    Tp = head_params['Tp']
    assert fused.shape == (N_dec, B, Q, Tp)
    assert ret_dicts['single_ego_ret_dicts'][0]['center'].shape == (N_dec, B, Q, 2)
    assert ret_dicts['single_ego_ret_dicts'][0]['height'].shape == (N_dec, B, Q, 1)
    assert ret_dicts['single_ego_ret_dicts'][0]['cls_logits'].shape == (N_dec, B, Q, num_cls)

    fused_t = fused[..., :T]

    # Tight check vs a reference that applies identical bf16-matmul rounding.
    ref_bf16 = head_reference(outs_dec, reference_points, w1, b1, w2, b2, pc_range,
                              use_bf16=True)
    assert jnp.allclose(fused_t, ref_bf16, rtol=1e-3, atol=1e-3), "mismatch vs bf16 reference"

    # Coarse sanity check vs full-f32 head semantics (bf16 rounding of inputs/weights only).
    ref_f32 = head_reference(outs_dec, reference_points, w1, b1, w2, b2, pc_range,
                             use_bf16=False)
    assert jnp.allclose(fused_t, ref_f32, rtol=5e-2, atol=1.0), "mismatch vs f32 reference"

    # Padded columns beyond T must be exactly zero (zero-padded w2/b2, col>=3 passthrough).
    assert jnp.all(fused[..., T:] == 0.0), "nonzero values in padded output columns"

    print("KERNEL_OK")
</pallas_src>

<mosaic_0001>
module attributes {stable_mosaic.version = 11 : i64} {
  func.func @_head_kernel(%arg0: i32, %arg1: memref<512x64xbf16, #tpu.memory_space<vmem>>, %arg2: memref<256x3xf32, #tpu.memory_space<vmem>>, %arg3: memref<64x256xbf16, #tpu.memory_space<vmem>>, %arg4: memref<1x256xf32, #tpu.memory_space<vmem>>, %arg5: memref<256x128xbf16, #tpu.memory_space<vmem>>, %arg6: memref<1x128xf32, #tpu.memory_space<vmem>>, %arg7: memref<512x128xf32, #tpu.memory_space<vmem>>) attributes {dimension_semantics = [#tpu.dimension_semantics<parallel>], iteration_bounds = array<i64: 1>, scalar_prefetch = 0 : i64, scratch_operands = 0 : i64, tpu.core_type = #tpu.core_type<tc>, window_params = [{transform_indices = @transform_0, window_bounds = array<i64: 512, 64>}, {pipeline_mode = #tpu.pipeline_mode<synchronous>, transform_indices = @transform_1, window_bounds = array<i64: 256, 3>}, {pipeline_mode = #tpu.pipeline_mode<synchronous>, transform_indices = @transform_2, window_bounds = array<i64: 64, 256>}, {pipeline_mode = #tpu.pipeline_mode<synchronous>, transform_indices = @transform_3, window_bounds = array<i64: 1, 256>}, {pipeline_mode = #tpu.pipeline_mode<synchronous>, transform_indices = @transform_4, window_bounds = array<i64: 256, 128>}, {pipeline_mode = #tpu.pipeline_mode<synchronous>, transform_indices = @transform_5, window_bounds = array<i64: 1, 128>}, {transform_indices = @transform_6, window_bounds = array<i64: 512, 128>}]} {
    %c0 = arith.constant 0 : index
    %c0_0 = arith.constant 0 : index
    %0 = vector.load %arg1[%c0, %c0_0] : memref<512x64xbf16, #tpu.memory_space<vmem>>, vector<512x64xbf16>
    %c0_1 = arith.constant 0 : index
    %c0_2 = arith.constant 0 : index
    %1 = vector.load %arg3[%c0_1, %c0_2] : memref<64x256xbf16, #tpu.memory_space<vmem>>, vector<64x256xbf16>
    %cst = arith.constant dense<0.000000e+00> : vector<512x256xf32>
    %2 = tpu.matmul %0, %1, %cst {dimension_numbers = #tpu.dot_dimension_numbers<[1], [0], [0], [1], [0, 0, 1, 1], [], []>} : vector<512x64xbf16>, vector<64x256xbf16>, vector<512x256xf32> -> vector<512x256xf32>
    %c0_3 = arith.constant 0 : index
    %c0_4 = arith.constant 0 : index
    %3 = vector.load %arg4[%c0_3, %c0_4] : memref<1x256xf32, #tpu.memory_space<vmem>>, vector<1x256xf32>
    %4 = vector.broadcast %3 : vector<1x256xf32> to vector<512x256xf32>
    %5 = arith.addf %2, %4 : vector<512x256xf32>
    %cst_5 = arith.constant 0.000000e+00 : f32
    %6 = vector.broadcast %cst_5 : f32 to vector<512x256xf32>
    %7 = arith.maximumf %5, %6 : vector<512x256xf32>
    %8 = arith.truncf %7 : vector<512x256xf32> to vector<512x256xbf16>
    %c0_6 = arith.constant 0 : index
    %c0_7 = arith.constant 0 : index
    %9 = vector.load %arg5[%c0_6, %c0_7] : memref<256x128xbf16, #tpu.memory_space<vmem>>, vector<256x128xbf16>
    %cst_8 = arith.constant dense<0.000000e+00> : vector<512x128xf32>
    %10 = tpu.matmul %8, %9, %cst_8 {dimension_numbers = #tpu.dot_dimension_numbers<[1], [0], [0], [1], [0, 0, 1, 1], [], []>} : vector<512x256xbf16>, vector<256x128xbf16>, vector<512x128xf32> -> vector<512x128xf32>
    %c0_9 = arith.constant 0 : index
    %c0_10 = arith.constant 0 : index
    %11 = vector.load %arg6[%c0_9, %c0_10] : memref<1x128xf32, #tpu.memory_space<vmem>>, vector<1x128xf32>
    %12 = vector.broadcast %11 : vector<1x128xf32> to vector<512x128xf32>
    %13 = arith.addf %10, %12 : vector<512x128xf32>
    %c0_11 = arith.constant 0 : index
    %c0_12 = arith.constant 0 : index
    %14 = vector.load %arg2[%c0_11, %c0_12] : memref<256x3xf32, #tpu.memory_space<vmem>>, vector<256x3xf32>
    %cst_13 = arith.constant 0.000000e+00 : f32
    %cst_14 = arith.constant 1.000000e+00 : f32
    %15 = vector.broadcast %cst_13 : f32 to vector<256x3xf32>
    %16 = arith.maximumf %15, %14 : vector<256x3xf32>
    %17 = vector.broadcast %cst_14 : f32 to vector<256x3xf32>
    %18 = arith.minimumf %17, %16 : vector<256x3xf32>
    %cst_15 = arith.constant 9.99999974E-6 : f32
    %19 = vector.broadcast %cst_15 : f32 to vector<256x3xf32>
    %20 = arith.maximumf %18, %19 : vector<256x3xf32>
    %cst_16 = arith.constant 1.000000e+00 : f32
    %21 = vector.broadcast %cst_16 : f32 to vector<256x3xf32>
    %22 = arith.subf %21, %18 : vector<256x3xf32>
    %cst_17 = arith.constant 9.99999974E-6 : f32
    %23 = vector.broadcast %cst_17 : f32 to vector<256x3xf32>
    %24 = arith.maximumf %22, %23 : vector<256x3xf32>
    %25 = arith.divf %20, %24 : vector<256x3xf32>
    %26 = math.log %25 : vector<256x3xf32>
    %cst_18 = arith.constant 0.000000e+00 : f32
    %27 = vector.broadcast %cst_18 : f32 to vector<256x125xf32>
    %28 = tpu.concatenate %26, %27 in 1 : vector<256x3xf32>, vector<256x125xf32> -> vector<256x128xf32>
    %29 = tpu.concatenate %28, %28 in 0 : vector<256x128xf32>, vector<256x128xf32> -> vector<512x128xf32>
    %30 = tpu.iota {dimensions = array<i32: 1>} : vector<1x128xi32>
    %c0_i32 = arith.constant 0 : i32
    %31 = vector.broadcast %c0_i32 : i32 to vector<1x128xi32>
    %32 = arith.cmpi eq, %30, %31 : vector<1x128xi32>
    %c1_i32 = arith.constant 1 : i32
    %33 = vector.broadcast %c1_i32 : i32 to vector<1x128xi32>
    %34 = arith.cmpi eq, %30, %33 : vector<1x128xi32>
    %cst_19 = arith.constant 1.080000e+02 : f32
    %cst_20 = arith.constant 8.000000e+00 : f32
    %35 = vector.broadcast %cst_19 : f32 to vector<1x128xf32>
    %36 = vector.broadcast %cst_20 : f32 to vector<1x128xf32>
    %37 = arith.select %34, %35, %36 : vector<1x128xi1>, vector<1x128xf32>
    %cst_21 = arith.constant 1.080000e+02 : f32
    %38 = vector.broadcast %cst_21 : f32 to vector<1x128xf32>
    %39 = arith.select %32, %38, %37 : vector<1x128xi1>, vector<1x128xf32>
    %c0_i32_22 = arith.constant 0 : i32
    %40 = vector.broadcast %c0_i32_22 : i32 to vector<1x128xi32>
    %41 = arith.cmpi eq, %30, %40 : vector<1x128xi32>
    %c1_i32_23 = arith.constant 1 : i32
    %42 = vector.broadcast %c1_i32_23 : i32 to vector<1x128xi32>
    %43 = arith.cmpi eq, %30, %42 : vector<1x128xi32>
    %cst_24 = arith.constant -5.400000e+01 : f32
    %cst_25 = arith.constant -5.000000e+00 : f32
    %44 = vector.broadcast %cst_24 : f32 to vector<1x128xf32>
    %45 = vector.broadcast %cst_25 : f32 to vector<1x128xf32>
    %46 = arith.select %43, %44, %45 : vector<1x128xi1>, vector<1x128xf32>
    %cst_26 = arith.constant -5.400000e+01 : f32
    %47 = vector.broadcast %cst_26 : f32 to vector<1x128xf32>
    %48 = arith.select %41, %47, %46 : vector<1x128xi1>, vector<1x128xf32>
    %49 = arith.addf %13, %29 : vector<512x128xf32>
    %50 = arith.negf %49 : vector<512x128xf32>
    %51 = math.exp %50 : vector<512x128xf32>
    %cst_27 = arith.constant 1.000000e+00 : f32
    %52 = vector.broadcast %cst_27 : f32 to vector<512x128xf32>
    %53 = arith.addf %52, %51 : vector<512x128xf32>
    %54 = arith.divf %52, %53 : vector<512x128xf32>
    %c3_i32 = arith.constant 3 : i32
    %55 = vector.broadcast %c3_i32 : i32 to vector<1x128xi32>
    %56 = arith.cmpi slt, %30, %55 : vector<1x128xi32>
    %57 = vector.broadcast %39 : vector<1x128xf32> to vector<512x128xf32>
    %58 = arith.mulf %54, %57 : vector<512x128xf32>
    %59 = vector.broadcast %48 : vector<1x128xf32> to vector<512x128xf32>
    %60 = arith.addf %58, %59 : vector<512x128xf32>
    %61 = vector.shape_cast %56 : vector<1x128xi1> to vector<1x128xi1>
    %62 = vector.broadcast %61 : vector<1x128xi1> to vector<512x128xi1>
    %63 = arith.select %62, %60, %13 : vector<512x128xi1>, vector<512x128xf32>
    %c0_28 = arith.constant 0 : index
    %c0_29 = arith.constant 0 : index
    %64 = vector.load %arg7[%c0_28, %c0_29] : memref<512x128xf32, #tpu.memory_space<vmem>>, vector<512x128xf32>
    tpu.vector_store %arg7[%c0_28, %c0_29], %63 {strides = array<i32>} : memref<512x128xf32, #tpu.memory_space<vmem>>, vector<512x128xf32>,
    return
  }
  func.func @transform_0(%arg0: i32) -> (i32, i32) {
    %c0_i32 = arith.constant 0 : i32
    %c0_i32_0 = arith.constant 0 : i32
    return %arg0, %c0_i32 : i32, i32
  }
  func.func @transform_1(%arg0: i32) -> (i32, i32) {
    %c0_i32 = arith.constant 0 : i32
    %c0_i32_0 = arith.constant 0 : i32
    %c0_i32_1 = arith.constant 0 : i32
    return %c0_i32, %c0_i32_0 : i32, i32
  }
  func.func @transform_2(%arg0: i32) -> (i32, i32) {
    %c0_i32 = arith.constant 0 : i32
    %c0_i32_0 = arith.constant 0 : i32
    %c0_i32_1 = arith.constant 0 : i32
    return %c0_i32, %c0_i32_0 : i32, i32
  }
  func.func @transform_3(%arg0: i32) -> (i32, i32) {
    %c0_i32 = arith.constant 0 : i32
    %c0_i32_0 = arith.constant 0 : i32
    %c0_i32_1 = arith.constant 0 : i32
    return %c0_i32, %c0_i32_0 : i32, i32
  }
  func.func @transform_4(%arg0: i32) -> (i32, i32) {
    %c0_i32 = arith.constant 0 : i32
    %c0_i32_0 = arith.constant 0 : i32
    %c0_i32_1 = arith.constant 0 : i32
    return %c0_i32, %c0_i32_0 : i32, i32
  }
  func.func @transform_5(%arg0: i32) -> (i32, i32) {
    %c0_i32 = arith.constant 0 : i32
    %c0_i32_0 = arith.constant 0 : i32
    %c0_i32_1 = arith.constant 0 : i32
    return %c0_i32, %c0_i32_0 : i32, i32
  }
  func.func @transform_6(%arg0: i32) -> (i32, i32) {
    %c0_i32 = arith.constant 0 : i32
    %c0_i32_0 = arith.constant 0 : i32
    return %arg0, %c0_i32 : i32, i32
  }
}

</mosaic_0001>

<bundles_post_ra>
// kernel: tpu_custom_call.1
= control target key start
LH: loop header
LB: loop body
LE: loop exit
PB: predicated region body
PF: predicated region fallthrough
CT: control target
= control target key end

     0   :  { %s7717_s0 = inlined_call_operand.vmem [shape: bf16[512,64], index: 0, kind: input, shape index: {}]   ;;  %s7718_s1 = inlined_call_operand.vmem [shape: f32[256,3], index: 1, kind: input, shape index: {}]   ;;  %s7719_s2 = inlined_call_operand.vmem [shape: bf16[64,256], index: 2, kind: input, shape index: {}]   ;;  %s7720_s3 = inlined_call_operand.vmem [shape: f32[1,256], index: 3, kind: input, shape index: {}]   ;;  %s7721_s4 = inlined_call_operand.vmem [shape: bf16[256,128], index: 4, kind: input, shape index: {}]   ;;  %s7722_s5 = inlined_call_operand.vmem [shape: f32[1,128], index: 5, kind: input, shape index: {}]   ;;  %s7723_s6 = inlined_call_operand.hbm [shape: f32[512,128], index: 6, kind: output, shape index: {}]  }
   0x1   :  { %v3888_v0 = vld [vmem:[%s7719_s2 + $0x30] sm:$0xf]  ;;  %v4125_v1 = vld [vmem:[%s7719_s2 + $0x34] sm:$0xf0]  ;;  %v4124_v2 = vld [vmem:[%s7719_s2 + $0x34] sm:$0xf] }
   0x2   :  { %v3889_v3 = vor.u32 %v4125_v1, %v3888_v0  ;;  %v3890_v4 = vld [vmem:[%s7719_s2 + $0x38] sm:$0xf0]  ;;  %v3880_v5 = vld [vmem:[%s7719_s2 + $0x20] sm:$0xf]  ;;  %v4123_v6 = vld [vmem:[%s7719_s2 + $0x24] sm:$0xf0] }
   0x3   :  { %v3893_v7 = vor.u32 %v4124_v2, %v3890_v4  ;;  %v4122_v8 = vld [vmem:[%s7719_s2 + $0x24] sm:$0xf]  ;;  %v3882_v9 = vld [vmem:[%s7719_s2 + $0x28] sm:$0xf0]  ;;  %v3881_v10 = vor.u32 %v4123_v6, %v3880_v5  ;;  %v3872_v12 = vld [vmem:[%s7719_s2 + $0x10] sm:$0xf] }
   0x4   :  { %404 = vmatpush.bf16.msra.mxu0 %v3889_v3  ;;  %v3885_v11 = vor.u32 %v4122_v8, %v3882_v9  ;;  %v4121_v13 = vld [vmem:[%s7719_s2 + $0x14] sm:$0xf0]  ;;  %v4120_v14 = vld [vmem:[%s7719_s2 + $0x14] sm:$0xf]  ;;  %v3874_v15 = vld [vmem:[%s7719_s2 + $0x18] sm:$0xf0] }
   0x5   :  { %573 = vmatpush.bf16.msra.mxu1 %v3893_v7 }
   0x6   :  { %11 = vsyncpa [#allocation3], 0  ;;  %v3873_v16 = vor.u32 %v4121_v13, %v3872_v12  ;;  %v3877_v17 = vor.u32 %v4120_v14, %v3874_v15  ;;  %v3864_v18 = vld [vmem:[%s7719_s2] sm:$0xf]  ;;  %v4119_v19 = vld [vmem:[%s7719_s2 + $0x4] sm:$0xf0] }
   0x7   :  { %v4118_v20 = vld [vmem:[%s7719_s2 + $0x4] sm:$0xf]  ;;  %v3866_v21 = vld [vmem:[%s7719_s2 + $0x8] sm:$0xf0]  ;;  %v3865_v22 = vor.u32 %v4119_v19, %v3864_v18  ;;  %vm303_vm0 = vcmask 523264   ;;  %v4088_v26 = vld [vmem:[%s7717_s0 + $0x10] sm:$0xff] }
   0x8   :  { %405 = vmatpush.bf16.msra.mxu0 %v3881_v10  ;;  %v3869_v23 = vor.u32 %v4118_v20, %v3866_v21  ;;  %v4086_v24 = vld [vmem:[%s7717_s0] sm:$0xff]  ;;  %v4087_v25 = vld [vmem:[%s7717_s0 + $0x8] sm:$0xff]  ;;  %v4089_v27 = vld [vmem:[%s7717_s0 + $0x18] sm:$0xff]  ;;  %vm2136_vm15 = vcmask 23552   ;;  %s3722_s19 = sshll.u32 %s7723_s6, 4  ;;  %s4566_s20 = smov 128   ;;  %s3723_s19 = int_to_ptr.hbm [resolvable:$true] %s3722_s19 }
   0x9   :  { %574 = vmatpush.bf16.msra.mxu1 %v3885_v11  ;;  %v4090_v28 = vld [vmem:[%s7717_s0 + $0x20] sm:$0xff]  ;;  %v4133_v29 = vld [vmem:[%s7721_s4 + $0x38] sm:$0xff]  ;;  %v4091_v31 = vld [vmem:[%s7717_s0 + $0x28] sm:$0xff]  ;;  %s4567_s6 = smov 8  }
   0xa   :  { %v4141_v30 = vld [vmem:[%s7721_s4 + $0x78] sm:$0xff]  ;;  %1062 = vmatpush.bf16.msra.mxu2 %v4133_v29  ;;  %v4132_v32 = vld [vmem:[%s7721_s4 + $0x30] sm:$0xff]  ;;  %v4131_v34 = vld [vmem:[%s7721_s4 + $0x28] sm:$0xff] }
   0xb   :  { %1231 = vmatpush.bf16.msra.mxu3 %v4141_v30  ;;  %v4140_v33 = vld [vmem:[%s7721_s4 + $0x70] sm:$0xff]  ;;  %v4139_v35 = vld [vmem:[%s7721_s4 + $0x68] sm:$0xff]  ;;  %v4130_v36 = vld [vmem:[%s7721_s4 + $0x20] sm:$0xff] }
   0xc   :  { %406 = vmatpush.bf16.msra.mxu0 %v3873_v16  ;;  %v4138_v37 = vld [vmem:[%s7721_s4 + $0x60] sm:$0xff]  ;;  %v4092_v38 = vld [vmem:[%s7717_s0 + $0x30] sm:$0xff]  ;;  %v4129_v39 = vld [vmem:[%s7721_s4 + $0x18] sm:$0xff] }
   0xd   :  { %575 = vmatpush.bf16.msra.mxu1 %v3877_v17  ;;  %v4137_v40 = vld [vmem:[%s7721_s4 + $0x58] sm:$0xff]  ;;  %v4128_v41 = vld [vmem:[%s7721_s4 + $0x10] sm:$0xff]  ;;  %v4127_v43 = vld [vmem:[%s7721_s4 + $0x8] sm:$0xff] }
   0xe   :  { %1063 = vmatpush.bf16.msra.mxu2 %v4132_v32  ;;  %v4136_v42 = vld [vmem:[%s7721_s4 + $0x50] sm:$0xff]  ;;  %v4135_v44 = vld [vmem:[%s7721_s4 + $0x48] sm:$0xff]  ;;  %v4126_v45 = vld [vmem:[%s7721_s4] sm:$0xff] }
   0xf   :  { %1232 = vmatpush.bf16.msra.mxu3 %v4140_v33  ;;  %v4134_v46 = vld [vmem:[%s7721_s4 + $0x40] sm:$0xff]  ;;  %v4093_v47 = vld [vmem:[%s7717_s0 + $0x38] sm:$0xff]  ;;  %v4095_v2 = vld [vmem:[%s7717_s0 + $0x48] sm:$0xff] }
  0x10   :  { %407 = vmatpush.bf16.msra.mxu0 %v3865_v22  ;;  %v4094_v48 = vld [vmem:[%s7717_s0 + $0x40] sm:$0xff]  ;;  %v4096_v17 = vld [vmem:[%s7717_s0 + $0x50] sm:$0xff]  ;;  %v4097_v32 = vld [vmem:[%s7717_s0 + $0x58] sm:$0xff] }
  0x11   :  { %576 = vmatpush.bf16.msra.mxu1 %v3869_v23  ;;  %v97_v49 = vld [vmem:[%s7720_s3] sm:$0x3] }
  0x12   :  { %1064 = vmatpush.bf16.msra.mxu2 %v4131_v34  ;;  %v4745_v52 = vperm.slane %v97_v49, 0  ;;  %v4748_v53 = vperm.slane %v97_v49, 1 }
  0x13   :  { %3894 = vmatmul.msk.bf16.vlgmr.msra.gmra.mxu0 %vm303_vm0, %v4086_v24  ;;  %1233 = vmatpush.bf16.msra.mxu3 %v4139_v35 }
  0x14   :  { %3926 = vmatmul.msk.bf16.vlgmr.msra.gmra.mxu1 %vm303_vm0, %v4086_v24 }
  0x16   :  { %1065 = vmatpush.bf16.msra.mxu2 %v4130_v36 }
  0x17   :  { %1234 = vmatpush.bf16.msra.mxu3 %v4138_v37 }
  0x1a   :  { %1066 = vmatpush.bf16.msra.mxu2 %v4129_v39 }
  0x1b   :  { %1235 = vmatpush.bf16.msra.mxu3 %v4137_v40 }
  0x1e   :  { %1067 = vmatpush.bf16.msra.mxu2 %v4128_v41 }
  0x1f   :  { %1236 = vmatpush.bf16.msra.mxu3 %v4136_v42 }
  0x22   :  { %1068 = vmatpush.bf16.msra.mxu2 %v4127_v43 }
  0x23   :  { %3895 = vmatmul.msk.bf16.gmra.mxu0 %vm303_vm0, %v4087_v25  ;;  %1237 = vmatpush.bf16.msra.mxu3 %v4135_v44 }
  0x24   :  { %3927 = vmatmul.msk.bf16.gmra.mxu1 %vm303_vm0, %v4087_v25 }
  0x26   :  { %1069 = vmatpush.bf16.msra.mxu2 %v4126_v45 }
  0x27   :  { %1238 = vmatpush.bf16.msra.mxu3 %v4134_v46 }
  0x33   :  { %3896 = vmatmul.msk.bf16.gmra.mxu0 %vm303_vm0, %v4088_v26 }
  0x34   :  { %3928 = vmatmul.msk.bf16.gmra.mxu1 %vm303_vm0, %v4088_v26 }
  0x43   :  { %3897 = vmatmul.msk.bf16.gmra.mxu0 %vm303_vm0, %v4089_v27 }
  0x44   :  { %3929 = vmatmul.msk.bf16.gmra.mxu1 %vm303_vm0, %v4089_v27 }
  0x53   :  { %3898 = vmatmul.msk.bf16.gmra.mxu0 %vm303_vm0, %v4090_v28 }
  0x54   :  { %3930 = vmatmul.msk.bf16.gmra.mxu1 %vm303_vm0, %v4090_v28 }
  0x63   :  { %3899 = vmatmul.msk.bf16.gmra.mxu0 %vm303_vm0, %v4091_v31 }
  0x64   :  { %3931 = vmatmul.msk.bf16.gmra.mxu1 %vm303_vm0, %v4091_v31 }
  0x73   :  { %3900 = vmatmul.msk.bf16.gmra.mxu0 %vm303_vm0, %v4092_v38 }
  0x74   :  { %3932 = vmatmul.msk.bf16.gmra.mxu1 %vm303_vm0, %v4092_v38 }
  0x83   :  { %3901 = vmatmul.msk.bf16.gmra.mxu0 %vm303_vm0, %v4093_v47 }
  0x84   :  { %3933 = vmatmul.msk.bf16.gmra.mxu1 %vm303_vm0, %v4093_v47  ;;  %v4098_v47 = vld [vmem:[%s7717_s0 + $0x60] sm:$0xff] }
  0x90   :  { %v409_v50 = vpop.f32.mrf.mxu0 }
  0x91   :  { %v578_v51 = vpop.f32.mrf.mxu1  ;;  %v410_v54 = vadd.f32 %v409_v50, %v4745_v52 }
  0x92   :  { %v579_v55 = vadd.f32 %v578_v51, %v4748_v53 }
  0x93   :  { %3902 = vmatmul.msk.bf16.gmra.mxu0 %vm303_vm0, %v4094_v48  ;;  %v738_v60 = vmax.f32 %v410_v54, 0.0 }
  0x94   :  { %3934 = vmatmul.msk.bf16.gmra.mxu1 %vm303_vm0, %v4094_v48  ;;  %v739_v62 = vmax.f32 %v579_v55, 0.0 }
  0x98   :  { %v411_v56 = vpop.f32.mrf.mxu0 }
  0x99   :  { %v412_v57 = vadd.f32 %v411_v56, %v4745_v52  ;;  %v580_v58 = vpop.f32.mrf.mxu1 }
  0x9a   :  { %v581_v59 = vadd.f32 %v580_v58, %v4748_v53 }
  0x9b   :  { %v740_v61 = vmax.f32 %v412_v57, 0.0 }
  0x9c   :  { %v741_v63 = vmax.f32 %v581_v59, 0.0 }
  0x9d   :  { %v866_v0 = vpack.c.bf16 %v740_v61, %v738_v60 }
  0x9e   :  { %v867_v1 = vpack.c.bf16 %v741_v63, %v739_v62 }
  0x9f   :  { %1070 = vmatmul.bf16.vlgmr.msra.gmra.mxu2 %v866_v0  ;;  %v4099_v0 = vld [vmem:[%s7717_s0 + $0x68] sm:$0xff] }
  0xa0   :  { %1239 = vmatmul.bf16.vlgmr.msra.gmra.mxu3 %v867_v1  ;;  %v414_v3 = vpop.f32.mrf.mxu0 }
  0xa1   :  { %v583_v4 = vpop.f32.mrf.mxu1  ;;  %v415_v5 = vadd.f32 %v414_v3, %v4745_v52  ;;  %v1400_v3 = vld [vmem:[%s7718_s1] sm:$0xff] }
  0xa2   :  { %v584_v6 = vadd.f32 %v583_v4, %v4748_v53  ;;  %v1432_v4 = vmax.f32 %v1400_v3, 0.0 }
  0xa3   :  { %3903 = vmatmul.msk.bf16.gmra.mxu0 %vm303_vm0, %v4095_v2  ;;  %v742_v11 = vmax.f32 %v415_v5, 0.0 }
  0xa4   :  { %3935 = vmatmul.msk.bf16.gmra.mxu1 %vm303_vm0, %v4095_v2  ;;  %v743_v13 = vmax.f32 %v584_v6, 0.0  ;;  %v4799_v5 = vmin.f32 %v1432_v4, 1.0 }
  0xa8   :  { %v416_v7 = vpop.f32.mrf.mxu0 }
  0xa9   :  { %v417_v8 = vadd.f32 %v416_v7, %v4745_v52  ;;  %v585_v9 = vpop.f32.mrf.mxu1  ;;  %v1528_v7 = vsub.f32 1.0, %v4799_v5 }
  0xaa   :  { %v586_v10 = vadd.f32 %v585_v9, %v4748_v53 }
  0xab   :  { %v744_v12 = vmax.f32 %v417_v8, 0.0 }
  0xac   :  { %v745_v14 = vmax.f32 %v586_v10, 0.0 }
  0xad   :  { %v868_v15 = vpack.c.bf16 %v744_v12, %v742_v11  ;;  %v4805_v12 = vmax.f32 %v1528_v7, 1e-05 }
  0xae   :  { %v869_v16 = vpack.c.bf16 %v745_v14, %v743_v13  ;;  %v1401_v14 = vld [vmem:[%s7718_s1 + $0x8] sm:$0xff] }
  0xaf   :  { %1075 = vmatmul.bf16.gmra.mxu2 %v868_v15  ;;  %4148 = vrcp.f32 %v4805_v12  ;;  %vm1597_vm1 = vweird.f32 %v4805_v12 }
  0xb0   :  { %1244 = vmatmul.bf16.gmra.mxu3 %v869_v16  ;;  %v419_v18 = vpop.f32.mrf.mxu0 }
  0xb1   :  { %v588_v19 = vpop.f32.mrf.mxu1  ;;  %v420_v20 = vadd.f32 %v419_v18, %v4745_v52 }
  0xb2   :  { %v589_v21 = vadd.f32 %v588_v19, %v4748_v53 }
  0xb3   :  { %3904 = vmatmul.msk.bf16.gmra.mxu0 %vm303_vm0, %v4096_v17  ;;  %v746_v26 = vmax.f32 %v420_v20, 0.0 }
  0xb4   :  { %3936 = vmatmul.msk.bf16.gmra.mxu1 %vm303_vm0, %v4096_v17  ;;  %v747_v28 = vmax.f32 %v589_v21, 0.0  ;;  %v1433_v17 = vmax.f32 %v1401_v14, 0.0 }
  0xb6   :  { %v4812_v21 = vmin.f32 %v1433_v17, 1.0 }
  0xb8   :  { %v421_v22 = vpop.f32.mrf.mxu0 }
  0xb9   :  { %v422_v23 = vadd.f32 %v421_v22, %v4745_v52  ;;  %v590_v24 = vpop.f32.mrf.mxu1 }
  0xba   :  { %v591_v25 = vadd.f32 %v590_v24, %v4748_v53  ;;  %v1529_v24 = vsub.f32 1.0, %v4812_v21 }
  0xbb   :  { %v748_v27 = vmax.f32 %v422_v23, 0.0  ;;  %v4100_v23 = vld [vmem:[%s7717_s0 + $0x70] sm:$0xff] }
  0xbc   :  { %v749_v29 = vmax.f32 %v591_v25, 0.0 }
  0xbd   :  { %v870_v30 = vpack.c.bf16 %v748_v27, %v746_v26  ;;  %v4149_v26 = vpop.eup %4148 }
  0xbe   :  { %v871_v31 = vpack.c.bf16 %v749_v29, %v747_v28  ;;  %v4818_v28 = vmax.f32 %v1529_v24, 1e-05  ;;  %v1593_v29 = vmul.f32 %v4149_v26, %v4805_v12  ;;  %vm1598_vm2 = vweird.f32 %v4149_v26 }
  0xbf   :  { %1080 = vmatmul.bf16.gmra.mxu2 %v870_v30  ;;  %v1402_v30 = vld [vmem:[%s7718_s1 + $0x10] sm:$0xff]  ;;  %vm4847_vm3 = vmor %vm1597_vm1, %vm1598_vm2 }
  0xc0   :  { %1249 = vmatmul.bf16.gmra.mxu3 %v871_v31  ;;  %v424_v33 = vpop.f32.mrf.mxu0  ;;  %4150 = vrcp.f32 %v4818_v28  ;;  %v1434_v31 = vmax.f32 %v1402_v30, 0.0  ;;  %vm1612_vm5 = vweird.f32 %v4818_v28 }
  0xc1   :  { %v593_v34 = vpop.f32.mrf.mxu1  ;;  %v425_v35 = vadd.f32 %v424_v33, %v4745_v52 }
  0xc2   :  { %v594_v36 = vadd.f32 %v593_v34, %v4748_v53  ;;  %v4828_v34 = vmin.f32 %v1434_v31, 1.0 }
  0xc3   :  { %3905 = vmatmul.msk.bf16.gmra.mxu0 %vm303_vm0, %v4097_v32  ;;  %v750_v41 = vmax.f32 %v425_v35, 0.0 }
  0xc4   :  { %3937 = vmatmul.msk.bf16.gmra.mxu1 %vm303_vm0, %v4097_v32  ;;  %v751_v43 = vmax.f32 %v594_v36, 0.0  ;;  %v1594_v32 = vsub.f32 1.0, %v1593_v29  ;;  %v1530_v36 = vsub.f32 1.0, %v4828_v34  ;;  %v1497_v29 = vmax.f32 %v4812_v21, 1e-05 }
  0xc8   :  { %v426_v37 = vpop.f32.mrf.mxu0 }
  0xc9   :  { %v427_v38 = vadd.f32 %v426_v37, %v4745_v52  ;;  %v595_v39 = vpop.f32.mrf.mxu1 }
  0xca   :  { %v596_v40 = vadd.f32 %v595_v39, %v4748_v53  ;;  %v4832_v39 = vpop.eup %4150 }
  0xcb   :  { %v752_v42 = vmax.f32 %v427_v38, 0.0  ;;  %v1595_v38 = vmul.f32 %v4149_v26, %v1594_v32  ;;  %vm1613_vm6 = vweird.f32 %v4832_v39 }
  0xcc   :  { %v753_v44 = vmax.f32 %v596_v40, 0.0  ;;  %vm4877_vm7 = vmor %vm1612_vm5, %vm1613_vm6 }
  0xcd   :  { %v872_v45 = vpack.c.bf16 %v752_v42, %v750_v41 }
  0xce   :  { %v873_v46 = vpack.c.bf16 %v753_v44, %v751_v43  ;;  %v4835_v43 = vmax.f32 %v1530_v36, 1e-05 }
  0xcf   :  { %1085 = vmatmul.bf16.gmra.mxu2 %v872_v45 }
  0xd0   :  { %1254 = vmatmul.bf16.gmra.mxu3 %v873_v46  ;;  %v429_v48 = vpop.f32.mrf.mxu0  ;;  %4152 = vrcp.f32 %v4835_v43  ;;  %vm1627_vm9 = vweird.f32 %v4835_v43 }
  0xd1   :  { %v598_v49 = vpop.f32.mrf.mxu1  ;;  %v430_v50 = vadd.f32 %v429_v48, %v4745_v52  ;;  %v1608_v48 = vmul.f32 %v4832_v39, %v4818_v28 }
  0xd2   :  { %v599_v51 = vadd.f32 %v598_v49, %v4748_v53  ;;  %v1403_v49 = vld [vmem:[%s7718_s1 + $0x18] sm:$0xff] }
  0xd3   :  { %3906 = vmatmul.msk.bf16.gmra.mxu0 %vm303_vm0, %v4098_v47  ;;  %v754_v58 = vmax.f32 %v430_v50, 0.0 }
  0xd4   :  { %3938 = vmatmul.msk.bf16.gmra.mxu1 %vm303_vm0, %v4098_v47  ;;  %v755_v60 = vmax.f32 %v599_v51, 0.0  ;;  %v1603_v47 = vand.u32 2147483648, %v4805_v12  ;;  %v1596_v51 = vadd.f32 %v4149_v26, %v1595_v38  ;;  %v1405_v38 = vld [vmem:[%s7718_s1 + $0x28] sm:$0xff] }
  0xd8   :  { %v431_v54 = vpop.f32.mrf.mxu0 }
  0xd9   :  { %v432_v55 = vadd.f32 %v431_v54, %v4745_v52  ;;  %v600_v56 = vpop.f32.mrf.mxu1  ;;  %v1601_v54 = vand.u32 2147483647, %v4805_v12  ;;  %v1404_v12 = vld [vmem:[%s7718_s1 + $0x20] sm:$0xff] }
  0xda   :  { %v601_v57 = vadd.f32 %v600_v56, %v4748_v53 }
  0xdb   :  { %v756_v59 = vmax.f32 %v432_v55, 0.0  ;;  %v1435_v55 = vmax.f32 %v1403_v49, 0.0  ;;  %vm1602_vm4 = vcmp.eq.f32.partialorder %v1601_v54, 8.507059e+37 }
  0xdc   :  { %v757_v61 = vmax.f32 %v601_v57, 0.0 }
  0xdd   :  { %v874_v62 = vpack.c.bf16 %v756_v59, %v754_v58  ;;  %v1609_v58 = vsub.f32 1.0, %v1608_v48  ;;  %v1631_v48 = vand.u32 2147483647, %v4835_v43 }
  0xde   :  { %v875_v63 = vpack.c.bf16 %v757_v61, %v755_v60  ;;  %v4851_v60 = vmin.f32 %v1435_v55, 1.0  ;;  %v4101_v61 = vld [vmem:[%s7717_s0 + $0x78] sm:$0xff]  ;;  %v1633_v55 = vand.u32 2147483648, %v4835_v43 }
  0xdf   :  { %1090 = vmatmul.bf16.gmra.mxu2 %v874_v62  ;;  %v1604_v62 = vor.u32 1.1754944e-38, %v1603_v47  ;;  %v1610_v4 = vmul.f32 %v4832_v39, %v1609_v58  ;;  %vm4927_vm12 = vcmp.eq.f32.partialorder %v1631_v48, 8.507059e+37 }
  0xe0   :  { %1259 = vmatmul.bf16.gmra.mxu3 %v875_v63  ;;  %v434_v1 = vpop.f32.mrf.mxu0 }
  0xe1   :  { %v603_v2 = vpop.f32.mrf.mxu1  ;;  %v435_v6 = vadd.f32 %v434_v1, %v4745_v52  ;;  %v1531_v1 = vsub.f32 1.0, %v4851_v60 }
  0xe2   :  { %v604_v8 = vadd.f32 %v603_v2, %v4748_v53  ;;  %v4859_v2 = vpop.eup %4152 }
  0xe3   :  { %3907 = vmatmul.msk.bf16.gmra.mxu0 %vm303_vm0, %v4099_v0  ;;  %v758_v15 = vmax.f32 %v435_v6, 0.0  ;;  %v1496_v6 = vmax.f32 %v4799_v5, 1e-05  ;;  %v1616_v5 = vand.u32 2147483647, %v4818_v28  ;;  %vm1628_vm10 = vweird.f32 %v4859_v2 }
  0xe4   :  { %3939 = vmatmul.msk.bf16.gmra.mxu1 %vm303_vm0, %v4099_v0  ;;  %v759_v18 = vmax.f32 %v604_v8, 0.0  ;;  %v1600_v0 = vsel %vm4847_vm3, %v4149_v26, %v1596_v51  ;;  %v4866_v8 = vmax.f32 %v1531_v1, 1e-05  ;;  %vm4916_vm11 = vmor %vm1627_vm9, %vm1628_vm10 }
  0xe5   :  { %v1605_v7 = vsel %vm1602_vm4, %v1604_v62, %v1600_v0  ;;  %vm1617_vm8 = vcmp.eq.f32.partialorder %v1616_v5, 8.507059e+37  ;;  %v1634_v62 = vor.u32 1.1754944e-38, %v1633_v55 }
  0xe6   :  { %4154 = vrcp.f32 %v4866_v8  ;;  %vm1642_vm13 = vweird.f32 %v4866_v8  ;;  %v1648_v1 = vand.u32 2147483648, %v4866_v8 }
  0xe8   :  { %v436_v9 = vpop.f32.mrf.mxu0 }
  0xe9   :  { %v437_v10 = vadd.f32 %v436_v9, %v4745_v52  ;;  %v605_v11 = vpop.f32.mrf.mxu1  ;;  %v1618_v9 = vand.u32 2147483648, %v4818_v28 }
  0xea   :  { %v606_v13 = vadd.f32 %v605_v11, %v4748_v53  ;;  %v1611_v11 = vadd.f32 %v4832_v39, %v1610_v4  ;;  %v2169_v4 = vlaneseq }
  0xeb   :  { %v760_v16 = vmax.f32 %v437_v10, 0.0  ;;  %v1623_v10 = vmul.f32 %v4859_v2, %v4835_v43 }
  0xec   :  { %v761_v19 = vmax.f32 %v606_v13, 0.0  ;;  %v1606_v13 = vmul.f32 %v1605_v7, %v1496_v6  ;;  %v1615_v24 = vsel %vm4877_vm7, %v4832_v39, %v1611_v11  ;;  %v4890_v30 = vpop.eup %4154  ;;  %v1646_v7 = vand.u32 2147483647, %v4866_v8 }
  0xed   :  { %v876_v20 = vpack.c.bf16 %v760_v16, %v758_v15  ;;  %vm1643_vm14 = vweird.f32 %v4890_v30 }
  0xee   :  { %v877_v22 = vpack.c.bf16 %v761_v19, %v759_v18  ;;  %v1619_v18 = vor.u32 1.1754944e-38, %v1618_v9  ;;  %v1624_v19 = vsub.f32 1.0, %v1623_v10  ;;  %4156 = vlog2.f32 %v1606_v13  ;;  %vm4945_vm1 = vmor %vm1642_vm13, %vm1643_vm14 }
  0xef   :  { %1095 = vmatmul.bf16.gmra.mxu2 %v876_v20  ;;  %v1436_v20 = vmax.f32 %v1404_v12, 0.0  ;;  %vm1647_vm2 = vcmp.eq.f32.partialorder %v1646_v7, 8.507059e+37 }
  0xf0   :  { %1264 = vmatmul.bf16.gmra.mxu3 %v877_v22  ;;  %v439_v25 = vpop.f32.mrf.mxu0  ;;  %v1620_v32 = vsel %vm1617_vm8, %v1619_v18, %v1615_v24 }
  0xf1   :  { %v608_v27 = vpop.f32.mrf.mxu1  ;;  %v440_v33 = vadd.f32 %v439_v25, %v4745_v52 }
  0xf2   :  { %v609_v35 = vadd.f32 %v608_v27, %v4748_v53 }
  0xf3   :  { %3908 = vmatmul.msk.bf16.gmra.mxu0 %vm303_vm0, %v4100_v23  ;;  %v762_v40 = vmax.f32 %v440_v33, 0.0  ;;  %v1625_v33 = vmul.f32 %v4859_v2, %v1624_v19  ;;  %v1499_v19 = vmax.f32 %v4851_v60, 1e-05 }
  0xf4   :  { %3940 = vmatmul.msk.bf16.gmra.mxu1 %vm303_vm0, %v4100_v23  ;;  %v763_v44 = vmax.f32 %v609_v35, 0.0  ;;  %v4893_v35 = vmin.f32 %v1436_v20, 1.0  ;;  %v1649_v20 = vor.u32 1.1754944e-38, %v1648_v1 }
  0xf5   :  { %v1626_v47 = vadd.f32 %v4859_v2, %v1625_v33 }
  0xf6   :  { %v1532_v21 = vsub.f32 1.0, %v4893_v35 }
  0xf7   :  { %v1630_v58 = vsel %vm4916_vm11, %v4859_v2, %v1626_v47 }
  0xf8   :  { %v441_v37 = vpop.f32.mrf.mxu0  ;;  %v4908_v49 = vmax.f32 %v1532_v21, 1e-05 }
  0xf9   :  { %v442_v41 = vadd.f32 %v441_v37, %v4745_v52  ;;  %v610_v42 = vpop.f32.mrf.mxu1  ;;  %v1638_v37 = vmul.f32 %v4890_v30, %v4866_v8 }
  0xfa   :  { %v611_v45 = vadd.f32 %v610_v42, %v4748_v53  ;;  %v1621_v42 = vmul.f32 %v1620_v32, %v1497_v29  ;;  %vm1657_vm3 = vweird.f32 %v4908_v49  ;;  %v1661_v60 = vand.u32 2147483647, %v4908_v49  ;;  %v1407_v29 = vld [vmem:[%s7718_s1 + $0x38] sm:$0xff] }
  0xfb   :  { %v764_v46 = vmax.f32 %v442_v41, 0.0  ;;  %v4102_v41 = vld [vmem:[%s7717_s0 + $0x80] sm:$0xff] }
  0xfc   :  { %v765_v50 = vmax.f32 %v611_v45, 0.0  ;;  %v4157_v45 = vpop.eup %4156  ;;  %4158 = vlog2.f32 %v1621_v42  ;;  %vm4996_vm6 = vcmp.eq.f32.partialorder %v1661_v60, 8.507059e+37 }
  0xfd   :  { %v878_v56 = vpack.c.bf16 %v764_v46, %v762_v40  ;;  %v1437_v40 = vmax.f32 %v1405_v38, 0.0  ;;  %4160 = vrcp.f32 %v4908_v49 }
  0xfe   :  { %v879_v59 = vpack.c.bf16 %v765_v50, %v763_v44  ;;  %v1639_v44 = vsub.f32 1.0, %v1638_v37  ;;  %v4976_v37 = vld [vmem:[%s7722_s5] ss:$0 sm:$0xff] }
  0xff   :  { %1100 = vmatmul.bf16.gmra.mxu2 %v878_v56  ;;  %v4910_v50 = vmin.f32 %v1437_v40, 1.0  ;;  %v2073_v56 = vmul.f32 0.6931472, %v4157_v45 }
 0x100   :  { %1269 = vmatmul.bf16.gmra.mxu3 %v879_v59  ;;  %v444_v63 = vpop.f32.mrf.mxu0  ;;  %v1640_v57 = vmul.f32 %v4890_v30, %v1639_v44 }
 0x101   :  { %v613_v3 = vpop.f32.mrf.mxu1  ;;  %v445_v15 = vadd.f32 %v444_v63, %v4745_v52  ;;  %v1533_v43 = vsub.f32 1.0, %v4910_v50  ;;  %v1406_v63 = vld [vmem:[%s7718_s1 + $0x30] sm:$0xff]  ;;  %v4979_v38 = vsel %vm2136_vm15, %v2073_v56, 0.0 }
 0x102   :  { %v614_v16 = vadd.f32 %v613_v3, %v4748_v53  ;;  %v1438_v3 = vmax.f32 %v1406_v63, 0.0  ;;  %v1641_v6 = vadd.f32 %v4890_v30, %v1640_v57  ;;  %v4159_v5 = vpop.eup %4158 }
 0x103   :  { %3909 = vmatmul.msk.bf16.gmra.mxu0 %vm303_vm0, %v4101_v61  ;;  %v766_v26 = vmax.f32 %v445_v15, 0.0  ;;  %v4941_v2 = vmax.f32 %v1533_v43, 1e-05  ;;  %v1498_v15 = vmax.f32 %v4828_v34, 1e-05  ;;  %v4161_v8 = vpop.eup %4160  ;;  %v1663_v34 = vand.u32 2147483648, %v4908_v49 }
 0x104   :  { %3941 = vmatmul.msk.bf16.gmra.mxu1 %vm303_vm0, %v4101_v61  ;;  %v767_v27 = vmax.f32 %v614_v16, 0.0  ;;  %v4950_v11 = vmin.f32 %v1438_v3, 1.0  ;;  %v1635_v16 = vsel %vm4927_vm12, %v1634_v62, %v1630_v58  ;;  %v1653_v24 = vmul.f32 %v4161_v8, %v4908_v49 }
 0x105   :  { %4162 = vrcp.f32 %v4941_v2  ;;  %vm1658_vm4 = vweird.f32 %v4161_v8  ;;  %v2075_v21 = vmul.f32 0.6931472, %v4159_v5  ;;  %v1636_v44 = vmul.f32 %v1635_v16, %v1498_v15 }
 0x106   :  { %vm4989_vm5 = vmor %vm1657_vm3, %vm1658_vm4  ;;  %v5000_v58 = vand.u32 127, %v2169_v4  ;;  %v1500_v49 = vmax.f32 %v4893_v35, 1e-05  ;;  %v1678_v59 = vand.u32 2147483648, %v4941_v2  ;;  %vm1672_vm7 = vweird.f32 %v4941_v2 }
 0x107   :  { %v5013_v35 = vsel %vm2136_vm15, %v2075_v21, 0.0  ;;  %v1676_v10 = vand.u32 2147483647, %v4941_v2  ;;  %v1502_v55 = vmax.f32 %v4950_v11, 1e-05 }
 0x108   :  { %v446_v17 = vpop.f32.mrf.mxu0  ;;  %v1679_v5 = vor.u32 1.1754944e-38, %v1678_v59  ;;  %vm2172_vm14 = vcmp.eq.s32.totalorder %v5000_v58, 1 }
 0x109   :  { %v447_v22 = vadd.f32 %v446_v17, %v4745_v52  ;;  %v615_v23 = vpop.f32.mrf.mxu1  ;;  %vm1677_vm10 = vcmp.eq.f32.partialorder %v1676_v10, 8.507059e+37 }
 0x10a   :  { %v616_v25 = vadd.f32 %v615_v23, %v4748_v53  ;;  %v1645_v23 = vsel %vm4945_vm1, %v4890_v30, %v1641_v6 }
 0x10b   :  { %v768_v28 = vmax.f32 %v447_v22, 0.0  ;;  %v4969_v30 = vpop.eup %4162  ;;  %v1650_v32 = vsel %vm1647_vm2, %v1649_v20, %v1645_v23  ;;  %vm2171_vm2 = vcmp.eq.s32.totalorder %v5000_v58, 0 }
 0x10c   :  { %v769_v31 = vmax.f32 %v616_v25, 0.0  ;;  %vm1673_vm8 = vweird.f32 %v4969_v30 }
 0x10d   :  { %v880_v36 = vpack.c.bf16 %v768_v28, %v766_v26  ;;  %v1534_v26 = vsub.f32 1.0, %v4950_v11  ;;  %v1654_v28 = vsub.f32 1.0, %v1653_v24  ;;  %vm1674_vm9 = vmor %vm1672_vm7, %vm1673_vm8  ;;  %vm3457_vm8 = vcmp.lt.s32.totalorder %v5000_v58, 3 }
 0x10e   :  { %v881_v39 = vpack.c.bf16 %v769_v31, %v767_v27 }
 0x10f   :  { %1105 = vmatmul.bf16.gmra.mxu2 %v880_v36  ;;  %v4971_v33 = vmax.f32 %v1534_v26, 1e-05  ;;  %v1439_v36 = vmax.f32 %v1407_v29, 0.0  ;;  %v1655_v40 = vmul.f32 %v4161_v8, %v1654_v28 }
 0x110   :  { %1274 = vmatmul.bf16.gmra.mxu3 %v881_v39  ;;  %v449_v46 = vpop.f32.mrf.mxu0  ;;  %v4103_v39 = vld [vmem:[%s7717_s0 + $0x88] sm:$0xff] }
 0x111   :  { %v618_v51 = vpop.f32.mrf.mxu1  ;;  %v450_v61 = vadd.f32 %v449_v46, %v4745_v52  ;;  %v1664_v46 = vor.u32 1.1754944e-38, %v1663_v34  ;;  %4164 = vrcp.f32 %v4971_v33  ;;  %v4994_v47 = vmin.f32 %v1439_v36, 1.0 }
 0x112   :  { %v619_v0 = vadd.f32 %v618_v51, %v4748_v53  ;;  %v1651_v51 = vmul.f32 %v1650_v32, %v1499_v19  ;;  %v1656_v54 = vadd.f32 %v4161_v8, %v1655_v40  ;;  %4166 = vlog2.f32 %v1636_v44 }
 0x113   :  { %3910 = vmatmul.msk.bf16.gmra.mxu0 %vm303_vm0, %v4102_v41  ;;  %v770_v12 = vmax.f32 %v450_v61, 0.0  ;;  %v1535_v43 = vsub.f32 1.0, %v4994_v47  ;;  %v1693_v28 = vand.u32 2147483648, %v4971_v33  ;;  %vm1687_vm11 = vweird.f32 %v4971_v33 }
 0x114   :  { %3942 = vmatmul.msk.bf16.gmra.mxu1 %vm303_vm0, %v4102_v41  ;;  %v771_v17 = vmax.f32 %v619_v0, 0.0  ;;  %v1668_v41 = vmul.f32 %v4969_v30, %v4941_v2  ;;  %v1660_v0 = vsel %vm4989_vm5, %v4161_v8, %v1656_v54  ;;  %4168 = vlog2.f32 %v1651_v51  ;;  %v1408_v8 = vld [vmem:[%s7718_s1 + $0x40] sm:$0xff]  ;;  %v4104_v54 = vld [vmem:[%s7717_s0 + $0x90] sm:$0xff] }
 0x115   :  { %v1665_v3 = vsel %vm4996_vm6, %v1664_v46, %v1660_v0  ;;  %v1440_v60 = vmax.f32 %v1408_v8, 0.0  ;;  %v1691_v46 = vand.u32 2147483647, %v4971_v33  ;;  %v4563_v0 = vmov 8.0  }
 0x116   :  { %v1669_v56 = vsub.f32 1.0, %v1668_v41  ;;  %v1666_v15 = vmul.f32 %v1665_v3, %v1500_v49  ;;  %v4564_v3 = vmov -5.0  }
 0x117   :  { %vm1692_vm1 = vcmp.eq.f32.partialorder %v1691_v46, 8.507059e+37  ;;  %v5067_v59 = vmin.f32 %v1440_v60, 1.0 }
 0x118   :  { %v451_v9 = vpop.f32.mrf.mxu0  ;;  %v1670_v1 = vmul.f32 %v4969_v30, %v1669_v56 }
 0x119   :  { %v452_v13 = vadd.f32 %v451_v9, %v4745_v52  ;;  %v620_v14 = vpop.f32.mrf.mxu1  ;;  %v5022_v9 = vpop.eup %4164 }
 0x11a   :  { %v621_v18 = vadd.f32 %v620_v14, %v4748_v53  ;;  %v1671_v7 = vadd.f32 %v4969_v30, %v1670_v1  ;;  %v1683_v16 = vmul.f32 %v5022_v9, %v4971_v33  ;;  %vm1688_vm12 = vweird.f32 %v5022_v9 }
 0x11b   :  { %v772_v22 = vmax.f32 %v452_v13, 0.0  ;;  %vm5048_vm13 = vmor %vm1687_vm11, %vm1688_vm12  ;;  %v2173_v1 = vsel %vm2172_vm14, 108.0, %v4563_v0 }
 0x11c   :  { %v773_v25 = vmax.f32 %v621_v18, 0.0  ;;  %v1501_v18 = vmax.f32 %v4910_v50, 1e-05  ;;  %v1675_v2 = vsel %vm1674_vm9, %v4969_v30, %v1671_v7  ;;  %v1684_v24 = vsub.f32 1.0, %v1683_v16 }
 0x11d   :  { %v882_v27 = vpack.c.bf16 %v772_v22, %v770_v12  ;;  %v5026_v12 = vmax.f32 %v1535_v43, 1e-05  ;;  %v1680_v23 = vsel %vm1677_vm10, %v1679_v5, %v1675_v2 }
 0x11e   :  { %v883_v31 = vpack.c.bf16 %v773_v25, %v771_v17  ;;  %v4167_v25 = vpop.eup %4166  ;;  %v1685_v32 = vmul.f32 %v5022_v9, %v1684_v24 }
 0x11f   :  { %1110 = vmatmul.bf16.gmra.mxu2 %v882_v27  ;;  %4170 = vrcp.f32 %v5026_v12  ;;  %v4169_v50 = vpop.eup %4168  ;;  %v2077_v49 = vmul.f32 0.6931472, %v4167_v25  ;;  %vm1702_vm3 = vweird.f32 %v5026_v12 }
 0x120   :  { %1279 = vmatmul.bf16.gmra.mxu3 %v883_v31  ;;  %v454_v42 = vpop.f32.mrf.mxu0  ;;  %v1686_v41 = vadd.f32 %v5022_v9, %v1685_v32  ;;  %v2079_v11 = vmul.f32 0.6931472, %v4169_v50  ;;  %v1706_v50 = vand.u32 2147483647, %v5026_v12 }
 0x121   :  { %v623_v48 = vpop.f32.mrf.mxu1  ;;  %v455_v61 = vadd.f32 %v454_v42, %v4745_v52  ;;  %v5081_v8 = vsel %vm2136_vm15, %v2077_v49, 0.0 }
 0x122   :  { %v1071_v57 = vpop.f32.mrf.mxu2  ;;  %v624_v4 = vadd.f32 %v623_v48, %v4748_v53  ;;  %v1694_v48 = vor.u32 1.1754944e-38, %v1693_v28  ;;  %v1690_v56 = vsel %vm5048_vm13, %v5022_v9, %v1686_v41  ;;  %vm5125_vm6 = vcmp.eq.f32.partialorder %v1706_v50, 8.507059e+37 }
 0x123   :  { %v1072_v62 = vadd.f32 %v4976_v37, %v1071_v57  ;;  %v1240_v63 = vpop.f32.mrf.mxu3  ;;  %3911 = vmatmul.msk.bf16.gmra.mxu0 %vm303_vm0, %v4103_v39  ;;  %v774_v13 = vmax.f32 %v455_v61, 0.0 }
 0x124   :  { %3943 = vmatmul.msk.bf16.gmra.mxu1 %vm303_vm0, %v4103_v39  ;;  %v775_v34 = vmax.f32 %v624_v4, 0.0  ;;  %v1681_v39 = vmul.f32 %v1680_v23, %v1501_v18  ;;  %v2175_v4 = vsel %vm2172_vm14, -54.0, %v4564_v3  ;;  %v5087_v18 = vsel %vm2171_vm2, 108.0, %v2173_v1 }
 0x125   :  { %v5019_v6 = vadd.f32 %v1240_v63, %v1072_v62  ;;  %v5052_v44 = vpop.eup %4170  ;;  %v1695_v63 = vsel %vm1692_vm1, %v1694_v48, %v1690_v56  ;;  %v5091_v2 = vsel %vm2171_vm2, -54.0, %v2175_v4 }
 0x126   :  { %v1698_v57 = vmul.f32 %v5052_v44, %v5026_v12  ;;  %vm1703_vm4 = vweird.f32 %v5052_v44 }
 0x127   :  { %v2177_v14 = vadd.f32 %v4979_v38, %v5019_v6  ;;  %vm5111_vm5 = vmor %vm1702_vm3, %vm1703_vm4 }
 0x128   :  { %v456_v17 = vpop.f32.mrf.mxu0  ;;  %v1699_v10 = vsub.f32 1.0, %v1698_v57 }
 0x129   :  { %v4022_v19 = vmul.f32 -1.442695, %v2177_v14  ;;  %v457_v20 = vadd.f32 %v456_v17, %v4745_v52  ;;  %v625_v22 = vpop.f32.mrf.mxu1  ;;  %v1536_v17 = vsub.f32 1.0, %v5067_v59 }
 0x12a   :  { %v626_v26 = vadd.f32 %v625_v22, %v4748_v53  ;;  %v1073_v27 = vpop.f32.mrf.mxu2  ;;  %v1700_v25 = vmul.f32 %v5052_v44, %v1699_v10  ;;  %v4105_v10 = vld [vmem:[%s7717_s0 + $0x98] sm:$0xff] }
 0x12b   :  { %4172 = vpow2.f32 %v4022_v19  ;;  %v776_v29 = vmax.f32 %v457_v20, 0.0  ;;  %v1074_v30 = vadd.f32 %v4976_v37, %v1073_v27  ;;  %v1242_v31 = vpop.f32.mrf.mxu3  ;;  %v5096_v20 = vsel %vm2136_vm15, %v2079_v11, 0.0 }
 0x12c   :  { %v777_v36 = vmax.f32 %v626_v26, 0.0  ;;  %4174 = vlog2.f32 %v1666_v15  ;;  %v1696_v15 = vmul.f32 %v1695_v63, %v1502_v55  ;;  %v1701_v60 = vadd.f32 %v5052_v44, %v1700_v25 }
 0x12d   :  { %v5045_v21 = vadd.f32 %v1242_v31, %v1074_v30  ;;  %v884_v40 = vpack.c.bf16 %v776_v29, %v774_v13  ;;  %4176 = vlog2.f32 %v1681_v39  ;;  %v5107_v29 = vmax.f32 %v1536_v17, 1e-05 }
 0x12e   :  { %v885_v45 = vpack.c.bf16 %v777_v36, %v775_v34  ;;  %v1708_v34 = vand.u32 2147483648, %v5026_v12 }
 0x12f   :  { %v2178_v51 = vadd.f32 %v5013_v35, %v5045_v21  ;;  %1115 = vmatmul.bf16.gmra.mxu2 %v884_v40  ;;  %vm1717_vm14 = vweird.f32 %v5107_v29 }
 0x130   :  { %1284 = vmatmul.bf16.gmra.mxu3 %v885_v45  ;;  %v459_v33 = vpop.f32.mrf.mxu0  ;;  %v1709_v56 = vor.u32 1.1754944e-38, %v1708_v34 }
 0x131   :  { %v4173_v43 = vpop.eup %4172  ;;  %v4023_v61 = vmul.f32 -1.442695, %v2178_v51  ;;  %v628_v62 = vpop.f32.mrf.mxu1  ;;  %v460_v16 = vadd.f32 %v459_v33, %v4745_v52  ;;  %v1705_v33 = vsel %vm5111_vm5, %v5052_v44, %v1701_v60  ;;  %v1503_v44 = vmax.f32 %v4994_v47, 1e-05 }
 0x132   :  { %v5074_v7 = vadd.f32 1.0, %v4173_v43  ;;  %v1076_v9 = vpop.f32.mrf.mxu2  ;;  %v4175_v5 = vpop.eup %4174  ;;  %v629_v23 = vadd.f32 %v628_v62, %v4748_v53 }
 0x133   :  { %4178 = vpow2.f32 %v4023_v61  ;;  %v1077_v13 = vadd.f32 %v4976_v37, %v1076_v9  ;;  %v1245_v14 = vpop.f32.mrf.mxu3  ;;  %3912 = vmatmul.msk.bf16.gmra.mxu0 %vm303_vm0, %v4104_v54  ;;  %v4177_v22 = vpop.eup %4176  ;;  %v2081_v24 = vmul.f32 0.6931472, %v4175_v5  ;;  %v778_v27 = vmax.f32 %v460_v16, 0.0 }
 0x134   :  { %4180 = vrcp.f32 %v5074_v7  ;;  %3944 = vmatmul.msk.bf16.gmra.mxu1 %vm303_vm0, %v4104_v54  ;;  %v2506_v31 = vand.u32 2147483647, %v5074_v7  ;;  %v2083_v40 = vmul.f32 0.6931472, %v4177_v22  ;;  %v2508_v45 = vand.u32 2147483648, %v5074_v7 }
 0x135   :  { %v5093_v19 = vadd.f32 %v1245_v14, %v1077_v13  ;;  %4182 = vlog2.f32 %v1696_v15  ;;  %v779_v57 = vmax.f32 %v629_v23, 0.0  ;;  %v5133_v1 = vsel %vm2136_vm15, %v2081_v24, 0.0  ;;  %v5146_v13 = vld [vmem:[%s7718_s1 + $0x50] sm:$0xff] }
 0x136   :  { %4184 = vrcp.f32 %v5107_v29  ;;  %v1710_v5 = vsel %vm5125_vm6, %v1709_v56, %v1705_v33  ;;  %vm2502_vm9 = vweird.f32 %v5074_v7  ;;  %v5153_v16 = vsel %vm2136_vm15, %v2083_v40, 0.0 }
 0x137   :  { %v2179_v26 = vadd.f32 %v5081_v8, %v5093_v19  ;;  %vm5155_vm10 = vcmp.eq.f32.partialorder %v2506_v31, 8.507059e+37  ;;  %v2509_v25 = vor.u32 1.1754944e-38, %v2508_v45  ;;  %v1711_v60 = vmul.f32 %v1710_v5, %v1503_v44 }
 0x138   :  { %v461_v28 = vpop.f32.mrf.mxu0  ;;  %v1442_v50 = vmax.f32 %v5146_v13, 0.0 }
 0x139   :  { %v4179_v30 = vpop.eup %4178  ;;  %v4024_v32 = vmul.f32 -1.442695, %v2179_v26  ;;  %v462_v36 = vadd.f32 %v461_v28, %v4745_v52  ;;  %v630_v39 = vpop.f32.mrf.mxu1 }
 0x13a   :  { %v4181_v42 = vpop.eup %4180  ;;  %v5116_v46 = vadd.f32 1.0, %v4179_v30  ;;  %v631_v12 = vadd.f32 %v630_v39, %v4748_v53  ;;  %v1078_v48 = vpop.f32.mrf.mxu2 }
 0x13b   :  { %v2498_v51 = vmul.f32 %v4181_v42, %v5074_v7  ;;  %4186 = vpow2.f32 %v4024_v32  ;;  %v780_v54 = vmax.f32 %v462_v36, 0.0  ;;  %v1247_v55 = vpop.f32.mrf.mxu3  ;;  %v4183_v43 = vpop.eup %4182  ;;  %v1079_v11 = vadd.f32 %v4976_v37, %v1078_v48 }
 0x13c   :  { %4188 = vrcp.f32 %v5116_v46  ;;  %v781_v62 = vmax.f32 %v631_v12, 0.0  ;;  %vm2503_vm7 = vweird.f32 %v4181_v42  ;;  %v2521_v0 = vand.u32 2147483647, %v5116_v46  ;;  %v5148_v14 = vpop.eup %4184 }
 0x13d   :  { %v2499_v61 = vsub.f32 1.0, %v2498_v51  ;;  %v886_v63 = vpack.c.bf16 %v780_v54, %v778_v27  ;;  %v5136_v4 = vadd.f32 %v1247_v55, %v1079_v11  ;;  %v2523_v47 = vand.u32 2147483648, %v5116_v46  ;;  %vm2504_vm11 = vmor %vm2502_vm9, %vm2503_vm7 }
 0x13e   :  { %v887_v9 = vpack.c.bf16 %v781_v62, %v779_v57  ;;  %v2085_v17 = vmul.f32 0.6931472, %v4183_v43  ;;  %vm2517_vm12 = vweird.f32 %v5116_v46  ;;  %vm5167_vm13 = vcmp.eq.f32.partialorder %v2521_v0, 8.507059e+37 }
 0x13f   :  { %v2500_v3 = vmul.f32 %v4181_v42, %v2499_v61  ;;  %1120 = vmatmul.bf16.gmra.mxu2 %v886_v63  ;;  %v2180_v34 = vadd.f32 %v5096_v20, %v5136_v4  ;;  %v1713_v40 = vmul.f32 %v5148_v14, %v5107_v29  ;;  %v2524_v45 = vor.u32 1.1754944e-38, %v2523_v47 }
 0x140   :  { %v464_v15 = vpop.f32.mrf.mxu0  ;;  %1289 = vmatmul.bf16.gmra.mxu3 %v887_v9  ;;  %v1504_v51 = vmax.f32 %v5067_v59, 1e-05  ;;  %vm1718_vm2 = vweird.f32 %v5148_v14  ;;  %v1721_v62 = vand.u32 2147483647, %v5107_v29 }
 0x141   :  { %v4187_v22 = vpop.eup %4186  ;;  %v2501_v23 = vadd.f32 %v4181_v42, %v2500_v3  ;;  %v633_v26 = vpop.f32.mrf.mxu1  ;;  %v4025_v36 = vmul.f32 -1.442695, %v2180_v34  ;;  %v465_v54 = vadd.f32 %v464_v15, %v4745_v52  ;;  %v1714_v33 = vsub.f32 1.0, %v1713_v40  ;;  %vm5225_vm6 = vmor %vm1717_vm14, %vm1718_vm2 }
 0x142   :  { %v4189_v7 = vpop.eup %4188  ;;  %v5163_v27 = vadd.f32 1.0, %v4187_v22  ;;  %v1081_v28 = vpop.f32.mrf.mxu2  ;;  %v634_v49 = vadd.f32 %v633_v26, %v4748_v53  ;;  %v1723_v15 = vand.u32 2147483648, %v5107_v29  ;;  %vm5235_vm7 = vcmp.eq.f32.partialorder %v1721_v62, 8.507059e+37 }
 0x143   :  { %v2505_v30 = vsel %vm2504_vm11, %v4181_v42, %v2501_v23  ;;  %v2513_v31 = vmul.f32 %v4189_v7, %v5116_v46  ;;  %v1250_v39 = vpop.f32.mrf.mxu3  ;;  %3913 = vmatmul.msk.bf16.gmra.mxu0 %vm303_vm0, %v4105_v10  ;;  %v5179_v42 = vsel %vm2136_vm15, %v2085_v17, 0.0  ;;  %v1082_v55 = vadd.f32 %v4976_v37, %v1081_v28 }
 0x144   :  { %v2510_v41 = vsel %vm5155_vm10, %v2509_v25, %v2505_v30  ;;  %4190 = vrcp.f32 %v5163_v27  ;;  %3945 = vmatmul.msk.bf16.gmra.mxu1 %vm303_vm0, %v4105_v10  ;;  %vm2518_vm1 = vweird.f32 %v4189_v7  ;;  %vm2532_vm3 = vweird.f32 %v5163_v27 }
 0x145   :  { %v3458_v12 = vmul.f32 %v2510_v41, %v5087_v18  ;;  %v2514_v48 = vsub.f32 1.0, %v2513_v31  ;;  %4192 = vpow2.f32 %v4025_v36  ;;  %v5188_v43 = vadd.f32 %v1250_v39, %v1082_v55  ;;  %vm2519_vm4 = vmor %vm2517_vm12, %vm2518_vm1 }
 0x146   :  { %4194 = vlog2.f32 %v1711_v60  ;;  %v2536_v0 = vand.u32 2147483647, %v5163_v27  ;;  %v782_v10 = vmax.f32 %v465_v54, 0.0  ;;  %v1715_v34 = vmul.f32 %v5148_v14, %v1714_v33 }
 0x147   :  { %v3522_v56 = vadd.f32 %v3458_v12, %v5091_v2  ;;  %v2515_v57 = vmul.f32 %v4189_v7, %v2514_v48  ;;  %v2181_v5 = vadd.f32 %v5133_v1, %v5188_v43  ;;  %v2538_v40 = vand.u32 2147483648, %v5163_v27  ;;  %v4106_v48 = vld [vmem:[%s7717_s0 + $0xa0] sm:$0xff] }
 0x148   :  { %v466_v61 = vpop.f32.mrf.mxu0  ;;  %v783_v41 = vmax.f32 %v634_v49, 0.0  ;;  %v1716_v33 = vadd.f32 %v5148_v14, %v1715_v34  ;;  %v1724_v49 = vor.u32 1.1754944e-38, %v1723_v15  ;;  %vm2537_vm10 = vcmp.eq.f32.partialorder %v2536_v0, 8.507059e+37 }
 0x149   :  { %v3588_v11 = vsel %vm3457_vm8, %v3522_v56, %v5019_v6  ;;  %v2516_v63 = vadd.f32 %v4189_v7, %v2515_v57  ;;  %v467_v44 = vadd.f32 %v466_v61, %v4745_v52  ;;  %v635_v3 = vpop.f32.mrf.mxu1  ;;  %v4026_v60 = vmul.f32 -1.442695, %v2181_v5 }
 0x14a   :  { %v4191_v9 = vpop.eup %4190  ;;  %3652 = vst [vmem:[#allocation2] sm:$0xff] %v3588_v11  ;;  %v636_v6 = vadd.f32 %v635_v3, %v4748_v53  ;;  %v1083_v47 = vpop.f32.mrf.mxu2  ;;  %v2539_v3 = vor.u32 1.1754944e-38, %v2538_v40  ;;  %v1720_v5 = vsel %vm5225_vm6, %v5148_v14, %v1716_v33  ;;  %v5257_v14 = vmin.f32 %v1442_v50, 1.0 }
 0x14b   :  { %v4193_v17 = vpop.eup %4192  ;;  %v2520_v22 = vsel %vm2519_vm4, %v4189_v7, %v2516_v63  ;;  %v2528_v23 = vmul.f32 %v4191_v9, %v5163_v27  ;;  %v784_v24 = vmax.f32 %v467_v44, 0.0  ;;  %v1252_v25 = vpop.f32.mrf.mxu3  ;;  %v1084_v39 = vadd.f32 %v4976_v37, %v1083_v47 }
 0x14c   :  { %v4195_v26 = vpop.eup %4194  ;;  %v2525_v46 = vsel %vm5167_vm13, %v2524_v45, %v2520_v22  ;;  %v5209_v28 = vadd.f32 1.0, %v4193_v17  ;;  %v785_v30 = vmax.f32 %v636_v6, 0.0  ;;  %vm2533_vm5 = vweird.f32 %v4191_v9 }
 0x14d   :  { %v3459_v31 = vmul.f32 %v2525_v46, %v5087_v18  ;;  %v2529_v36 = vsub.f32 1.0, %v2528_v23  ;;  %v888_v7 = vpack.c.bf16 %v784_v24, %v782_v10  ;;  %v5216_v45 = vadd.f32 %v1252_v25, %v1084_v39  ;;  %vm2534_vm9 = vmor %vm2532_vm3, %vm2533_vm5 }
 0x14e   :  { %4196 = vrcp.f32 %v5209_v28  ;;  %v889_v55 = vpack.c.bf16 %v785_v30, %v783_v41  ;;  %v2087_v57 = vmul.f32 0.6931472, %v4195_v26  ;;  %v2551_v10 = vand.u32 2147483647, %v5209_v28 }
 0x14f   :  { %v3523_v12 = vadd.f32 %v3459_v31, %v5091_v2  ;;  %v2530_v32 = vmul.f32 %v4191_v9, %v2529_v36  ;;  %4198 = vpow2.f32 %v4026_v60  ;;  %1125 = vmatmul.bf16.gmra.mxu2 %v888_v7  ;;  %v2182_v63 = vadd.f32 %v5153_v16, %v5216_v45  ;;  %v1412_v36 = vld [vmem:[%s7718_s1 + $0x60] sm:$0xff] }
 0x150   :  { %v469_v56 = vpop.f32.mrf.mxu0  ;;  %1294 = vmatmul.bf16.gmra.mxu3 %v889_v55  ;;  %v2553_v62 = vand.u32 2147483648, %v5209_v28  ;;  %v5251_v22 = vsel %vm2136_vm15, %v2087_v57, 0.0  ;;  %v1725_v23 = vsel %vm5235_vm7, %v1724_v49, %v1720_v5  ;;  %vm2547_vm11 = vweird.f32 %v5209_v28 }
 0x151   :  { %v3589_v61 = vsel %vm3457_vm8, %v3523_v12, %v5045_v21  ;;  %v2531_v11 = vadd.f32 %v4191_v9, %v2530_v32  ;;  %v638_v44 = vpop.f32.mrf.mxu1  ;;  %v4027_v47 = vmul.f32 -1.442695, %v2182_v63  ;;  %v470_v26 = vadd.f32 %v469_v56, %v4745_v52 }
 0x152   :  { %3653 = vst [vmem:[#allocation2 + $0x8] sm:$0xff] %v3589_v61  ;;  %v1086_v21 = vpop.f32.mrf.mxu2  ;;  %v1726_v60 = vmul.f32 %v1725_v23, %v1504_v51  ;;  %vm5270_vm12 = vcmp.eq.f32.partialorder %v2551_v10, 8.507059e+37  ;;  %v2554_v31 = vor.u32 1.1754944e-38, %v2553_v62  ;;  %v639_v39 = vadd.f32 %v638_v44, %v4748_v53 }
 0x153   :  { %v2535_v6 = vsel %vm2534_vm9, %v4191_v9, %v2531_v11  ;;  %v1087_v15 = vadd.f32 %v4976_v37, %v1086_v21  ;;  %v1255_v17 = vpop.f32.mrf.mxu3  ;;  %3914 = vmatmul.msk.bf16.gmra.mxu0 %vm303_vm0, %v4106_v48  ;;  %4200 = vpow2.f32 %v4027_v47  ;;  %v1538_v59 = vsub.f32 1.0, %v5257_v14 }
 0x154   :  { %v4197_v27 = vpop.eup %4196  ;;  %v2540_v0 = vsel %vm2537_vm10, %v2539_v3, %v2535_v6  ;;  %3946 = vmatmul.msk.bf16.gmra.mxu1 %vm303_vm0, %v4106_v48  ;;  %v786_v48 = vmax.f32 %v470_v26, 0.0  ;;  %v1444_v56 = vmax.f32 %v1412_v36, 0.0 }
 0x155   :  { %v4199_v9 = vpop.eup %4198  ;;  %v3460_v24 = vmul.f32 %v2540_v0, %v5087_v18  ;;  %v2543_v25 = vmul.f32 %v4197_v27, %v5209_v28  ;;  %v5265_v46 = vadd.f32 %v1255_v17, %v1087_v15  ;;  %vm2548_vm13 = vweird.f32 %v4197_v27  ;;  %v4107_v17 = vld [vmem:[%s7717_s0 + $0xa8] sm:$0xff] }
 0x156   :  { %v5262_v34 = vadd.f32 1.0, %v4199_v9  ;;  %vm2549_vm14 = vmor %vm2547_vm11, %vm2548_vm13  ;;  %v5294_v3 = vmax.f32 %v1538_v59, 1e-05  ;;  %v787_v28 = vmax.f32 %v639_v39, 0.0  ;;  %v5316_v30 = vmin.f32 %v1444_v56, 1.0 }
 0x157   :  { %v3524_v13 = vadd.f32 %v3460_v24, %v5091_v2  ;;  %v2544_v50 = vsub.f32 1.0, %v2543_v25  ;;  %v2183_v41 = vadd.f32 %v5179_v42, %v5265_v46 }
 0x158   :  { %4202 = vrcp.f32 %v5262_v34  ;;  %v471_v7 = vpop.f32.mrf.mxu0  ;;  %v2566_v63 = vand.u32 2147483647, %v5262_v34  ;;  %v2568_v23 = vand.u32 2147483648, %v5262_v34  ;;  %vm2562_vm2 = vweird.f32 %v5262_v34 }
 0x159   :  { %v3590_v51 = vsel %vm3457_vm8, %v3524_v13, %v5093_v19  ;;  %v2545_v40 = vmul.f32 %v4197_v27, %v2544_v50  ;;  %v472_v12 = vadd.f32 %v471_v7, %v4745_v52  ;;  %v640_v32 = vpop.f32.mrf.mxu1  ;;  %4204 = vlog2.f32 %v1726_v60  ;;  %v4201_v57 = vpop.eup %4200 }
 0x15a   :  { %3654 = vst [vmem:[#allocation2 + $0x10] sm:$0xff] %v3590_v51  ;;  %v641_v54 = vadd.f32 %v640_v32, %v4748_v53  ;;  %v1088_v55 = vpop.f32.mrf.mxu2  ;;  %v4028_v49 = vmul.f32 -1.442695, %v2183_v41  ;;  %v5292_v44 = vadd.f32 1.0, %v4201_v57  ;;  %vm5312_vm1 = vcmp.eq.f32.partialorder %v2566_v63, 8.507059e+37 }
 0x15b   :  { %v2546_v33 = vadd.f32 %v4197_v27, %v2545_v40  ;;  %v788_v61 = vmax.f32 %v472_v12, 0.0  ;;  %v1089_v19 = vadd.f32 %v4976_v37, %v1088_v55  ;;  %v1257_v11 = vpop.f32.mrf.mxu3  ;;  %vm1747_vm9 = vweird.f32 %v5294_v3 }
 0x15c   :  { %v789_v29 = vmax.f32 %v641_v54, 0.0  ;;  %4206 = vpow2.f32 %v4028_v49  ;;  %vm2577_vm5 = vweird.f32 %v5292_v44 }
 0x15d   :  { %v2550_v10 = vsel %vm2549_vm14, %v4197_v27, %v2546_v33  ;;  %v5296_v21 = vadd.f32 %v1257_v11, %v1089_v19  ;;  %v890_v5 = vpack.c.bf16 %v788_v61, %v786_v48  ;;  %4208 = vrcp.f32 %v5292_v44 }
 0x15e   :  { %v4203_v6 = vpop.eup %4202  ;;  %v2555_v62 = vsel %vm5270_vm12, %v2554_v31, %v2550_v10  ;;  %v1506_v27 = vmax.f32 %v5257_v14, 1e-05  ;;  %v891_v24 = vpack.c.bf16 %v789_v29, %v787_v28  ;;  %4210 = vrcp.f32 %v5294_v3 }
 0x15f   :  { %v3461_v47 = vmul.f32 %v2555_v62, %v5087_v18  ;;  %v2558_v15 = vmul.f32 %v4203_v6, %v5262_v34  ;;  %1130 = vmatmul.bf16.gmra.mxu2 %v890_v5  ;;  %v4205_v0 = vpop.eup %4204  ;;  %v2184_v9 = vadd.f32 %v5251_v22, %v5296_v21  ;;  %v2581_v31 = vand.u32 2147483647, %v5292_v44 }
 0x160   :  { %v474_v25 = vpop.f32.mrf.mxu0  ;;  %1299 = vmatmul.bf16.gmra.mxu3 %v891_v24  ;;  %v2089_v7 = vmul.f32 0.6931472, %v4205_v0  ;;  %vm2563_vm3 = vweird.f32 %v4203_v6  ;;  %v2569_v48 = vor.u32 1.1754944e-38, %v2568_v23  ;;  %v1540_v33 = vsub.f32 1.0, %v5316_v30 }
 0x161   :  { %v3525_v26 = vadd.f32 %v3461_v47, %v5091_v2  ;;  %v2559_v60 = vsub.f32 1.0, %v2558_v15  ;;  %v643_v50 = vpop.f32.mrf.mxu1  ;;  %v4029_v36 = vmul.f32 -1.442695, %v2184_v9  ;;  %vm2564_vm4 = vmor %vm2562_vm2, %vm2563_vm3  ;;  %vm5341_vm6 = vcmp.eq.f32.partialorder %v2581_v31, 8.507059e+37 }
 0x162   :  { %v1091_v39 = vpop.f32.mrf.mxu2  ;;  %v4207_v59 = vpop.eup %4206  ;;  %v5328_v55 = vsel %vm2136_vm15, %v2089_v7, 0.0  ;;  %v2583_v19 = vand.u32 2147483648, %v5292_v44  ;;  %v475_v5 = vadd.f32 %v474_v25, %v4745_v52  ;;  %v644_v62 = vadd.f32 %v643_v50, %v4748_v53 }
 0x163   :  { %v3591_v51 = vsel %vm3457_vm8, %v3525_v26, %v5136_v4  ;;  %v2560_v40 = vmul.f32 %v4203_v6, %v2559_v60  ;;  %v1092_v41 = vadd.f32 %v4976_v37, %v1091_v39  ;;  %v1260_v12 = vpop.f32.mrf.mxu3  ;;  %3915 = vmatmul.msk.bf16.gmra.mxu0 %vm303_vm0, %v4107_v17  ;;  %v4209_v32 = vpop.eup %4208  ;;  %v5325_v54 = vadd.f32 1.0, %v4207_v59 }
 0x164   :  { %3655 = vst [vmem:[#allocation2 + $0x18] sm:$0xff] %v3591_v51  ;;  %4212 = vpow2.f32 %v4029_v36  ;;  %3947 = vmatmul.msk.bf16.gmra.mxu1 %vm303_vm0, %v4107_v17  ;;  %v2573_v4 = vmul.f32 %v4209_v32, %v5292_v44  ;;  %v5335_v49 = vpop.eup %4210  ;;  %vm2578_vm7 = vweird.f32 %v4209_v32  ;;  %v2584_v9 = vor.u32 1.1754944e-38, %v2583_v19 }
 0x165   :  { %v2561_v56 = vadd.f32 %v4203_v6, %v2560_v40  ;;  %v5332_v57 = vadd.f32 %v1260_v12, %v1092_v41  ;;  %4214 = vrcp.f32 %v5325_v54  ;;  %v1743_v10 = vmul.f32 %v5335_v49, %v5294_v3  ;;  %vm2579_vm10 = vmor %vm2577_vm5, %vm2578_vm7 }
 0x166   :  { %v2574_v63 = vsub.f32 1.0, %v2573_v4  ;;  %v790_v39 = vmax.f32 %v475_v5, 0.0  ;;  %v2596_v44 = vand.u32 2147483647, %v5325_v54  ;;  %vm1748_vm12 = vweird.f32 %v5335_v49 }
 0x167   :  { %v2565_v11 = vsel %vm2564_vm4, %v4203_v6, %v2561_v56  ;;  %v2185_v29 = vadd.f32 %v5328_v55, %v5332_v57  ;;  %v1744_v60 = vsub.f32 1.0, %v1743_v10  ;;  %vm2592_vm13 = vweird.f32 %v5325_v54  ;;  %vm5405_vm14 = vmor %vm1747_vm9, %vm1748_vm12 }
 0x168   :  { %v2570_v34 = vsel %vm5312_vm1, %v2569_v48, %v2565_v11  ;;  %v476_v28 = vpop.f32.mrf.mxu0  ;;  %v2575_v15 = vmul.f32 %v4209_v32, %v2574_v63  ;;  %v791_v48 = vmax.f32 %v644_v62, 0.0  ;;  %v2598_v63 = vand.u32 2147483648, %v5325_v54 }
 0x169   :  { %v3462_v47 = vmul.f32 %v2570_v34, %v5087_v18  ;;  %v4030_v6 = vmul.f32 -1.442695, %v2185_v29  ;;  %v477_v17 = vadd.f32 %v476_v28, %v4745_v52  ;;  %v645_v0 = vpop.f32.mrf.mxu1  ;;  %v1745_v4 = vmul.f32 %v5335_v49, %v1744_v60 }
 0x16a   :  { %v4213_v23 = vpop.eup %4212  ;;  %v646_v24 = vadd.f32 %v645_v0, %v4748_v53  ;;  %v1093_v26 = vpop.f32.mrf.mxu2  ;;  %v2576_v13 = vadd.f32 %v4209_v32, %v2575_v15  ;;  %vm2597_vm2 = vcmp.eq.f32.partialorder %v2596_v44, 8.507059e+37 }
 0x16b   :  { %v3526_v25 = vadd.f32 %v3462_v47, %v5091_v2  ;;  %v5360_v50 = vadd.f32 1.0, %v4213_v23  ;;  %4216 = vpow2.f32 %v4030_v6  ;;  %v1262_v31 = vpop.f32.mrf.mxu3  ;;  %v4215_v36 = vpop.eup %4214  ;;  %v792_v7 = vmax.f32 %v477_v17, 0.0 }
 0x16c   :  { %v793_v59 = vmax.f32 %v646_v24, 0.0  ;;  %v1094_v51 = vadd.f32 %v4976_v37, %v1093_v26  ;;  %v2580_v41 = vsel %vm2579_vm10, %v4209_v32, %v2576_v13  ;;  %v2588_v12 = vmul.f32 %v4215_v36, %v5325_v54  ;;  %v4108_v32 = vld [vmem:[%s7717_s0 + $0xb0] sm:$0xff] }
 0x16d   :  { %v3592_v40 = vsel %vm3457_vm8, %v3526_v25, %v5188_v43  ;;  %v2585_v56 = vsel %vm5341_vm6, %v2584_v9, %v2580_v41  ;;  %4218 = vrcp.f32 %v5360_v50  ;;  %vm2593_vm11 = vweird.f32 %v4215_v36 }
 0x16e   :  { %3656 = vst [vmem:[#allocation2 + $0x20] sm:$0xff] %v3592_v40  ;;  %v3463_v19 = vmul.f32 %v2585_v56, %v5087_v18  ;;  %v2589_v11 = vsub.f32 1.0, %v2588_v12  ;;  %v5377_v43 = vadd.f32 %v1262_v31, %v1094_v51  ;;  %v892_v61 = vpack.c.bf16 %v792_v7, %v790_v39  ;;  %vm2594_vm1 = vmor %vm2592_vm13, %vm2593_vm11 }
 0x16f   :  { %v893_v29 = vpack.c.bf16 %v793_v59, %v791_v48  ;;  %v2611_v28 = vand.u32 2147483647, %v5360_v50  ;;  %v2613_v47 = vand.u32 2147483648, %v5360_v50  ;;  %v1746_v0 = vadd.f32 %v5335_v49, %v1745_v4 }
 0x170   :  { %v479_v10 = vpop.f32.mrf.mxu0  ;;  %v3527_v5 = vadd.f32 %v3463_v19, %v5091_v2  ;;  %v2590_v62 = vmul.f32 %v4215_v36, %v2589_v11  ;;  %1135 = vmatmul.bf16.gmra.mxu2 %v892_v61  ;;  %v1751_v23 = vand.u32 2147483647, %v5294_v3  ;;  %v1753_v13 = vand.u32 2147483648, %v5294_v3 }
 0x171   :  { %v4217_v34 = vpop.eup %4216  ;;  %v648_v15 = vpop.f32.mrf.mxu1  ;;  %1304 = vmatmul.bf16.gmra.mxu3 %v893_v29  ;;  %v5397_v26 = vadd.f32 %v479_v10, %v4745_v52  ;;  %vm2607_vm3 = vweird.f32 %v5360_v50  ;;  %vm5418_vm4 = vcmp.eq.f32.partialorder %v2611_v28, 8.507059e+37  ;;  %v2614_v59 = vor.u32 1.1754944e-38, %v2613_v47  ;;  %v1416_v28 = vld [vmem:[%s7718_s1 + $0x80] sm:$0xff] }
 0x172   :  { %v5387_v6 = vadd.f32 1.0, %v4217_v34  ;;  %v5389_v17 = vpop.f32.mrf.mxu2  ;;  %v3593_v9 = vsel %vm3457_vm8, %v3527_v5, %v5216_v45  ;;  %v2591_v24 = vadd.f32 %v4215_v36, %v2590_v62  ;;  %v2599_v45 = vor.u32 1.1754944e-38, %v2598_v63 }
 0x173   :  { %v5399_v60 = vpop.f32.mrf.mxu3  ;;  %3916 = vmatmul.msk.bf16.gmra.mxu0 %vm303_vm0, %v4108_v32  ;;  %v4219_v31 = vpop.eup %4218  ;;  %3657 = vst [vmem:[#allocation2 + $0x28] sm:$0xff] %v3593_v9  ;;  %v649_v54 = vadd.f32 %v648_v15, %v4748_v53  ;;  %v1750_v40 = vsel %vm5405_vm14, %v5335_v49, %v1746_v0  ;;  %vm1752_vm5 = vcmp.eq.f32.partialorder %v1751_v23, 8.507059e+37  ;;  %v1754_v48 = vor.u32 1.1754944e-38, %v1753_v13  ;;  %v1414_v49 = vld [vmem:[%s7718_s1 + $0x70] sm:$0xff]  ;;  %v5462_v13 = vld [vmem:[%s7722_s5] ss:$0 sm:$0xff] }
 0x174   :  { %4220 = vrcp.f32 %v5387_v6  ;;  %3948 = vmatmul.msk.bf16.gmra.mxu1 %vm303_vm0, %v4108_v32  ;;  %v2595_v39 = vsel %vm2594_vm1, %v4215_v36, %v2591_v24  ;;  %v2603_v7 = vmul.f32 %v4219_v31, %v5360_v50  ;;  %v794_v36 = vmax.f32 %v5397_v26, 0.0  ;;  %v5457_v26 = vld [vmem:[%s7718_s1 + $0x48] sm:$0xff] }
 0x175   :  { %v2600_v51 = vsel %vm2597_vm2, %v2599_v45, %v2595_v39  ;;  %vm2608_vm6 = vweird.f32 %v4219_v31  ;;  %v2626_v56 = vand.u32 2147483647, %v5387_v6  ;;  %v2628_v44 = vand.u32 2147483648, %v5387_v6 }
 0x176   :  { %v3464_v41 = vmul.f32 %v2600_v51, %v5087_v18  ;;  %v2604_v12 = vsub.f32 1.0, %v2603_v7  ;;  %v5432_v19 = vmax.f32 %v1540_v33, 1e-05  ;;  %v1755_v32 = vsel %vm1752_vm5, %v1754_v48, %v1750_v40  ;;  %vm2609_vm7 = vmor %vm2607_vm3, %vm2608_vm6  ;;  %v4109_v40 = vld [vmem:[%s7717_s0 + $0xb8] sm:$0xff] }
 0x177   :  { %v795_v34 = vmax.f32 %v649_v54, 0.0  ;;  %v1756_v5 = vmul.f32 %v1755_v32, %v1506_v27  ;;  %v1446_v9 = vmax.f32 %v1414_v49, 0.0  ;;  %v1097_v50 = vadd.f32 %v5462_v13, %v5389_v17 }
 0x178   :  { %v481_v4 = vpop.f32.mrf.mxu0  ;;  %v3528_v11 = vadd.f32 %v3464_v41, %v5091_v2  ;;  %v2605_v63 = vmul.f32 %v4219_v31, %v2604_v12  ;;  %4222 = vrcp.f32 %v5432_v19  ;;  %v1448_v45 = vmax.f32 %v1416_v28, 0.0 }
 0x179   :  { %v482_v61 = vadd.f32 %v481_v4, %v4745_v52  ;;  %v650_v29 = vpop.f32.mrf.mxu1  ;;  %4224 = vlog2.f32 %v1756_v5  ;;  %v1441_v41 = vmax.f32 %v5457_v26, 0.0  ;;  %vm2622_vm10 = vweird.f32 %v5387_v6 }
 0x17a   :  { %v4221_v10 = vpop.eup %4220  ;;  %v651_v62 = vadd.f32 %v650_v29, %v4748_v53  ;;  %v1098_v33 = vpop.f32.mrf.mxu2  ;;  %v3594_v47 = vsel %vm3457_vm8, %v3528_v11, %v5265_v46  ;;  %v2606_v15 = vadd.f32 %v4219_v31, %v2605_v63  ;;  %vm5478_vm11 = vcmp.eq.f32.partialorder %v2626_v56, 8.507059e+37 }
 0x17b   :  { %v2618_v0 = vmul.f32 %v4221_v10, %v5387_v6  ;;  %v1267_v23 = vpop.f32.mrf.mxu3  ;;  %3658 = vst [vmem:[#allocation2 + $0x30] sm:$0xff] %v3594_v47  ;;  %v796_v14 = vmax.f32 %v482_v61, 0.0  ;;  %v1099_v24 = vadd.f32 %v4976_v37, %v1098_v33  ;;  %vm2623_vm9 = vweird.f32 %v4221_v10 }
 0x17c   :  { %v797_v27 = vmax.f32 %v651_v62, 0.0  ;;  %v2610_v46 = vsel %vm2609_vm7, %v4219_v31, %v2606_v15  ;;  %v2629_v3 = vor.u32 1.1754944e-38, %v2628_v44  ;;  %v5487_v63 = vmin.f32 %v1448_v45, 1.0  ;;  %vm5490_vm12 = vmor %vm2622_vm10, %vm2623_vm9 }
 0x17d   :  { %v2619_v25 = vsub.f32 1.0, %v2618_v0  ;;  %v2615_v39 = vsel %vm5418_vm4, %v2614_v59, %v2610_v46  ;;  %v5468_v37 = vadd.f32 %v1267_v23, %v1099_v24  ;;  %v894_v7 = vpack.c.bf16 %v796_v14, %v794_v36 }
 0x17e   :  { %v895_v51 = vpack.c.bf16 %v797_v27, %v795_v34  ;;  %v3465_v54 = vmul.f32 %v2615_v39, %v5087_v18  ;;  %v5475_v12 = vpop.eup %4222  ;;  %v5482_v36 = vmin.f32 %v1446_v9, 1.0  ;;  %v5495_v56 = vadd.f32 %v5399_v60, %v1097_v50 }
 0x17f   :  { %v2620_v31 = vmul.f32 %v4221_v10, %v2619_v25  ;;  %v1773_v11 = vmul.f32 %v5475_v12, %v5432_v19  ;;  %v4225_v32 = vpop.eup %4224  ;;  %v1508_v61 = vmax.f32 %v5316_v30, 1e-05  ;;  %v1781_v29 = vand.u32 2147483647, %v5432_v19 }
 0x180   :  { %v484_v59 = vpop.f32.mrf.mxu0  ;;  %v3529_v48 = vadd.f32 %v3465_v54, %v5091_v2  ;;  %1140 = vmatmul.bf16.gmra.mxu2 %v894_v7  ;;  %v1542_v34 = vsub.f32 1.0, %v5482_v36  ;;  %v2093_v33 = vmul.f32 0.6931472, %v4225_v32  ;;  %v1783_v60 = vand.u32 2147483648, %v5432_v19 }
 0x181   :  { %v2621_v4 = vadd.f32 %v4221_v10, %v2620_v31  ;;  %v653_v49 = vpop.f32.mrf.mxu1  ;;  %1309 = vmatmul.bf16.gmra.mxu3 %v895_v51  ;;  %v1774_v47 = vsub.f32 1.0, %v1773_v11  ;;  %vm1777_vm13 = vweird.f32 %v5432_v19  ;;  %vm1778_vm14 = vweird.f32 %v5475_v12 }
 0x182   :  { %v1101_v44 = vpop.f32.mrf.mxu2  ;;  %v3595_v5 = vsel %vm3457_vm8, %v3529_v48, %v5296_v21  ;;  %v1418_v21 = vld [vmem:[%s7718_s1 + $0x90] sm:$0xff]  ;;  %v5519_v15 = vsel %vm2136_vm15, %v2093_v33, 0.0  ;;  %v5521_v0 = vmax.f32 %v1542_v34, 1e-05  ;;  %v1544_v23 = vsub.f32 1.0, %v5487_v63  ;;  %vm5533_vm2 = vmor %vm1777_vm13, %vm1778_vm14 }
 0x183   :  { %v2625_v62 = vsel %vm5490_vm12, %v4221_v10, %v2621_v4  ;;  %v5505_v28 = vpop.f32.mrf.mxu3  ;;  %3917 = vmatmul.msk.bf16.gmra.mxu0 %vm303_vm0, %v4109_v40  ;;  %3659 = vst [vmem:[#allocation2 + $0x38] sm:$0xff] %v3595_v5  ;;  %v2187_v19 = vadd.f32 %v5519_v15, %v5495_v56  ;;  %v485_v9 = vadd.f32 %v484_v59, %v4745_v52  ;;  %vm5528_vm1 = vcmp.eq.f32.partialorder %v1781_v29, 8.507059e+37 }
 0x184   :  { %v2630_v30 = vsel %vm5478_vm11, %v2629_v3, %v2625_v62  ;;  %3949 = vmatmul.msk.bf16.gmra.mxu1 %vm303_vm0, %v4109_v40  ;;  %v1775_v14 = vmul.f32 %v5475_v12, %v1774_v47  ;;  %v1784_v46 = vor.u32 1.1754944e-38, %v1783_v60  ;;  %4226 = vrcp.f32 %v5521_v0 }
 0x185   :  { %v3466_v10 = vmul.f32 %v2630_v30, %v5087_v18  ;;  %v1450_v25 = vmax.f32 %v1418_v21, 0.0  ;;  %v4032_v50 = vmul.f32 -1.442695, %v2187_v19  ;;  %v654_v45 = vadd.f32 %v653_v49, %v4748_v53 }
 0x186   :  { %v1776_v39 = vadd.f32 %v5475_v12, %v1775_v14  ;;  %v5540_v51 = vmax.f32 %v1544_v23, 1e-05  ;;  %v5546_v17 = vmin.f32 %v1441_v41, 1.0  ;;  %v798_v3 = vmax.f32 %v485_v9, 0.0 }
 0x187   :  { %v3530_v24 = vadd.f32 %v3466_v10, %v5091_v2  ;;  %4228 = vpow2.f32 %v4032_v50  ;;  %v5555_v6 = vmin.f32 %v1450_v25, 1.0  ;;  %v799_v41 = vmax.f32 %v654_v45, 0.0 }
 0x188   :  { %v486_v7 = vpop.f32.mrf.mxu0  ;;  %v1780_v59 = vsel %vm5533_vm2, %v5475_v12, %v1776_v39  ;;  %4230 = vrcp.f32 %v5540_v51  ;;  %v1537_v12 = vsub.f32 1.0, %v5546_v17  ;;  %v1102_v47 = vadd.f32 %v5462_v13, %v1101_v44 }
 0x189   :  { %v3596_v54 = vsel %vm3457_vm8, %v3530_v24, %v5332_v57  ;;  %v487_v31 = vadd.f32 %v486_v7, %v4745_v52  ;;  %v655_v40 = vpop.f32.mrf.mxu1  ;;  %v1785_v49 = vsel %vm5528_vm1, %v1784_v46, %v1780_v59  ;;  %v1811_v21 = vand.u32 2147483647, %v5521_v0 }
 0x18a   :  { %3660 = vst [vmem:[#allocation2 + $0x40] sm:$0xff] %v3596_v54  ;;  %v656_v48 = vadd.f32 %v655_v40, %v4748_v53  ;;  %v1103_v4 = vpop.f32.mrf.mxu2  ;;  %v1786_v29 = vmul.f32 %v1785_v49, %v1508_v61  ;;  %v4227_v5 = vpop.eup %4226  ;;  %v1813_v10 = vand.u32 2147483648, %v5521_v0  ;;  %v4110_v61 = vld [vmem:[%s7717_s0 + $0xc0] sm:$0xff]  ;;  %v1546_v23 = vsub.f32 1.0, %v5555_v6 }
 0x18b   :  { %v800_v11 = vmax.f32 %v487_v31, 0.0  ;;  %v1104_v57 = vadd.f32 %v5462_v13, %v1103_v4  ;;  %v1272_v32 = vpop.f32.mrf.mxu3  ;;  %v1803_v30 = vmul.f32 %v4227_v5, %v5521_v0  ;;  %vm1807_vm3 = vweird.f32 %v5521_v0 }
 0x18c   :  { %v801_v34 = vmax.f32 %v656_v48, 0.0  ;;  %4232 = vlog2.f32 %v1786_v29  ;;  %vm1808_vm4 = vweird.f32 %v4227_v5  ;;  %v1841_v27 = vand.u32 2147483647, %v5540_v51 }
 0x18d   :  { %v5558_v62 = vadd.f32 %v1272_v32, %v1104_v57  ;;  %v896_v33 = vpack.c.bf16 %v800_v11, %v798_v3  ;;  %v4229_v19 = vpop.eup %4228  ;;  %v1804_v14 = vsub.f32 1.0, %v1803_v30  ;;  %v5573_v26 = vmax.f32 %v1537_v12, 1e-05  ;;  %vm5590_vm5 = vmor %vm1807_vm3, %vm1808_vm4  ;;  %v1420_v12 = vld [vmem:[%s7718_s1 + $0xa0] sm:$0xff] }
 0x18e   :  { %v897_v60 = vpack.c.bf16 %v801_v34, %v799_v41  ;;  %v5571_v24 = vadd.f32 1.0, %v4229_v19  ;;  %v5575_v46 = vpop.eup %4230  ;;  %v1510_v50 = vmax.f32 %v5482_v36, 1e-05  ;;  %v1843_v39 = vand.u32 2147483648, %v5540_v51 }
 0x18f   :  { %v1805_v45 = vmul.f32 %v4227_v5, %v1804_v14  ;;  %v5579_v7 = vmax.f32 %v1546_v23, 1e-05  ;;  %v5583_v54 = vadd.f32 %v5505_v28, %v1102_v47  ;;  %vm5594_vm6 = vcmp.eq.f32.partialorder %v1811_v21, 8.507059e+37 }
 0x190   :  { %v489_v9 = vpop.f32.mrf.mxu0  ;;  %1145 = vmatmul.bf16.gmra.mxu2 %v896_v33  ;;  %4234 = vrcp.f32 %v5571_v24  ;;  %v1814_v3 = vor.u32 1.1754944e-38, %v1813_v10  ;;  %v1512_v28 = vmax.f32 %v5487_v63, 1e-05  ;;  %vm1837_vm7 = vweird.f32 %v5540_v51 }
 0x191   :  { %v658_v44 = vpop.f32.mrf.mxu1  ;;  %1314 = vmatmul.bf16.gmra.mxu3 %v897_v60  ;;  %v1806_v48 = vadd.f32 %v4227_v5, %v1805_v45  ;;  %vm5602_vm9 = vcmp.eq.f32.partialorder %v1841_v27, 8.507059e+37  ;;  %v490_v49 = vadd.f32 %v489_v9, %v4745_v52  ;;  %v1833_v11 = vmul.f32 %v5575_v46, %v5540_v51 }
 0x192   :  { %v1106_v25 = vpop.f32.mrf.mxu2  ;;  %v4233_v59 = vpop.eup %4232  ;;  %4236 = vrcp.f32 %v5573_v26  ;;  %v659_v57 = vadd.f32 %v658_v44, %v4748_v53  ;;  %v1844_v63 = vor.u32 1.1754944e-38, %v1843_v39  ;;  %vm1838_vm10 = vweird.f32 %v5575_v46 }
 0x193   :  { %v5585_v31 = vpop.f32.mrf.mxu3  ;;  %3918 = vmatmul.msk.bf16.gmra.mxu0 %vm303_vm0, %v4110_v61  ;;  %v2097_v4 = vmul.f32 0.6931472, %v4233_v59  ;;  %v1810_v32 = vsel %vm5590_vm5, %v4227_v5, %v1806_v48  ;;  %4238 = vrcp.f32 %v5579_v7  ;;  %v1834_v34 = vsub.f32 1.0, %v1833_v11  ;;  %vm5635_vm12 = vmor %vm1837_vm7, %vm1838_vm10 }
 0x194   :  { %3950 = vmatmul.msk.bf16.gmra.mxu1 %vm303_vm0, %v4110_v61  ;;  %v1815_v29 = vsel %vm5594_vm6, %v1814_v3, %v1810_v32  ;;  %vm2652_vm11 = vweird.f32 %v5571_v24  ;;  %v2656_v5 = vand.u32 2147483647, %v5571_v24  ;;  %v2658_v21 = vand.u32 2147483648, %v5571_v24 }
 0x195   :  { %v5615_v41 = vsel %vm2136_vm15, %v2097_v4, 0.0  ;;  %v1816_v60 = vmul.f32 %v1815_v29, %v1510_v50  ;;  %v802_v10 = vmax.f32 %v490_v49, 0.0  ;;  %v1835_v19 = vmul.f32 %v5575_v46, %v1834_v34 }
 0x196   :  { %v2189_v33 = vadd.f32 %v5615_v41, %v5583_v54  ;;  %v4235_v47 = vpop.eup %4234  ;;  %v1452_v50 = vmax.f32 %v1420_v12, 0.0  ;;  %v803_v51 = vmax.f32 %v659_v57, 0.0  ;;  %v1107_v49 = vadd.f32 %v5462_v13, %v1106_v25 }
 0x197   :  { %v2648_v9 = vmul.f32 %v4235_v47, %v5571_v24  ;;  %4240 = vlog2.f32 %v1816_v60  ;;  %v1836_v59 = vadd.f32 %v5575_v46, %v1835_v19  ;;  %vm2653_vm13 = vweird.f32 %v4235_v47 }
 0x198   :  { %v491_v30 = vpop.f32.mrf.mxu0  ;;  %v4034_v14 = vmul.f32 -1.442695, %v2189_v33  ;;  %v5639_v45 = vpop.eup %4236  ;;  %vm5656_vm14 = vcmp.eq.f32.partialorder %v2656_v5, 8.507059e+37  ;;  %v2659_v19 = vor.u32 1.1754944e-38, %v2658_v21  ;;  %v5666_v0 = vadd.f32 %v5585_v31, %v1107_v49  ;;  %vm2654_vm1 = vmor %vm2652_vm11, %vm2653_vm13 }
 0x199   :  { %v492_v61 = vadd.f32 %v491_v30, %v4745_v52  ;;  %v660_v23 = vpop.f32.mrf.mxu1  ;;  %v5644_v48 = vpop.eup %4238  ;;  %v2649_v4 = vsub.f32 1.0, %v2648_v9  ;;  %v1840_v29 = vsel %vm5635_vm12, %v5575_v46, %v1836_v59  ;;  %vm1867_vm2 = vweird.f32 %v5579_v7 }
 0x19a   :  { %v1108_v27 = vpop.f32.mrf.mxu2  ;;  %v661_v40 = vadd.f32 %v660_v23, %v4748_v53  ;;  %4242 = vpow2.f32 %v4034_v14  ;;  %v1845_v33 = vsel %vm5602_vm9, %v1844_v63, %v1840_v29  ;;  %v1863_v60 = vmul.f32 %v5644_v48, %v5579_v7 }
 0x19b   :  { %v804_v39 = vmax.f32 %v492_v61, 0.0  ;;  %v1109_v36 = vadd.f32 %v5462_v13, %v1108_v27  ;;  %v1277_v3 = vpop.f32.mrf.mxu3  ;;  %v2650_v34 = vmul.f32 %v4235_v47, %v2649_v4  ;;  %v1846_v30 = vmul.f32 %v1845_v33, %v1512_v28  ;;  %v4111_v61 = vld [vmem:[%s7717_s0 + $0xc8] sm:$0xff] }
 0x19c   :  { %v805_v11 = vmax.f32 %v661_v40, 0.0  ;;  %v5663_v23 = vmin.f32 %v1452_v50, 1.0  ;;  %v1864_v9 = vsub.f32 1.0, %v1863_v60  ;;  %v1871_v14 = vand.u32 2147483647, %v5579_v7 }
 0x19d   :  { %v5647_v32 = vadd.f32 %v1277_v3, %v1109_v36  ;;  %v898_v12 = vpack.c.bf16 %v804_v39, %v802_v10  ;;  %v4241_v46 = vpop.eup %4240  ;;  %v2651_v10 = vadd.f32 %v4235_v47, %v2650_v34  ;;  %4244 = vlog2.f32 %v1846_v30 }
 0x19e   :  { %v899_v25 = vpack.c.bf16 %v805_v11, %v803_v51  ;;  %v2101_v5 = vmul.f32 0.6931472, %v4241_v46  ;;  %v1873_v27 = vand.u32 2147483648, %v5579_v7  ;;  %v1865_v31 = vmul.f32 %v5644_v48, %v1864_v9 }
 0x19f   :  { %v2655_v50 = vsel %vm2654_vm1, %v4235_v47, %v2651_v10  ;;  %vm1868_vm3 = vweird.f32 %v5644_v48  ;;  %v1548_v47 = vsub.f32 1.0, %v5663_v23  ;;  %v1514_v4 = vmax.f32 %v5555_v6, 1e-05 }
 0x1a0   :  { %v494_v63 = vpop.f32.mrf.mxu0  ;;  %v4243_v44 = vpop.eup %4242  ;;  %1150 = vmatmul.bf16.gmra.mxu2 %v898_v12  ;;  %v2660_v24 = vsel %vm5656_vm14, %v2659_v19, %v2655_v50  ;;  %v5681_v40 = vsel %vm2136_vm15, %v2101_v5, 0.0  ;;  %vm5692_vm4 = vmor %vm1867_vm2, %vm1868_vm3  ;;  %vm5696_vm5 = vcmp.eq.f32.partialorder %v1871_v14, 8.507059e+37  ;;  %v1874_v11 = vor.u32 1.1754944e-38, %v1873_v27 }
 0x1a1   :  { %v663_v28 = vpop.f32.mrf.mxu1  ;;  %1319 = vmatmul.bf16.gmra.mxu3 %v899_v25  ;;  %v5678_v39 = vadd.f32 1.0, %v4243_v44  ;;  %v3468_v3 = vmul.f32 %v2660_v24, %v5087_v18  ;;  %v2191_v7 = vadd.f32 %v5681_v40, %v5666_v0  ;;  %v495_v12 = vadd.f32 %v494_v63, %v4745_v52  ;;  %v1422_v44 = vld [vmem:[%s7718_s1 + $0xb0] sm:$0xff] }
 0x1a2   :  { %v1111_v21 = vpop.f32.mrf.mxu2  ;;  %v1866_v33 = vadd.f32 %v5644_v48, %v1865_v31  ;;  %v664_v57 = vadd.f32 %v663_v28, %v4748_v53  ;;  %v5706_v25 = vmax.f32 %v1548_v47, 1e-05  ;;  %v1728_v5 = vmul.f32 %v5639_v45, %v5573_v26 }
 0x1a3   :  { %v1280_v36 = vpop.f32.mrf.mxu3  ;;  %3919 = vmatmul.msk.bf16.gmra.mxu0 %vm303_vm0, %v4111_v61  ;;  %v1112_v59 = vadd.f32 %v5462_v13, %v1111_v21  ;;  %4246 = vrcp.f32 %v5678_v39  ;;  %v3532_v29 = vadd.f32 %v3468_v3, %v5091_v2  ;;  %v4036_v34 = vmul.f32 -1.442695, %v2191_v7  ;;  %v4245_v60 = vpop.eup %4244 }
 0x1a4   :  { %3951 = vmatmul.msk.bf16.gmra.mxu1 %vm303_vm0, %v4111_v61  ;;  %v2105_v61 = vmul.f32 0.6931472, %v4245_v60  ;;  %v1870_v10 = vsel %vm5692_vm4, %v5644_v48, %v1866_v33  ;;  %v807_v21 = vmax.f32 %v664_v57, 0.0  ;;  %v2686_v7 = vand.u32 2147483647, %v5678_v39 }
 0x1a5   :  { %v5704_v6 = vadd.f32 %v1280_v36, %v1112_v59  ;;  %v3598_v30 = vsel %vm3457_vm8, %v3532_v29, %v5495_v56  ;;  %4248 = vpow2.f32 %v4036_v34  ;;  %v1875_v9 = vsel %vm5696_vm5, %v1874_v11, %v1870_v10 }
 0x1a6   :  { %3662 = vst [vmem:[#allocation2 + $0x50] sm:$0xff] %v3598_v30  ;;  %4250 = vrcp.f32 %v5706_v25  ;;  %v806_v56 = vmax.f32 %v495_v12, 0.0  ;;  %v5721_v28 = vsel %vm2136_vm15, %v2105_v61, 0.0  ;;  %v1876_v48 = vmul.f32 %v1875_v9, %v1514_v4  ;;  %v4112_v61 = vld [vmem:[%s7717_s0 + $0xd0] sm:$0xff] }
 0x1a7   :  { %v2193_v31 = vadd.f32 %v5721_v28, %v5704_v6  ;;  %v2688_v4 = vand.u32 2147483648, %v5678_v39  ;;  %v1454_v11 = vmax.f32 %v1422_v44, 0.0  ;;  %v1729_v60 = vsub.f32 1.0, %v1728_v5 }
 0x1a8   :  { %v496_v46 = vpop.f32.mrf.mxu0  ;;  %4252 = vlog2.f32 %v1876_v48  ;;  %vm2682_vm6 = vweird.f32 %v5678_v39  ;;  %vm5744_vm9 = vcmp.eq.f32.partialorder %v2686_v7, 8.507059e+37  ;;  %vm1897_vm10 = vweird.f32 %v5706_v25  ;;  %v4113_v7 = vld [vmem:[%s7717_s0 + $0xd8] sm:$0xff] }
 0x1a9   :  { %v497_v19 = vadd.f32 %v496_v46, %v4745_v52  ;;  %v665_v63 = vpop.f32.mrf.mxu1  ;;  %v4247_v50 = vpop.eup %4246  ;;  %v4038_v51 = vmul.f32 -1.442695, %v2193_v31  ;;  %v1901_v46 = vand.u32 2147483647, %v5706_v25  ;;  %v2689_v5 = vor.u32 1.1754944e-38, %v2688_v4 }
 0x1aa   :  { %v666_v14 = vadd.f32 %v665_v63, %v4748_v53  ;;  %v1113_v27 = vpop.f32.mrf.mxu2  ;;  %v2678_v3 = vmul.f32 %v4247_v50, %v5678_v39  ;;  %vm2683_vm7 = vweird.f32 %v4247_v50 }
 0x1ab   :  { %v808_v24 = vmax.f32 %v497_v19, 0.0  ;;  %v1114_v36 = vadd.f32 %v5462_v13, %v1113_v27  ;;  %v1282_v47 = vpop.f32.mrf.mxu3  ;;  %v4249_v29 = vpop.eup %4248  ;;  %4254 = vpow2.f32 %v4038_v51  ;;  %vm2684_vm11 = vmor %vm2682_vm6, %vm2683_vm7  ;;  %vm5761_vm12 = vcmp.eq.f32.partialorder %v1901_v46, 8.507059e+37 }
 0x1ac   :  { %v809_v59 = vmax.f32 %v666_v14, 0.0  ;;  %v2679_v34 = vsub.f32 1.0, %v2678_v3  ;;  %v5735_v57 = vpop.eup %4250  ;;  %v5738_v30 = vadd.f32 1.0, %v4249_v29  ;;  %v5752_v14 = vmin.f32 %v1454_v11, 1.0 }
 0x1ad   :  { %v5733_v49 = vadd.f32 %v1282_v47, %v1114_v36  ;;  %v900_v12 = vpack.c.bf16 %v808_v24, %v806_v56  ;;  %v1893_v9 = vmul.f32 %v5735_v57, %v5706_v25  ;;  %v1903_v24 = vand.u32 2147483648, %v5706_v25 }
 0x1ae   :  { %v901_v33 = vpack.c.bf16 %v809_v59, %v807_v21  ;;  %v2680_v10 = vmul.f32 %v4247_v50, %v2679_v34  ;;  %4256 = vrcp.f32 %v5738_v30  ;;  %v4253_v27 = vpop.eup %4252  ;;  %v1730_v59 = vmul.f32 %v5639_v45, %v1729_v60 }
 0x1af   :  { %v1894_v31 = vsub.f32 1.0, %v1893_v9  ;;  %v2109_v3 = vmul.f32 0.6931472, %v4253_v27  ;;  %v1550_v60 = vsub.f32 1.0, %v5752_v14  ;;  %vm1898_vm13 = vweird.f32 %v5735_v57 }
 0x1b0   :  { %v499_v63 = vpop.f32.mrf.mxu0  ;;  %v2681_v48 = vadd.f32 %v4247_v50, %v2680_v10  ;;  %1155 = vmatmul.bf16.gmra.mxu2 %v900_v12  ;;  %vm2712_vm14 = vweird.f32 %v5738_v30  ;;  %v2716_v19 = vand.u32 2147483647, %v5738_v30  ;;  %vm5798_vm1 = vmor %vm1897_vm10, %vm1898_vm13  ;;  %vm1732_vm13 = vweird.f32 %v5573_v26 }
 0x1b1   :  { %v668_v56 = vpop.f32.mrf.mxu1  ;;  %1324 = vmatmul.bf16.gmra.mxu3 %v901_v33  ;;  %v500_v51 = vadd.f32 %v499_v63, %v4745_v52  ;;  %v1895_v39 = vmul.f32 %v5735_v57, %v1894_v31  ;;  %v4255_v29 = vpop.eup %4254  ;;  %v5775_v33 = vsel %vm2136_vm15, %v2109_v3, 0.0  ;;  %v2718_v63 = vand.u32 2147483648, %v5738_v30 }
 0x1b2   :  { %v1116_v44 = vpop.f32.mrf.mxu2  ;;  %v2685_v4 = vsel %vm2684_vm11, %v4247_v50, %v2681_v48  ;;  %v669_v11 = vadd.f32 %v668_v56, %v4748_v53  ;;  %7797 = vst [vmem:[#allocation5_spill] sm:$0xff] %v5775_v33  ;;  %v5779_v46 = vadd.f32 1.0, %v4255_v29  ;;  %vm2717_vm4 = vcmp.eq.f32.partialorder %v2716_v19, 8.507059e+37 }
 0x1b3   :  { %v1117_v36 = vadd.f32 %v5462_v13, %v1116_v44  ;;  %v1285_v47 = vpop.f32.mrf.mxu3  ;;  %3920 = vmatmul.msk.bf16.gmra.mxu0 %vm303_vm0, %v4112_v61  ;;  %v2690_v34 = vsel %vm5744_vm9, %v2689_v5, %v2685_v4  ;;  %v1896_v48 = vadd.f32 %v5735_v57, %v1895_v39  ;;  %v1424_v44 = vld [vmem:[%s7718_s1 + $0xc0] sm:$0xff]  ;;  %v810_v31 = vmax.f32 %v500_v51, 0.0 }
 0x1b4   :  { %3952 = vmatmul.msk.bf16.gmra.mxu1 %vm303_vm0, %v4112_v61  ;;  %v3470_v50 = vmul.f32 %v2690_v34, %v5087_v18  ;;  %v1904_v61 = vor.u32 1.1754944e-38, %v1903_v24  ;;  %v4257_v10 = vpop.eup %4256  ;;  %4258 = vrcp.f32 %v5779_v46  ;;  %v811_v24 = vmax.f32 %v669_v11, 0.0 }
 0x1b5   :  { %v5772_v12 = vadd.f32 %v1285_v47, %v1117_v36  ;;  %v2708_v56 = vmul.f32 %v4257_v10, %v5738_v30  ;;  %v5802_v4 = vmax.f32 %v1550_v60, 1e-05  ;;  %vm2713_vm2 = vweird.f32 %v4257_v10 }
 0x1b6   :  { %v3534_v5 = vadd.f32 %v3470_v50, %v5091_v2  ;;  %vm2714_vm3 = vmor %vm2712_vm14, %vm2713_vm2  ;;  %vm2742_vm5 = vweird.f32 %v5779_v46  ;;  %vm1733_vm14 = vweird.f32 %v5639_v45 }
 0x1b7   :  { %v2195_v9 = vadd.f32 %v5775_v33, %v5772_v12  ;;  %v2709_v29 = vsub.f32 1.0, %v2708_v56  ;;  %v1931_v3 = vand.u32 2147483647, %v5802_v4  ;;  %vm1927_vm9 = vweird.f32 %v5802_v4 }
 0x1b8   :  { %v501_v27 = vpop.f32.mrf.mxu0  ;;  %v3600_v39 = vsel %vm3457_vm8, %v3534_v5, %v5583_v54  ;;  %v1900_v54 = vsel %vm5798_vm1, %v5735_v57, %v1896_v48  ;;  %v2746_v5 = vand.u32 2147483647, %v5779_v46  ;;  %v2719_v57 = vor.u32 1.1754944e-38, %v2718_v63 }
 0x1b9   :  { %v4040_v36 = vmul.f32 -1.442695, %v2195_v9  ;;  %v670_v47 = vpop.f32.mrf.mxu1  ;;  %v502_v51 = vadd.f32 %v501_v27, %v4745_v52  ;;  %3664 = vst [vmem:[#allocation2 + $0x60] sm:$0xff] %v3600_v39  ;;  %v1456_v9 = vmax.f32 %v1424_v44, 0.0  ;;  %v2710_v21 = vmul.f32 %v4257_v10, %v2709_v29 }
 0x1ba   :  { %v671_v11 = vadd.f32 %v670_v47, %v4748_v53  ;;  %v1118_v34 = vpop.f32.mrf.mxu2  ;;  %v1905_v27 = vsel %vm5761_vm12, %v1904_v61, %v1900_v54  ;;  %v7800_v29 = vmax.f32 %v5663_v23, 1e-05  ;;  %v5829_v61 = vadd.f32 %v5639_v45, %v1730_v59 }
 0x1bb   :  { %4260 = vpow2.f32 %v4040_v36  ;;  %v1119_v25 = vadd.f32 %v5462_v13, %v1118_v34  ;;  %v1287_v50 = vpop.f32.mrf.mxu3  ;;  %v812_v60 = vmax.f32 %v502_v51, 0.0  ;;  %v4259_v36 = vpop.eup %4258  ;;  %v2711_v47 = vadd.f32 %v4257_v10, %v2710_v21 }
 0x1bc   :  { %v813_v33 = vmax.f32 %v671_v11, 0.0  ;;  %4262 = vrcp.f32 %v5802_v4  ;;  %v1906_v51 = vmul.f32 %v1905_v27, %v7800_v29  ;;  %v2738_v48 = vmul.f32 %v4259_v36, %v5779_v46 }
 0x1bd   :  { %v5814_v56 = vadd.f32 %v1287_v50, %v1119_v25  ;;  %v902_v39 = vpack.c.bf16 %v812_v60, %v810_v31  ;;  %v2715_v21 = vsel %vm2714_vm3, %v4257_v10, %v2711_v47  ;;  %v5832_v31 = vmin.f32 %v1456_v9, 1.0 }
 0x1be   :  { %v903_v44 = vpack.c.bf16 %v813_v33, %v811_v24  ;;  %v2748_v33 = vand.u32 2147483648, %v5779_v46  ;;  %4264 = vlog2.f32 %v1906_v51  ;;  %v2720_v24 = vsel %vm2717_vm4, %v2719_v57, %v2715_v21 }
 0x1bf   :  { %v2739_v19 = vsub.f32 1.0, %v2738_v48  ;;  %v3472_v11 = vmul.f32 %v2720_v24, %v5087_v18  ;;  %vm2743_vm6 = vweird.f32 %v4259_v36  ;;  %vm5837_vm7 = vcmp.eq.f32.partialorder %v2746_v5, 8.507059e+37 }
 0x1c0   :  { %v504_v23 = vpop.f32.mrf.mxu0  ;;  %1160 = vmatmul.bf16.gmra.mxu2 %v902_v39  ;;  %v1933_v60 = vand.u32 2147483648, %v5802_v4  ;;  %v1552_v54 = vsub.f32 1.0, %v5832_v31  ;;  %v2749_v27 = vor.u32 1.1754944e-38, %v2748_v33  ;;  %v1518_v29 = vmax.f32 %v5752_v14, 1e-05  ;;  %vm2744_vm11 = vmor %vm2742_vm5, %vm2743_vm6 }
 0x1c1   :  { %v4261_v30 = vpop.eup %4260  ;;  %v673_v63 = vpop.f32.mrf.mxu1  ;;  %1329 = vmatmul.bf16.gmra.mxu3 %v903_v44  ;;  %v2740_v50 = vmul.f32 %v4259_v36, %v2739_v19  ;;  %v3536_v5 = vadd.f32 %v3472_v11, %v5091_v2  ;;  %v505_v47 = vadd.f32 %v504_v23, %v4745_v52  ;;  %vm5855_vm10 = vcmp.eq.f32.partialorder %v1931_v3, 8.507059e+37 }
 0x1c2   :  { %v5841_v10 = vadd.f32 1.0, %v4261_v30  ;;  %v1121_v34 = vpop.f32.mrf.mxu2  ;;  %v5843_v25 = vpop.eup %4262  ;;  %v1934_v30 = vor.u32 1.1754944e-38, %v1933_v60  ;;  %v5870_v24 = vmax.f32 %v1552_v54, 1e-05 }
 0x1c3   :  { %v1122_v9 = vadd.f32 %v5462_v13, %v1121_v34  ;;  %3921 = vmatmul.msk.bf16.gmra.mxu0 %vm303_vm0, %v4113_v7  ;;  %v1290_v39 = vpop.f32.mrf.mxu3  ;;  %v2741_v44 = vadd.f32 %v4259_v36, %v2740_v50  ;;  %v3602_v48 = vsel %vm3457_vm8, %v3536_v5, %v5666_v0  ;;  %v1923_v14 = vmul.f32 %v5843_v25, %v5802_v4 }
 0x1c4   :  { %4266 = vrcp.f32 %v5841_v10  ;;  %3953 = vmatmul.msk.bf16.gmra.mxu1 %vm303_vm0, %v4113_v7  ;;  %v4265_v57 = vpop.eup %4264  ;;  %v674_v7 = vadd.f32 %v673_v63, %v4748_v53  ;;  %3666 = vst [vmem:[#allocation2 + $0x70] sm:$0xff] %v3602_v48  ;;  %v814_v19 = vmax.f32 %v505_v47, 0.0  ;;  %vm1928_vm12 = vweird.f32 %v5843_v25  ;;  %v1426_v63 = vld [vmem:[%s7718_s1 + $0xd0] sm:$0xff] }
 0x1c5   :  { %v5866_v21 = vadd.f32 %v1290_v39, %v1122_v9  ;;  %v2745_v33 = vsel %vm2744_vm11, %v4259_v36, %v2741_v44  ;;  %v2113_v23 = vmul.f32 0.6931472, %v4265_v57  ;;  %v1924_v46 = vsub.f32 1.0, %v1923_v14  ;;  %vm5896_vm1 = vmor %vm1927_vm9, %vm1928_vm12 }
 0x1c6   :  { %v2750_v0 = vsel %vm5837_vm7, %v2749_v27, %v2745_v33  ;;  %4268 = vrcp.f32 %v5870_v24  ;;  %v815_v9 = vmax.f32 %v674_v7, 0.0  ;;  %v1458_v48 = vmax.f32 %v1426_v63, 0.0  ;;  %vm5949_vm9 = vmor %vm1732_vm13, %vm1733_vm14 }
 0x1c7   :  { %v3474_v11 = vmul.f32 %v2750_v0, %v5087_v18  ;;  %v5880_v36 = vsel %vm2136_vm15, %v2113_v23, 0.0  ;;  %v1925_v27 = vmul.f32 %v5843_v25, %v1924_v46  ;;  %vm2772_vm3 = vweird.f32 %v5841_v10 }
 0x1c8   :  { %v506_v3 = vpop.f32.mrf.mxu0  ;;  %v2197_v60 = vadd.f32 %v5880_v36, %v5866_v21  ;;  %vm1957_vm4 = vweird.f32 %v5870_v24  ;;  %v1963_v51 = vand.u32 2147483648, %v5870_v24 }
 0x1c9   :  { %v507_v34 = vadd.f32 %v506_v3, %v4745_v52  ;;  %v675_v50 = vpop.f32.mrf.mxu1  ;;  %v3538_v47 = vadd.f32 %v3474_v11, %v5091_v2  ;;  %v1926_v0 = vadd.f32 %v5843_v25, %v1925_v27  ;;  %v2778_v11 = vand.u32 2147483648, %v5841_v10 }
 0x1ca   :  { %v4267_v59 = vpop.eup %4266  ;;  %v676_v54 = vadd.f32 %v675_v50, %v4748_v53  ;;  %v1123_v5 = vpop.f32.mrf.mxu2  ;;  %v4042_v7 = vmul.f32 -1.442695, %v2197_v60 }
 0x1cb   :  { %v2768_v39 = vmul.f32 %v4267_v59, %v5841_v10  ;;  %v816_v44 = vmax.f32 %v507_v34, 0.0  ;;  %v1124_v33 = vadd.f32 %v5462_v13, %v1123_v5  ;;  %v1292_v23 = vpop.f32.mrf.mxu3  ;;  %v3604_v3 = vsel %vm3457_vm8, %v3538_v47, %v5704_v6 }
 0x1cc   :  { %v817_v14 = vmax.f32 %v676_v54, 0.0  ;;  %3668 = vst [vmem:[#allocation2 + $0x80] sm:$0xff] %v3604_v3  ;;  %4270 = vpow2.f32 %v4042_v7  ;;  %v1930_v50 = vsel %vm5896_vm1, %v5843_v25, %v1926_v0  ;;  %v5911_v60 = vpop.eup %4268  ;;  %vm2773_vm2 = vweird.f32 %v4267_v59 }
 0x1cd   :  { %v2769_v46 = vsub.f32 1.0, %v2768_v39  ;;  %v904_v4 = vpack.c.bf16 %v816_v44, %v814_v19  ;;  %v5906_v34 = vadd.f32 %v1292_v23, %v1124_v33  ;;  %v2776_v5 = vand.u32 2147483647, %v5841_v10  ;;  %v4114_v19 = vld [vmem:[%s7717_s0 + $0xe0] sm:$0xff]  ;;  %vm5926_vm5 = vmor %vm2772_vm3, %vm2773_vm2 }
 0x1ce   :  { %v905_v63 = vpack.c.bf16 %v817_v14, %v815_v9  ;;  %v1935_v6 = vsel %vm5855_vm10, %v1934_v30, %v1930_v50  ;;  %v1953_v25 = vmul.f32 %v5911_v60, %v5870_v24  ;;  %v5922_v47 = vmin.f32 %v1458_v48, 1.0  ;;  %v1428_v23 = vld [vmem:[%s7718_s1 + $0xe0] sm:$0xff] }
 0x1cf   :  { %v2770_v54 = vmul.f32 %v4267_v59, %v2769_v46  ;;  %v1936_v27 = vmul.f32 %v1935_v6, %v1518_v29  ;;  %v2779_v44 = vor.u32 1.1754944e-38, %v2778_v11  ;;  %vm1958_vm6 = vweird.f32 %v5911_v60 }
 0x1d0   :  { %v509_v9 = vpop.f32.mrf.mxu0  ;;  %1165 = vmatmul.bf16.gmra.mxu2 %v904_v4  ;;  %v1954_v29 = vsub.f32 1.0, %v1953_v25  ;;  %v1554_v48 = vsub.f32 1.0, %v5922_v47  ;;  %vm2777_vm7 = vcmp.eq.f32.partialorder %v2776_v5, 8.507059e+37  ;;  %v1961_v33 = vand.u32 2147483647, %v5870_v24  ;;  %vm5961_vm10 = vmor %vm1957_vm4, %vm1958_vm6 }
 0x1d1   :  { %v2771_v39 = vadd.f32 %v4267_v59, %v2770_v54  ;;  %v678_v57 = vpop.f32.mrf.mxu1  ;;  %1334 = vmatmul.bf16.gmra.mxu3 %v905_v63  ;;  %4272 = vlog2.f32 %v1936_v27  ;;  %v510_v14 = vadd.f32 %v509_v9, %v4745_v52  ;;  %v1964_v27 = vor.u32 1.1754944e-38, %v1963_v51 }
 0x1d2   :  { %v1126_v10 = vpop.f32.mrf.mxu2  ;;  %v4271_v0 = vpop.eup %4270  ;;  %v1955_v11 = vmul.f32 %v5911_v60, %v1954_v29  ;;  %v679_v54 = vadd.f32 %v678_v57, %v4748_v53  ;;  %v1460_v25 = vmax.f32 %v1428_v23, 0.0  ;;  %vm1962_vm11 = vcmp.eq.f32.partialorder %v1961_v33, 8.507059e+37 }
 0x1d3   :  { %v2775_v7 = vsel %vm5926_vm5, %v4267_v59, %v2771_v39  ;;  %3922 = vmatmul.msk.bf16.gmra.mxu0 %vm303_vm0, %v4114_v19  ;;  %v1127_v46 = vadd.f32 %v5462_v13, %v1126_v10  ;;  %v5943_v59 = vmax.f32 %v1554_v48, 1e-05  ;;  %v5954_v50 = vadd.f32 1.0, %v4271_v0  ;;  %v1295_v5 = vpop.f32.mrf.mxu3 }
 0x1d4   :  { %v2780_v3 = vsel %vm2777_vm7, %v2779_v44, %v2775_v7  ;;  %3954 = vmatmul.msk.bf16.gmra.mxu1 %vm303_vm0, %v4114_v19  ;;  %v1736_v19 = vand.u32 2147483647, %v5573_v26  ;;  %v1956_v9 = vadd.f32 %v5911_v60, %v1955_v11  ;;  %v1520_v44 = vmax.f32 %v5832_v31, 1e-05 }
 0x1d5   :  { %v3476_v63 = vmul.f32 %v2780_v3, %v5087_v18  ;;  %4274 = vrcp.f32 %v5943_v59  ;;  %v818_v57 = vmax.f32 %v510_v14, 0.0  ;;  %v5971_v30 = vadd.f32 %v1295_v5, %v1127_v46 }
 0x1d6   :  { %4276 = vrcp.f32 %v5954_v50  ;;  %v1960_v29 = vsel %vm5961_vm10, %v5911_v60, %v1956_v9  ;;  %v819_v31 = vmax.f32 %v679_v54, 0.0  ;;  %v5985_v60 = vmin.f32 %v1460_v25, 1.0 }
 0x1d7   :  { %v3540_v39 = vadd.f32 %v3476_v63, %v5091_v2  ;;  %v4273_v24 = vpop.eup %4272  ;;  %v1965_v3 = vsel %vm1962_vm11, %v1964_v27, %v1960_v29  ;;  %v1738_v46 = vand.u32 2147483648, %v5573_v26  ;;  %v2806_v6 = vand.u32 2147483647, %v5954_v50 }
 0x1d8   :  { %v511_v10 = vpop.f32.mrf.mxu0  ;;  %v2117_v7 = vmul.f32 0.6931472, %v4273_v24  ;;  %v1966_v54 = vmul.f32 %v1965_v3, %v1520_v44  ;;  %vm1987_vm12 = vweird.f32 %v5943_v59  ;;  %v1991_v24 = vand.u32 2147483647, %v5943_v59 }
 0x1d9   :  { %v3606_v48 = vsel %vm3457_vm8, %v3540_v39, %v5772_v12  ;;  %v512_v14 = vadd.f32 %v511_v10, %v4745_v52  ;;  %v680_v33 = vpop.f32.mrf.mxu1  ;;  %vm6002_vm13 = vcmp.eq.f32.partialorder %v1736_v19, 8.507059e+37  ;;  %v1411_v10 = vld [vmem:[%s7718_s1 + $0x58] sm:$0xff]  ;;  %v1556_v19 = vsub.f32 1.0, %v5985_v60 }
 0x1da   :  { %3670 = vst [vmem:[#allocation2 + $0x90] sm:$0xff] %v3606_v48  ;;  %v681_v23 = vadd.f32 %v680_v33, %v4748_v53  ;;  %v1128_v0 = vpop.f32.mrf.mxu2  ;;  %v5989_v11 = vsel %vm2136_vm15, %v2117_v7, 0.0  ;;  %4278 = vlog2.f32 %v1966_v54  ;;  %vm2802_vm1 = vweird.f32 %v5954_v50 }
 0x1db   :  { %7813 = vst [vmem:[#allocation6_spill] sm:$0xff] %v5989_v11  ;;  %v820_v63 = vmax.f32 %v512_v14, 0.0  ;;  %v1129_v12 = vadd.f32 %v5462_v13, %v1128_v0  ;;  %v5992_v5 = vpop.eup %4274  ;;  %v2199_v9 = vadd.f32 %v5989_v11, %v5971_v30  ;;  %v1297_v25 = vpop.f32.mrf.mxu3  ;;  %v1993_v13 = vand.u32 2147483648, %v5943_v59 }
 0x1dc   :  { %v821_v39 = vmax.f32 %v681_v23, 0.0  ;;  %v4277_v27 = vpop.eup %4276  ;;  %v1983_v26 = vmul.f32 %v5992_v5, %v5943_v59  ;;  %v4115_v23 = vld [vmem:[%s7717_s0 + $0xe8] sm:$0xff]  ;;  %vm1988_vm14 = vweird.f32 %v5992_v5  ;;  %v1443_v51 = vmax.f32 %v1411_v10, 0.0 }
 0x1dd   :  { %v2798_v29 = vmul.f32 %v4277_v27, %v5954_v50  ;;  %v4044_v48 = vmul.f32 -1.442695, %v2199_v9  ;;  %v906_v7 = vpack.c.bf16 %v820_v63, %v818_v57  ;;  %v6010_v33 = vadd.f32 %v1297_v25, %v1129_v12  ;;  %vm6031_vm4 = vmor %vm1987_vm12, %vm1988_vm14 }
 0x1de   :  { %v907_v14 = vpack.c.bf16 %v821_v39, %v819_v31  ;;  %v1984_v0 = vsub.f32 1.0, %v1983_v26  ;;  %vm6018_vm2 = vcmp.eq.f32.partialorder %v2806_v6, 8.507059e+37  ;;  %v2808_v31 = vand.u32 2147483648, %v5954_v50 }
 0x1df   :  { %v2799_v3 = vsub.f32 1.0, %v2798_v29  ;;  %4280 = vpow2.f32 %v4044_v48  ;;  %v6024_v9 = vmax.f32 %v1556_v19, 1e-05  ;;  %vm2803_vm3 = vweird.f32 %v4277_v27  ;;  %v6038_v48 = vld [vmem:[%s7722_s5] ss:$0 sm:$0xff] }
 0x1e0   :  { %v514_v54 = vpop.f32.mrf.mxu0  ;;  %v1985_v12 = vmul.f32 %v5992_v5, %v1984_v0  ;;  %1170 = vmatmul.bf16.gmra.mxu2 %v906_v7  ;;  %v1522_v26 = vmax.f32 %v5922_v47, 1e-05  ;;  %v1994_v10 = vor.u32 1.1754944e-38, %v1993_v13  ;;  %v4279_v29 = vpop.eup %4278  ;;  %vm6043_vm5 = vcmp.eq.f32.partialorder %v1991_v24, 8.507059e+37  ;;  %vm2804_vm6 = vmor %vm2802_vm1, %vm2803_vm3 }
 0x1e1   :  { %v683_v63 = vpop.f32.mrf.mxu1  ;;  %v2800_v39 = vmul.f32 %v4277_v27, %v2799_v3  ;;  %1339 = vmatmul.bf16.gmra.mxu3 %v907_v14  ;;  %v1739_v59 = vor.u32 1.1754944e-38, %v1738_v46  ;;  %v2121_v19 = vmul.f32 0.6931472, %v4279_v29  ;;  %4282 = vrcp.f32 %v6024_v9 }
 0x1e2   :  { %v1131_v25 = vpop.f32.mrf.mxu2  ;;  %v1986_v47 = vadd.f32 %v5992_v5, %v1985_v12  ;;  %v6049_v13 = vmin.f32 %v1443_v51, 1.0  ;;  %v2809_v3 = vor.u32 1.1754944e-38, %v2808_v31  ;;  %v515_v12 = vadd.f32 %v514_v54, %v4745_v52  ;;  %v1430_v54 = vld [vmem:[%s7718_s1 + $0xf0] sm:$0xff] }
 0x1e3   :  { %v1132_v7 = vadd.f32 %v6038_v48, %v1131_v25  ;;  %3923 = vmatmul.msk.bf16.gmra.mxu0 %vm303_vm0, %v4115_v23  ;;  %v2801_v0 = vadd.f32 %v4277_v27, %v2800_v39  ;;  %v684_v24 = vadd.f32 %v683_v63, %v4748_v53  ;;  %v1300_v25 = vpop.f32.mrf.mxu3  ;;  %v6062_v51 = vsel %vm2136_vm15, %v2121_v19, 0.0 }
 0x1e4   :  { %3955 = vmatmul.msk.bf16.gmra.mxu1 %vm303_vm0, %v4115_v23  ;;  %v1990_v46 = vsel %vm6031_vm4, %v5992_v5, %v1986_v47  ;;  %7822 = vst [vmem:[#allocation7_spill] sm:$0xff] %v6062_v51  ;;  %v1539_v14 = vsub.f32 1.0, %v6049_v13  ;;  %v1462_v19 = vmax.f32 %v1430_v54, 0.0  ;;  %vm2017_vm7 = vweird.f32 %v6024_v9 }
 0x1e5   :  { %v4281_v39 = vpop.eup %4280  ;;  %v2805_v23 = vsel %vm2804_vm6, %v4277_v27, %v2801_v0  ;;  %v6059_v29 = vadd.f32 %v1300_v25, %v1132_v7  ;;  %v1995_v50 = vsel %vm6043_vm5, %v1994_v10, %v1990_v46  ;;  %v1505_v27 = vmax.f32 %v5546_v17, 1e-05 }
 0x1e6   :  { %v2810_v31 = vsel %vm6018_vm2, %v2809_v3, %v2805_v23  ;;  %v6071_v63 = vadd.f32 1.0, %v4281_v39  ;;  %v1996_v5 = vmul.f32 %v1995_v50, %v1522_v26  ;;  %v7823_v10 = vsel %vm5949_vm9, %v5639_v45, %v5829_v61 }
 0x1e7   :  { %v3478_v6 = vmul.f32 %v2810_v31, %v5087_v18  ;;  %v2201_v7 = vadd.f32 %v6062_v51, %v6059_v29  ;;  %v1740_v57 = vsel %vm6002_vm13, %v1739_v59, %v7823_v10  ;;  %v822_v26 = vmax.f32 %v515_v12, 0.0  ;;  %v6086_v3 = vpop.eup %4282 }
 0x1e8   :  { %v516_v47 = vpop.f32.mrf.mxu0  ;;  %4284 = vrcp.f32 %v6071_v63  ;;  %v823_v17 = vmax.f32 %v684_v24, 0.0  ;;  %v1741_v59 = vmul.f32 %v1740_v57, %v1505_v27  ;;  %v2013_v54 = vmul.f32 %v6086_v3, %v6024_v9  ;;  %v4116_v57 = vld [vmem:[%s7717_s0 + $0xf0] sm:$0xff] }
 0x1e9   :  { %v685_v0 = vpop.f32.mrf.mxu1  ;;  %v3542_v25 = vadd.f32 %v3478_v6, %v5091_v2  ;;  %v4046_v46 = vmul.f32 -1.442695, %v2201_v7  ;;  %v517_v4 = vadd.f32 %v516_v47, %v4745_v52  ;;  %4286 = vlog2.f32 %v1996_v5 }
 0x1ea   :  { %v686_v45 = vadd.f32 %v685_v0, %v4748_v53  ;;  %v1133_v61 = vpop.f32.mrf.mxu2  ;;  %v2021_v31 = vand.u32 2147483647, %v6024_v9  ;;  %v2023_v6 = vand.u32 2147483648, %v6024_v9  ;;  %v6100_v5 = vmax.f32 %v1539_v14, 1e-05 }
 0x1eb   :  { %v1134_v44 = vadd.f32 %v6038_v48, %v1133_v61  ;;  %v3608_v12 = vsel %vm3457_vm8, %v3542_v25, %v5866_v21  ;;  %4288 = vpow2.f32 %v4046_v46  ;;  %v824_v24 = vmax.f32 %v517_v4, 0.0  ;;  %v1302_v50 = vpop.f32.mrf.mxu3 }
 0x1ec   :  { %v825_v23 = vmax.f32 %v686_v45, 0.0  ;;  %3672 = vst [vmem:[#allocation2 + $0xa0] sm:$0xff] %v3608_v12  ;;  %vm2832_vm9 = vweird.f32 %v6071_v63  ;;  %v2836_v10 = vand.u32 2147483647, %v6071_v63  ;;  %v2014_v0 = vsub.f32 1.0, %v2013_v54 }
 0x1ed   :  { %v908_v27 = vpack.c.bf16 %v824_v24, %v822_v26  ;;  %v6102_v47 = vadd.f32 %v1302_v50, %v1134_v44  ;;  %v6110_v25 = vmin.f32 %v1462_v19, 1.0  ;;  %v2838_v26 = vand.u32 2147483648, %v6071_v63 }
 0x1ee   :  { %v909_v7 = vpack.c.bf16 %v825_v23, %v823_v17  ;;  %v4285_v21 = vpop.eup %4284  ;;  %v1524_v46 = vmax.f32 %v5985_v60, 1e-05  ;;  %vm2018_vm10 = vweird.f32 %v6086_v3  ;;  %v2015_v61 = vmul.f32 %v6086_v3, %v2014_v0 }
 0x1ef   :  { %7824 = vst [vmem:[#allocation8_spill] sm:$0xff] %v6102_v47  ;;  %v2828_v14 = vmul.f32 %v4285_v21, %v6071_v63  ;;  %v4287_v4 = vpop.eup %4286  ;;  %vm6117_vm11 = vcmp.eq.f32.partialorder %v2021_v31, 8.507059e+37  ;;  %v2024_v12 = vor.u32 1.1754944e-38, %v2023_v6  ;;  %v1558_v19 = vsub.f32 1.0, %v6110_v25  ;;  %vm6134_vm12 = vmor %vm2017_vm7, %vm2018_vm10 }
 0x1f0   :  { %v519_v17 = vpop.f32.mrf.mxu0  ;;  %1175 = vmatmul.bf16.gmra.mxu2 %v908_v27  ;;  %4290 = vlog2.f32 %v1741_v59  ;;  %v2125_v0 = vmul.f32 0.6931472, %v4287_v4  ;;  %v2016_v31 = vadd.f32 %v6086_v3, %v2015_v61  ;;  %vm2833_vm13 = vweird.f32 %v4285_v21 }
 0x1f1   :  { %v688_v45 = vpop.f32.mrf.mxu1  ;;  %v4289_v24 = vpop.eup %4288  ;;  %v2829_v23 = vsub.f32 1.0, %v2828_v14  ;;  %1344 = vmatmul.bf16.gmra.mxu3 %v909_v7  ;;  %v520_v50 = vadd.f32 %v519_v17, %v4745_v52  ;;  %v6138_v27 = vmax.f32 %v1558_v19, 1e-05  ;;  %4292 = vrcp.f32 %v6100_v5  ;;  %vm2834_vm1 = vmor %vm2832_vm9, %vm2833_vm13 }
 0x1f2   :  { %v6124_v60 = vadd.f32 %v688_v45, %v4748_v53  ;;  %v6126_v54 = vadd.f32 1.0, %v4289_v24  ;;  %v1768_v59 = vand.u32 2147483648, %v6100_v5  ;;  %vm6143_vm14 = vcmp.eq.f32.partialorder %v2836_v10, 8.507059e+37 }
 0x1f3   :  { %3924 = vmatmul.msk.bf16.gmra.mxu0 %vm303_vm0, %v4116_v57  ;;  %v2830_v7 = vmul.f32 %v4285_v21, %v2829_v23  ;;  %v2839_v17 = vor.u32 1.1754944e-38, %v2838_v26  ;;  %v1136_v9 = vpop.f32.mrf.mxu2  ;;  %v1766_v45 = vand.u32 2147483647, %v6100_v5  ;;  %v826_v10 = vmax.f32 %v520_v50, 0.0 }
 0x1f4   :  { %3956 = vmatmul.msk.bf16.gmra.mxu1 %vm303_vm0, %v4116_v57  ;;  %4294 = vrcp.f32 %v6126_v54  ;;  %v1305_v4 = vpop.f32.mrf.mxu3  ;;  %v1137_v19 = vadd.f32 %v6038_v48, %v1136_v9  ;;  %v2020_v57 = vsel %vm6134_vm12, %v6086_v3, %v2016_v31  ;;  %v827_v26 = vmax.f32 %v6124_v60, 0.0 }
 0x1f5   :  { %v2831_v61 = vadd.f32 %v4285_v21, %v2830_v7  ;;  %4296 = vrcp.f32 %v6138_v27  ;;  %v6158_v24 = vsel %vm2136_vm15, %v2125_v0, 0.0  ;;  %v2025_v23 = vsel %vm6117_vm11, %v2024_v12, %v2020_v57 }
 0x1f6   :  { %7831 = vst [vmem:[#allocation9_spill] sm:$0xff] %v6158_v24  ;;  %v4291_v7 = vpop.eup %4290  ;;  %v6162_v39 = vadd.f32 %v1305_v4, %v1137_v19  ;;  %v2026_v3 = vmul.f32 %v2025_v23, %v1524_v46  ;;  %v6164_v31 = vor.u32 1.1754944e-38, %v1768_v59  ;;  %v2868_v60 = vand.u32 2147483648, %v6126_v54 }
 0x1f7   :  { %v2835_v9 = vsel %vm2834_vm1, %v4285_v21, %v2831_v61  ;;  %v6171_v44 = vpop.eup %4292  ;;  %vm2862_vm2 = vweird.f32 %v6126_v54  ;;  %vm1762_vm3 = vweird.f32 %v6100_v5  ;;  %vm2047_vm4 = vweird.f32 %v6138_v27 }
 0x1f8   :  { %v521_v6 = vpop.f32.mrf.mxu0  ;;  %v2840_v63 = vsel %vm6143_vm14, %v2839_v17, %v2835_v9  ;;  %v2203_v46 = vadd.f32 %v6158_v24, %v6162_v39  ;;  %4298 = vlog2.f32 %v2026_v3  ;;  %v2053_v17 = vand.u32 2147483648, %v6138_v27 }
 0x1f9   :  { %v522_v0 = vadd.f32 %v521_v6, %v4745_v52  ;;  %v690_v47 = vpop.f32.mrf.mxu1  ;;  %v3480_v21 = vmul.f32 %v2840_v63, %v5087_v18  ;;  %v2091_v4 = vmul.f32 0.6931472, %v4291_v7  ;;  %v2051_v9 = vand.u32 2147483647, %v6138_v27 }
 0x1fa   :  { %v691_v12 = vadd.f32 %v690_v47, %v4748_v53  ;;  %v4295_v59 = vpop.eup %4294  ;;  %v4048_v23 = vmul.f32 -1.442695, %v2203_v46  ;;  %vm6193_vm6 = vcmp.eq.f32.partialorder %v1766_v45, 8.507059e+37  ;;  %vm1763_vm11 = vweird.f32 %v6171_v44 }
 0x1fb   :  { %v828_v14 = vmax.f32 %v522_v0, 0.0  ;;  %v6181_v61 = vpop.eup %4296  ;;  %v3544_v19 = vadd.f32 %v3480_v21, %v5091_v2  ;;  %v2858_v57 = vmul.f32 %v4295_v59, %v6126_v54  ;;  %v1138_v3 = vpop.f32.mrf.mxu2  ;;  %v6201_v24 = vsel %vm2136_vm15, %v2091_v4, 0.0  ;;  %vm6246_vm14 = vmor %vm1762_vm3, %vm1763_vm11 }
 0x1fc   :  { %v829_v6 = vmax.f32 %v691_v12, 0.0  ;;  %v1307_v63 = vpop.f32.mrf.mxu3  ;;  %v2043_v0 = vmul.f32 %v6181_v61, %v6138_v27  ;;  %vm2048_vm5 = vweird.f32 %v6181_v61  ;;  %4300 = vpow2.f32 %v4048_v23  ;;  %v4117_v12 = vld [vmem:[%s7717_s0 + $0xf8] sm:$0xff] }
 0x1fd   :  { %v910_v47 = vpack.c.bf16 %v828_v14, %v826_v10  ;;  %v3610_v7 = vsel %vm3457_vm8, %v3544_v19, %v5971_v30  ;;  %v2859_v50 = vsub.f32 1.0, %v2858_v57  ;;  %v1139_v21 = vadd.f32 %v6038_v48, %v1138_v3  ;;  %vm6217_vm9 = vmor %vm2047_vm4, %vm2048_vm5 }
 0x1fe   :  { %3674 = vst [vmem:[#allocation2 + $0xb0] sm:$0xff] %v3610_v7  ;;  %v911_v10 = vpack.c.bf16 %v829_v6, %v827_v26  ;;  %v2044_v14 = vsub.f32 1.0, %v2043_v0  ;;  %v1758_v30 = vmul.f32 %v6171_v44, %v6100_v5  ;;  %v4299_v19 = vpop.eup %4298  ;;  %vm2863_vm7 = vweird.f32 %v4295_v59  ;;  %v1413_v6 = vld [vmem:[%s7718_s1 + $0x68] sm:$0xff] }
 0x1ff   :  { %v2860_v57 = vmul.f32 %v4295_v59, %v2859_v50  ;;  %v6205_v45 = vadd.f32 %v1307_v63, %v1139_v21  ;;  %v2186_v26 = vadd.f32 %v6201_v24, %v5377_v43  ;;  %v2869_v3 = vor.u32 1.1754944e-38, %v2868_v60  ;;  %vm2864_vm12 = vmor %vm2862_vm2, %vm2863_vm7 }
 0x200   :  { %v524_v23 = vpop.f32.mrf.mxu0  ;;  %v2045_v4 = vmul.f32 %v6181_v61, %v2044_v14  ;;  %v2054_v7 = vor.u32 1.1754944e-38, %v2053_v17  ;;  %v1759_v51 = vsub.f32 1.0, %v1758_v30  ;;  %1180 = vmatmul.bf16.gmra.mxu2 %v910_v47  ;;  %vm6221_vm10 = vcmp.eq.f32.partialorder %v2051_v9, 8.507059e+37 }
 0x201   :  { %7834 = vst [vmem:[#allocation10_spill] sm:$0xff] %v6205_v45  ;;  %v693_v0 = vpop.f32.mrf.mxu1  ;;  %v2861_v11 = vadd.f32 %v4295_v59, %v2860_v57  ;;  %1349 = vmatmul.bf16.gmra.mxu3 %v911_v10  ;;  %v4031_v60 = vmul.f32 -1.442695, %v2186_v26  ;;  %v2129_v17 = vmul.f32 0.6931472, %v4299_v19  ;;  %v1445_v21 = vmax.f32 %v1413_v6, 0.0 }
 0x202   :  { %v2046_v27 = vadd.f32 %v6181_v61, %v2045_v4  ;;  %v1760_v47 = vmul.f32 %v6171_v44, %v1759_v51  ;;  %v4301_v10 = vpop.eup %4300  ;;  %v7839_v14 = vand.u32 2147483647, %v6126_v54  ;;  %v1526_v30 = vmax.f32 %v6110_v25, 1e-05 }
 0x203   :  { %3925 = vmatmul.msk.bf16.gmra.mxu0 %vm303_vm0, %v4117_v12  ;;  %v2865_v9 = vsel %vm2864_vm12, %v4295_v59, %v2861_v11  ;;  %4302 = vpow2.f32 %v4031_v60  ;;  %v6236_v26 = vadd.f32 1.0, %v4301_v10  ;;  %v1141_v19 = vpop.f32.mrf.mxu2  ;;  %v525_v54 = vadd.f32 %v524_v23, %v4745_v52 }
 0x204   :  { %vm2867_vm13 = vcmp.eq.f32.partialorder %v7839_v14, 8.507059e+37  ;;  %3957 = vmatmul.msk.bf16.gmra.mxu1 %vm303_vm0, %v4117_v12  ;;  %v1310_v45 = vpop.f32.mrf.mxu3  ;;  %v2050_v51 = vsel %vm6217_vm9, %v6181_v61, %v2046_v27  ;;  %v1761_v6 = vadd.f32 %v6171_v44, %v1760_v47  ;;  %v1142_v59 = vadd.f32 %v6038_v48, %v1141_v19 }
 0x205   :  { %v2870_v57 = vsel %vm2867_vm13, %v2869_v3, %v2865_v9  ;;  %v2055_v12 = vsel %vm6221_vm10, %v2054_v7, %v2050_v51  ;;  %4304 = vrcp.f32 %v6236_v26  ;;  %v694_v61 = vadd.f32 %v693_v0, %v4748_v53 }
 0x206   :  { %v3482_v25 = vmul.f32 %v2870_v57, %v5087_v18  ;;  %v6258_v3 = vsel %vm2136_vm15, %v2129_v17, 0.0  ;;  %v6260_v5 = vmin.f32 %v1445_v21, 1.0  ;;  %v6263_v50 = vadd.f32 %v1310_v45, %v1142_v59 }
 0x207   :  { %7842 = vst [vmem:[#allocation11_spill] sm:$0xff] %v6258_v3  ;;  %v2056_v23 = vmul.f32 %v2055_v12, %v1526_v30  ;;  %v1765_v63 = vsel %vm6246_vm14, %v6171_v44, %v1761_v6  ;;  %v830_v44 = vmax.f32 %v525_v54, 0.0  ;;  %v7843_v14 = vmax.f32 %v6049_v13, 1e-05 }
 0x208   :  { %v3546_v4 = vadd.f32 %v3482_v25, %v5091_v2  ;;  %v526_v60 = vpop.f32.mrf.mxu0  ;;  %v1770_v0 = vsel %vm6193_vm6, %v6164_v31, %v1765_v63  ;;  %v2205_v45 = vadd.f32 %v6258_v3, %v6263_v50  ;;  %v831_v31 = vmax.f32 %v694_v61, 0.0 }
 0x209   :  { %v527_v7 = vadd.f32 %v526_v60, %v4745_v52  ;;  %v695_v27 = vpop.f32.mrf.mxu1  ;;  %v4303_v17 = vpop.eup %4302  ;;  %4306 = vlog2.f32 %v2056_v23  ;;  %v1771_v46 = vmul.f32 %v1770_v0, %v7843_v14  ;;  %v1541_v19 = vsub.f32 1.0, %v6260_v5 }
 0x20a   :  { %v3612_v47 = vsel %vm3457_vm8, %v3546_v4, %v6059_v29  ;;  %v696_v21 = vadd.f32 %v695_v27, %v4748_v53  ;;  %v6278_v9 = vadd.f32 1.0, %v4303_v17  ;;  %v4050_v30 = vmul.f32 -1.442695, %v2205_v45  ;;  %v1415_v29 = vld [vmem:[%s7718_s1 + $0x78] sm:$0xff] }
 0x20b   :  { %3676 = vst [vmem:[#allocation2 + $0xc0] sm:$0xff] %v3612_v47  ;;  %v832_v10 = vmax.f32 %v527_v7, 0.0  ;;  %v4305_v51 = vpop.eup %4304  ;;  %v2896_v6 = vand.u32 2147483647, %v6236_v26  ;;  %v1143_v11 = vpop.f32.mrf.mxu2  ;;  %v2898_v61 = vand.u32 2147483648, %v6236_v26  ;;  %v1447_v60 = vmax.f32 %v1415_v29, 0.0 }
 0x20c   :  { %v833_v57 = vmax.f32 %v696_v21, 0.0  ;;  %v1312_v25 = vpop.f32.mrf.mxu3  ;;  %4308 = vrcp.f32 %v6278_v9  ;;  %v2888_v13 = vmul.f32 %v4305_v51, %v6236_v26  ;;  %v1144_v4 = vadd.f32 %v6038_v48, %v1143_v11 }
 0x20d   :  { %4310 = vpow2.f32 %v4050_v30  ;;  %v912_v59 = vpack.c.bf16 %v832_v10, %v830_v44  ;;  %vm2892_vm0 = vweird.f32 %v6236_v26  ;;  %v2643_v27 = vand.u32 2147483648, %v6278_v9 }
 0x20e   :  { %v913_v12 = vpack.c.bf16 %v833_v57, %v831_v31  ;;  %4312 = vlog2.f32 %v1771_v46  ;;  %v2889_v63 = vsub.f32 1.0, %v2888_v13  ;;  %v6294_v0 = vmax.f32 %v1541_v19, 1e-05 }
 0x20f   :  { %v4307_v23 = vpop.eup %4306  ;;  %vm6296_vm1 = vcmp.eq.f32.partialorder %v2896_v6, 8.507059e+37  ;;  %v6300_v47 = vadd.f32 %v1312_v25, %v1144_v4  ;;  %vm2893_vm2 = vweird.f32 %v4305_v51  ;;  %v2641_v14 = vand.u32 2147483647, %v6278_v9 }
 0x210   :  { %v529_v7 = vpop.f32.mrf.mxu0  ;;  %v2133_v44 = vmul.f32 0.6931472, %v4307_v23  ;;  %v2890_v10 = vmul.f32 %v4305_v51, %v2889_v63  ;;  %1185 = vmatmul.bf16.gmra.mxu2 %v912_v59  ;;  %4314 = vrcp.f32 %v6294_v0  ;;  %v2899_v31 = vor.u32 1.1754944e-38, %v2898_v61  ;;  %vm2894_vm5 = vmor %vm2892_vm0, %vm2893_vm2 }
 0x211   :  { %7846 = vst [vmem:[#allocation12_spill] sm:$0xff] %v6300_v47  ;;  %v6303_v45 = vadd.f32 %v529_v7, %v4745_v52  ;;  %v698_v21 = vpop.f32.mrf.mxu1  ;;  %1354 = vmatmul.bf16.gmra.mxu3 %v913_v12  ;;  %vm2637_vm3 = vweird.f32 %v6278_v9  ;;  %v6311_v57 = vmin.f32 %v1447_v60, 1.0  ;;  %v2644_v11 = vor.u32 1.1754944e-38, %v2643_v27 }
 0x212   :  { %v6307_v46 = vpop.eup %4308  ;;  %v699_v30 = vadd.f32 %v698_v21, %v4748_v53  ;;  %v2891_v29 = vadd.f32 %v4305_v51, %v2890_v10  ;;  %vm1792_vm4 = vweird.f32 %v6294_v0  ;;  %v6323_v4 = vsel %vm2136_vm15, %v2133_v44, 0.0 }
 0x213   :  { %v4311_v19 = vpop.eup %4310  ;;  %v2633_v6 = vmul.f32 %v6307_v46, %v6278_v9  ;;  %v834_v59 = vmax.f32 %v6303_v45, 0.0  ;;  %v1146_v12 = vpop.f32.mrf.mxu2  ;;  %7847 = vst [vmem:[#allocation13_spill] sm:$0xff] %v6323_v4  ;;  %v1796_v60 = vand.u32 2147483647, %v6294_v0  ;;  %vm6327_vm6 = vcmp.eq.f32.partialorder %v2641_v14, 8.507059e+37 }
 0x214   :  { %v4313_v25 = vpop.eup %4312  ;;  %v6319_v13 = vadd.f32 1.0, %v4311_v19  ;;  %v1315_v61 = vpop.f32.mrf.mxu3  ;;  %v2895_v23 = vsel %vm2894_vm5, %v4305_v51, %v2891_v29  ;;  %v1147_v63 = vadd.f32 %v6038_v48, %v1146_v12  ;;  %v835_v45 = vmax.f32 %v699_v30, 0.0 }
 0x215   :  { %v2634_v7 = vsub.f32 1.0, %v2633_v6  ;;  %v2095_v26 = vmul.f32 0.6931472, %v4313_v25  ;;  %v2900_v21 = vsel %vm6296_vm1, %v2899_v31, %v2895_v23  ;;  %v1798_v44 = vand.u32 2147483648, %v6294_v0 }
 0x216   :  { %4316 = vrcp.f32 %v6319_v13  ;;  %v4315_v10 = vpop.eup %4314  ;;  %v3484_v19 = vmul.f32 %v2900_v21, %v5087_v18  ;;  %v6336_v51 = vadd.f32 %v1315_v61, %v1147_v63  ;;  %vm2638_vm7 = vweird.f32 %v6307_v46 }
 0x217   :  { %v2635_v14 = vmul.f32 %v6307_v46, %v2634_v7  ;;  %v6342_v17 = vsel %vm2136_vm15, %v2095_v26, 0.0  ;;  %v1788_v31 = vmul.f32 %v4315_v10, %v6294_v0  ;;  %vm6345_vm9 = vcmp.eq.f32.partialorder %v1796_v60, 8.507059e+37  ;;  %vm6364_vm10 = vmor %vm2637_vm3, %vm2638_vm7 }
 0x218   :  { %v531_v29 = vpop.f32.mrf.mxu0  ;;  %v3548_v12 = vadd.f32 %v3484_v19, %v5091_v2  ;;  %v2207_v61 = vadd.f32 %v6323_v4, %v6336_v51  ;;  %v1543_v63 = vsub.f32 1.0, %v6311_v57  ;;  %v2188_v26 = vadd.f32 %v6342_v17, %v5468_v37 }
 0x219   :  { %v532_v6 = vadd.f32 %v531_v29, %v4745_v52  ;;  %v700_v25 = vpop.f32.mrf.mxu1  ;;  %v2636_v21 = vadd.f32 %v6307_v46, %v2635_v14  ;;  %v1789_v29 = vsub.f32 1.0, %v1788_v31  ;;  %vm1793_vm11 = vweird.f32 %v4315_v10 }
 0x21a   :  { %v701_v23 = vadd.f32 %v700_v25, %v4748_v53  ;;  %v3614_v60 = vsel %vm3457_vm8, %v3548_v12, %v6162_v39  ;;  %v4052_v54 = vmul.f32 -1.442695, %v2207_v61  ;;  %v4033_v39 = vmul.f32 -1.442695, %v2188_v26  ;;  %vm6374_vm12 = vmor %vm1792_vm4, %vm1793_vm11 }
 0x21b   :  { %v836_v7 = vmax.f32 %v532_v6, 0.0  ;;  %3678 = vst [vmem:[#allocation2 + $0xd0] sm:$0xff] %v3614_v60  ;;  %v1148_v6 = vpop.f32.mrf.mxu2  ;;  %v2640_v31 = vsel %vm6364_vm10, %v6307_v46, %v2636_v21  ;;  %v1790_v12 = vmul.f32 %v4315_v10, %v1789_v29  ;;  %v1799_v61 = vor.u32 1.1754944e-38, %v1798_v44 }
 0x21c   :  { %v837_v19 = vmax.f32 %v701_v23, 0.0  ;;  %v4317_v14 = vpop.eup %4316  ;;  %v1317_v4 = vpop.f32.mrf.mxu3  ;;  %4318 = vpow2.f32 %v4052_v54  ;;  %v1149_v60 = vadd.f32 %v6038_v48, %v1148_v6  ;;  %v2645_v25 = vsel %vm6327_vm6, %v2644_v11, %v2640_v31 }
 0x21d   :  { %v2918_v23 = vmul.f32 %v4317_v14, %v6319_v13  ;;  %v914_v9 = vpack.c.bf16 %v836_v7, %v834_v59  ;;  %4320 = vpow2.f32 %v4033_v39  ;;  %v1791_v46 = vadd.f32 %v4315_v10, %v1790_v12 }
 0x21e   :  { %v915_v47 = vpack.c.bf16 %v837_v19, %v835_v45  ;;  %v2926_v44 = vand.u32 2147483647, %v6319_v13  ;;  %v3467_v54 = vmul.f32 %v2645_v25, %v5087_v18  ;;  %v6383_v59 = vmax.f32 %v1543_v63, 1e-05 }
 0x21f   :  { %v2919_v21 = vsub.f32 1.0, %v2918_v23  ;;  %v2928_v0 = vand.u32 2147483648, %v6319_v13  ;;  %v6386_v45 = vadd.f32 %v1317_v4, %v1149_v60  ;;  %v1795_v29 = vsel %vm6374_vm12, %v4315_v10, %v1791_v46 }
 0x220   :  { %v534_v26 = vpop.f32.mrf.mxu0  ;;  %vm2923_vm13 = vweird.f32 %v4317_v14  ;;  %1190 = vmatmul.bf16.gmra.mxu2 %v914_v9  ;;  %v3531_v11 = vadd.f32 %v3467_v54, %v5091_v2  ;;  %4322 = vrcp.f32 %v6383_v59  ;;  %vm2922_vm14 = vweird.f32 %v6319_v13 }
 0x221   :  { %v703_v7 = vpop.f32.mrf.mxu1  ;;  %v2920_v27 = vmul.f32 %v4317_v14, %v2919_v21  ;;  %1359 = vmatmul.bf16.gmra.mxu3 %v915_v47  ;;  %v1800_v63 = vsel %vm6345_vm9, %v1799_v61, %v1795_v29  ;;  %vm6395_vm0 = vcmp.eq.f32.partialorder %v2926_v44, 8.507059e+37  ;;  %v7858_v47 = vmax.f32 %v6260_v5, 1e-05  ;;  %vm2924_vm1 = vmor %vm2922_vm14, %vm2923_vm13 }
 0x222   :  { %v4319_v19 = vpop.eup %4318  ;;  %v3597_v3 = vsel %vm3457_vm8, %v3531_v11, %v5377_v43  ;;  %v2929_v39 = vor.u32 1.1754944e-38, %v2928_v0  ;;  %v535_v30 = vadd.f32 %v534_v26, %v4745_v52  ;;  %v704_v12 = vadd.f32 %v703_v7, %v4748_v53 }
 0x223   :  { %v2921_v4 = vadd.f32 %v4317_v14, %v2920_v27  ;;  %v1801_v10 = vmul.f32 %v1800_v63, %v7858_v47  ;;  %v4321_v31 = vpop.eup %4320  ;;  %v6404_v13 = vadd.f32 1.0, %v4319_v19  ;;  %v1151_v61 = vpop.f32.mrf.mxu2  ;;  %3661 = vst [vmem:[#allocation2 + $0x48] sm:$0xff] %v3597_v3  ;;  %v1826_v5 = vand.u32 2147483647, %v6383_v59 }
 0x224   :  { %v1320_v23 = vpop.f32.mrf.mxu3  ;;  %v1152_v60 = vadd.f32 %v6038_v48, %v1151_v61  ;;  %v6409_v25 = vadd.f32 1.0, %v4321_v31  ;;  %v838_v54 = vmax.f32 %v535_v30, 0.0  ;;  %v839_v0 = vmax.f32 %v704_v12, 0.0 }
 0x225   :  { %v2925_v9 = vsel %vm2924_vm1, %v4317_v14, %v2921_v4  ;;  %4324 = vlog2.f32 %v1801_v10  ;;  %v1511_v14 = vmax.f32 %v6311_v57, 1e-05  ;;  %vm1822_vm2 = vweird.f32 %v6383_v59 }
 0x226   :  { %v2930_v43 = vsel %vm6395_vm0, %v2929_v39, %v2925_v9  ;;  %4326 = vrcp.f32 %v6404_v13  ;;  %v6415_v46 = vpop.eup %4322  ;;  %v6418_v44 = vadd.f32 %v1320_v23, %v1152_v60  ;;  %v2956_v11 = vand.u32 2147483647, %v6404_v13 }
 0x227   :  { %v3486_v21 = vmul.f32 %v2930_v43, %v5087_v18  ;;  %4328 = vrcp.f32 %v6409_v25  ;;  %v1818_v6 = vmul.f32 %v6415_v46, %v6383_v59  ;;  %vm6431_vm3 = vcmp.eq.f32.partialorder %v1826_v5, 8.507059e+37 }
 0x228   :  { %v536_v26 = vpop.f32.mrf.mxu0  ;;  %v2209_v63 = vadd.f32 %v4979_v38, %v6418_v44  ;;  %v1828_v47 = vand.u32 2147483648, %v6383_v59  ;;  %v2958_v39 = vand.u32 2147483648, %v6404_v13  ;;  %vm2952_vm4 = vweird.f32 %v6404_v13 }
 0x229   :  { %v537_v7 = vadd.f32 %v536_v26, %v4745_v52  ;;  %v705_v29 = vpop.f32.mrf.mxu1  ;;  %v3550_v27 = vadd.f32 %v3486_v21, %v5091_v2  ;;  %v1819_v60 = vsub.f32 1.0, %v1818_v6  ;;  %vm1823_vm5 = vweird.f32 %v6415_v46 }
 0x22a   :  { %v706_v19 = vadd.f32 %v705_v29, %v4748_v53  ;;  %v4054_v38 = vmul.f32 -1.442695, %v2209_v63  ;;  %vm6445_vm6 = vcmp.eq.f32.partialorder %v2956_v11, 8.507059e+37  ;;  %v2959_v6 = vor.u32 1.1754944e-38, %v2958_v39  ;;  %vm6466_vm7 = vmor %vm1822_vm2, %vm1823_vm5 }
 0x22b   :  { %v840_v4 = vmax.f32 %v537_v7, 0.0  ;;  %v4325_v10 = vpop.eup %4324  ;;  %v3616_v31 = vsel %vm3457_vm8, %v3550_v27, %v6263_v50  ;;  %v1153_v61 = vpop.f32.mrf.mxu2  ;;  %v2671_v27 = vand.u32 2147483647, %v6409_v25  ;;  %v1829_v39 = vor.u32 1.1754944e-38, %v1828_v47 }
 0x22c   :  { %v841_v30 = vmax.f32 %v706_v19, 0.0  ;;  %v4327_v12 = vpop.eup %4326  ;;  %3680 = vst [vmem:[#allocation2 + $0xe0] sm:$0xff] %v3616_v31  ;;  %v1322_v23 = vpop.f32.mrf.mxu3  ;;  %v2099_v9 = vmul.f32 0.6931472, %v4325_v10  ;;  %4330 = vpow2.f32 %v4054_v38  ;;  %v1154_v7 = vadd.f32 %v6038_v48, %v1153_v61  ;;  %v1417_v61 = vld [vmem:[%s7718_s1 + $0x88] sm:$0xff] }
 0x22d   :  { %v6442_v43 = vpop.eup %4328  ;;  %v2948_v5 = vmul.f32 %v4327_v12, %v6404_v13  ;;  %v916_v21 = vpack.c.bf16 %v840_v4, %v838_v54  ;;  %v1820_v31 = vmul.f32 %v6415_v46, %v1819_v60  ;;  %v2673_v38 = vand.u32 2147483648, %v6409_v25 }
 0x22e   :  { %v917_v26 = vpack.c.bf16 %v841_v30, %v839_v0  ;;  %v2663_v29 = vmul.f32 %v6442_v43, %v6409_v25  ;;  %v6454_v63 = vsel %vm2136_vm15, %v2099_v9, 0.0  ;;  %v6459_v54 = vadd.f32 %v1322_v23, %v1154_v7 }
 0x22f   :  { %v2949_v19 = vsub.f32 1.0, %v2948_v5  ;;  %v2190_v11 = vadd.f32 %v6454_v63, %v5558_v62  ;;  %vm2953_vm9 = vweird.f32 %v4327_v12  ;;  %v1821_v60 = vadd.f32 %v6415_v46, %v1820_v31 }
 0x230   :  { %v539_v10 = vpop.f32.mrf.mxu0  ;;  %v2664_v4 = vsub.f32 1.0, %v2663_v29  ;;  %1195 = vmatmul.bf16.gmra.mxu2 %v916_v21  ;;  %v2210_v5 = vadd.f32 %v5013_v35, %v6459_v54  ;;  %vm2668_vm10 = vweird.f32 %v6442_v43  ;;  %vm2954_vm11 = vmor %vm2952_vm4, %vm2953_vm9  ;;  %vm2667_vm12 = vweird.f32 %v6409_v25 }
 0x231   :  { %v708_v0 = vpop.f32.mrf.mxu1  ;;  %v2950_v9 = vmul.f32 %v4327_v12, %v2949_v19  ;;  %1364 = vmatmul.bf16.gmra.mxu3 %v917_v26  ;;  %v4035_v23 = vmul.f32 -1.442695, %v2190_v11  ;;  %v540_v59 = vadd.f32 %v539_v10, %v4745_v52  ;;  %v1825_v21 = vsel %vm6466_vm7, %v6415_v46, %v1821_v60  ;;  %vm2669_vm14 = vmor %vm2667_vm12, %vm2668_vm10 }
 0x232   :  { %v2665_v7 = vmul.f32 %v6442_v43, %v2664_v4  ;;  %v4331_v47 = vpop.eup %4330  ;;  %v1449_v26 = vmax.f32 %v1417_v61, 0.0  ;;  %v4055_v35 = vmul.f32 -1.442695, %v2210_v5  ;;  %v1830_v4 = vsel %vm6431_vm3, %v1829_v39, %v1825_v21 }
 0x233   :  { %v2951_v29 = vadd.f32 %v4327_v12, %v2950_v9  ;;  %4332 = vpow2.f32 %v4035_v23  ;;  %v6484_v19 = vadd.f32 1.0, %v4331_v47  ;;  %v1156_v11 = vpop.f32.mrf.mxu2  ;;  %v709_v23 = vadd.f32 %v708_v0, %v4748_v53 }
 0x234   :  { %v1325_v10 = vpop.f32.mrf.mxu3  ;;  %v2666_v31 = vadd.f32 %v6442_v43, %v2665_v7  ;;  %v1157_v30 = vadd.f32 %v6038_v48, %v1156_v11  ;;  %vm6495_vm13 = vcmp.eq.f32.partialorder %v2671_v27, 8.507059e+37  ;;  %v1831_v3 = vmul.f32 %v1830_v4, %v1511_v14 }
 0x235   :  { %v2955_v9 = vsel %vm2954_vm11, %v4327_v12, %v2951_v29  ;;  %4334 = vrcp.f32 %v6484_v19  ;;  %v2674_v25 = vor.u32 1.1754944e-38, %v2673_v38  ;;  %v842_v50 = vmax.f32 %v540_v59, 0.0 }
 0x236   :  { %v2960_v13 = vsel %vm6445_vm6, %v2959_v6, %v2955_v9  ;;  %4336 = vpow2.f32 %v4055_v35  ;;  %v6502_v0 = vadd.f32 %v1325_v10, %v1157_v30  ;;  %v2670_v61 = vsel %vm2669_vm14, %v6442_v43, %v2666_v31 }
 0x237   :  { %v3488_v12 = vmul.f32 %v2960_v13, %v5087_v18  ;;  %v6508_v60 = vmin.f32 %v1449_v26, 1.0  ;;  %v843_v5 = vmax.f32 %v709_v23, 0.0  ;;  %v2675_v38 = vsel %vm6495_vm13, %v2674_v25, %v2670_v61 }
 0x238   :  { %v541_v39 = vpop.f32.mrf.mxu0  ;;  %v2211_v7 = vadd.f32 %v5081_v8, %v6502_v0  ;;  %4338 = vlog2.f32 %v1831_v3  ;;  %v3469_v35 = vmul.f32 %v2675_v38, %v5087_v18  ;;  %v2986_v8 = vand.u32 2147483647, %v6484_v19 }
 0x239   :  { %v542_v6 = vadd.f32 %v541_v39, %v4745_v52  ;;  %v710_v27 = vpop.f32.mrf.mxu1  ;;  %v4333_v57 = vpop.eup %4332  ;;  %v3552_v14 = vadd.f32 %v3488_v12, %v5091_v2  ;;  %v2988_v10 = vand.u32 2147483648, %v6484_v19  ;;  %v1545_v25 = vsub.f32 1.0, %v6508_v60 }
 0x23a   :  { %v711_v47 = vadd.f32 %v710_v27, %v4748_v53  ;;  %v6516_v59 = vadd.f32 1.0, %v4333_v57  ;;  %v4056_v21 = vmul.f32 -1.442695, %v2211_v7  ;;  %v3533_v3 = vadd.f32 %v3469_v35, %v5091_v2 }
 0x23b   :  { %v844_v29 = vmax.f32 %v542_v6, 0.0  ;;  %v3618_v43 = vsel %vm3457_vm8, %v3552_v14, %v6336_v51  ;;  %v4335_v11 = vpop.eup %4334  ;;  %v1158_v31 = vpop.f32.mrf.mxu2  ;;  %vm2982_vm0 = vweird.f32 %v6484_v19  ;;  %vm6532_vm1 = vcmp.eq.f32.partialorder %v2986_v8, 8.507059e+37 }
 0x23c   :  { %v845_v26 = vmax.f32 %v711_v47, 0.0  ;;  %3682 = vst [vmem:[#allocation2 + $0xf0] sm:$0xff] %v3618_v43  ;;  %v1327_v4 = vpop.f32.mrf.mxu3  ;;  %4340 = vrcp.f32 %v6516_v59  ;;  %v4337_v9 = vpop.eup %4336  ;;  %v2978_v23 = vmul.f32 %v4335_v11, %v6484_v19  ;;  %v1159_v46 = vadd.f32 %v6038_v48, %v1158_v31 }
 0x23d   :  { %4342 = vpow2.f32 %v4056_v21  ;;  %v918_v30 = vpack.c.bf16 %v844_v29, %v842_v50  ;;  %v6526_v13 = vadd.f32 1.0, %v4337_v9  ;;  %v2989_v61 = vor.u32 1.1754944e-38, %v2988_v10 }
 0x23e   :  { %v919_v51 = vpack.c.bf16 %v845_v26, %v843_v5  ;;  %v2979_v12 = vsub.f32 1.0, %v2978_v23  ;;  %v4339_v6 = vpop.eup %4338  ;;  %vm2983_vm2 = vweird.f32 %v4335_v11  ;;  %v6537_v48 = vadd.f32 %v1327_v4, %v1159_v46 }
 0x23f   :  { %4344 = vrcp.f32 %v6526_v13  ;;  %v2701_v14 = vand.u32 2147483647, %v6516_v59  ;;  %v3001_v7 = vand.u32 2147483647, %v6526_v13  ;;  %v3003_v47 = vand.u32 2147483648, %v6526_v13  ;;  %vm2984_vm3 = vmor %vm2982_vm0, %vm2983_vm2 }
 0x240   :  { %v544_v39 = vpop.f32.mrf.mxu0  ;;  %v2980_v57 = vmul.f32 %v4335_v11, %v2979_v12  ;;  %1200 = vmatmul.bf16.gmra.mxu2 %v918_v30  ;;  %v3599_v29 = vsel %vm3457_vm8, %v3533_v3, %v5468_v37  ;;  %v2703_v38 = vand.u32 2147483648, %v6516_v59  ;;  %v2212_v26 = vadd.f32 %v5096_v20, %v6537_v48  ;;  %v6564_v30 = vld [vmem:[%s7722_s5] ss:$0 sm:$0xff] }
 0x241   :  { %v713_v50 = vpop.f32.mrf.mxu1  ;;  %1369 = vmatmul.bf16.gmra.mxu3 %v919_v51  ;;  %v545_v35 = vadd.f32 %v544_v39, %v4745_v52  ;;  %3663 = vst [vmem:[#allocation2 + $0x58] sm:$0xff] %v3599_v29  ;;  %vm2697_vm4 = vweird.f32 %v6516_v59  ;;  %v2103_v9 = vmul.f32 0.6931472, %v4339_v6  ;;  %vm2997_vm5 = vweird.f32 %v6526_v13 }
 0x242   :  { %v6540_v5 = vpop.eup %4340  ;;  %v2981_v21 = vadd.f32 %v4335_v11, %v2980_v57  ;;  %v714_v37 = vadd.f32 %v713_v50, %v4748_v53  ;;  %v4057_v23 = vmul.f32 -1.442695, %v2212_v26  ;;  %vm6570_vm6 = vcmp.eq.f32.partialorder %v2701_v14, 8.507059e+37 }
 0x243   :  { %v4343_v43 = vpop.eup %4342  ;;  %v2693_v8 = vmul.f32 %v6540_v5, %v6516_v59  ;;  %v1161_v31 = vpop.f32.mrf.mxu2  ;;  %vm6576_vm7 = vcmp.eq.f32.partialorder %v3001_v7, 8.507059e+37  ;;  %v3004_v57 = vor.u32 1.1754944e-38, %v3003_v47  ;;  %v846_v29 = vmax.f32 %v545_v35, 0.0 }
 0x244   :  { %v6556_v10 = vadd.f32 1.0, %v4343_v43  ;;  %v1330_v4 = vpop.f32.mrf.mxu3  ;;  %v2985_v20 = vsel %vm2984_vm3, %v4335_v11, %v2981_v21  ;;  %v1162_v19 = vadd.f32 %v6564_v30, %v1161_v31  ;;  %v2704_v11 = vor.u32 1.1754944e-38, %v2703_v38 }
 0x245   :  { %v4345_v51 = vpop.eup %4344  ;;  %v2990_v46 = vsel %vm6532_vm1, %v2989_v61, %v2985_v20  ;;  %v2694_v3 = vsub.f32 1.0, %v2693_v8  ;;  %v847_v61 = vmax.f32 %v714_v37, 0.0  ;;  %v6586_v7 = vsel %vm2136_vm15, %v2103_v9, 0.0 }
 0x246   :  { %4346 = vrcp.f32 %v6556_v10  ;;  %v3490_v39 = vmul.f32 %v2990_v46, %v5087_v18  ;;  %v2993_v6 = vmul.f32 %v4345_v51, %v6526_v13  ;;  %v6580_v43 = vadd.f32 %v1330_v4, %v1162_v19 }
 0x247   :  { %4348 = vpow2.f32 %v4057_v23  ;;  %v2695_v31 = vmul.f32 %v6540_v5, %v2694_v3  ;;  %vm2698_vm9 = vweird.f32 %v6540_v5  ;;  %vm2998_vm10 = vweird.f32 %v4345_v51 }
 0x248   :  { %v546_v27 = vpop.f32.mrf.mxu0  ;;  %v3554_v38 = vadd.f32 %v3490_v39, %v5091_v2  ;;  %v2994_v26 = vsub.f32 1.0, %v2993_v6  ;;  %v2213_v47 = vadd.f32 %v5133_v1, %v6580_v43  ;;  %v3016_v9 = vand.u32 2147483647, %v6556_v10  ;;  %vm2699_vm11 = vmor %vm2697_vm4, %vm2698_vm9 }
 0x249   :  { %v547_v14 = vadd.f32 %v546_v27, %v4745_v52  ;;  %v715_v21 = vpop.f32.mrf.mxu1  ;;  %v2696_v1 = vadd.f32 %v6540_v5, %v2695_v31  ;;  %v2192_v3 = vadd.f32 %v6586_v7, %v5647_v32  ;;  %vm2999_vm12 = vmor %vm2997_vm5, %vm2998_vm10  ;;  %v6625_v12 = vmax.f32 %v1545_v25, 1e-05 }
 0x24a   :  { %v716_v8 = vadd.f32 %v715_v21, %v4748_v53  ;;  %v3620_v37 = vsel %vm3457_vm8, %v3554_v38, %v6418_v44  ;;  %v2995_v4 = vmul.f32 %v4345_v51, %v2994_v26  ;;  %v4058_v19 = vmul.f32 -1.442695, %v2213_v47 }
 0x24b   :  { %v848_v35 = vmax.f32 %v547_v14, 0.0  ;;  %3684 = vst [vmem:[#allocation2 + $0x100] sm:$0xff] %v3620_v37  ;;  %v1163_v46 = vpop.f32.mrf.mxu2  ;;  %v3018_v38 = vand.u32 2147483648, %v6556_v10  ;;  %vm3012_vm14 = vweird.f32 %v6556_v10  ;;  %vm3017_vm1 = vcmp.eq.f32.partialorder %v3016_v9, 8.507059e+37 }
 0x24c   :  { %v849_v20 = vmax.f32 %v716_v8, 0.0  ;;  %v4347_v23 = vpop.eup %4346  ;;  %v1332_v39 = vpop.f32.mrf.mxu3  ;;  %v2996_v6 = vadd.f32 %v4345_v51, %v2995_v4  ;;  %4350 = vpow2.f32 %v4058_v19  ;;  %v1164_v26 = vadd.f32 %v6564_v30, %v1163_v46 }
 0x24d   :  { %v3008_v27 = vmul.f32 %v4347_v23, %v6556_v10  ;;  %v920_v14 = vpack.c.bf16 %v848_v35, %v846_v29  ;;  %v4349_v21 = vpop.eup %4348  ;;  %v2700_v8 = vsel %vm2699_vm11, %v6540_v5, %v2696_v1  ;;  %vm3013_vm13 = vweird.f32 %v4347_v23 }
 0x24e   :  { %v921_v44 = vpack.c.bf16 %v849_v20, %v847_v61  ;;  %v3000_v47 = vsel %vm2999_vm12, %v4345_v51, %v2996_v6  ;;  %v6610_v61 = vadd.f32 1.0, %v4349_v21  ;;  %v2705_v59 = vsel %vm6570_vm6, %v2704_v11, %v2700_v8  ;;  %vm3014_vm0 = vmor %vm3012_vm14, %vm3013_vm13 }
 0x24f   :  { %v3009_v29 = vsub.f32 1.0, %v3008_v27  ;;  %v3005_v31 = vsel %vm6576_vm7, %v3004_v57, %v3000_v47  ;;  %v6616_v13 = vadd.f32 %v1332_v39, %v1164_v26  ;;  %v3471_v4 = vmul.f32 %v2705_v59, %v5087_v18 }
 0x250   :  { %v549_v35 = vpop.f32.mrf.mxu0  ;;  %v4037_v20 = vmul.f32 -1.442695, %v2192_v3  ;;  %v3491_v19 = vmul.f32 %v3005_v31, %v5087_v18  ;;  %4352 = vrcp.f32 %v6610_v61  ;;  %1205 = vmatmul.bf16.gmra.mxu2 %v920_v14  ;;  %v3019_v39 = vor.u32 1.1754944e-38, %v3018_v38 }
 0x251   :  { %v718_v37 = vpop.f32.mrf.mxu1  ;;  %v3010_v5 = vmul.f32 %v4347_v23, %v3009_v29  ;;  %1374 = vmatmul.bf16.gmra.mxu3 %v921_v44  ;;  %v2214_v51 = vadd.f32 %v5153_v16, %v6616_v13  ;;  %v3535_v57 = vadd.f32 %v3471_v4, %v5091_v2  ;;  %v550_v3 = vadd.f32 %v549_v35, %v4745_v52 }
 0x252   :  { %v3555_v11 = vadd.f32 %v3491_v19, %v5091_v2  ;;  %v4351_v46 = vpop.eup %4350  ;;  %4354 = vpow2.f32 %v4037_v20  ;;  %v3031_v8 = vand.u32 2147483647, %v6610_v61  ;;  %vm3027_vm2 = vweird.f32 %v6610_v61 }
 0x253   :  { %v3011_v50 = vadd.f32 %v4347_v23, %v3010_v5  ;;  %v4059_v1 = vmul.f32 -1.442695, %v2214_v51  ;;  %v1166_v6 = vpop.f32.mrf.mxu2  ;;  %v6634_v14 = vadd.f32 1.0, %v4351_v46  ;;  %v3601_v9 = vsel %vm3457_vm8, %v3535_v57, %v5558_v62 }
 0x254   :  { %v1335_v16 = vpop.f32.mrf.mxu3  ;;  %v3621_v25 = vsel %vm3457_vm8, %v3555_v11, %v6459_v54  ;;  %v1167_v44 = vadd.f32 %v6564_v30, %v1166_v6  ;;  %v719_v54 = vadd.f32 %v718_v37, %v4748_v53  ;;  %3665 = vst [vmem:[#allocation2 + $0x68] sm:$0xff] %v3601_v9  ;;  %v3033_v37 = vand.u32 2147483648, %v6610_v61 }
 0x255   :  { %v3015_v27 = vsel %vm3014_vm0, %v4347_v23, %v3011_v50  ;;  %3685 = vst [vmem:[#allocation2 + $0x108] sm:$0xff] %v3621_v25  ;;  %4356 = vpow2.f32 %v4059_v1  ;;  %v850_v4 = vmax.f32 %v550_v3, 0.0  ;;  %vm6658_vm4 = vcmp.eq.f32.partialorder %v3031_v8, 8.507059e+37 }
 0x256   :  { %v3020_v10 = vsel %vm3017_vm1, %v3019_v39, %v3015_v27  ;;  %v4353_v21 = vpop.eup %4352  ;;  %4358 = vrcp.f32 %v6634_v14  ;;  %v6645_v47 = vadd.f32 %v1335_v16, %v1167_v44  ;;  %v851_v51 = vmax.f32 %v719_v54, 0.0 }
 0x257   :  { %v3492_v38 = vmul.f32 %v3020_v10, %v5087_v18  ;;  %v3023_v26 = vmul.f32 %v4353_v21, %v6610_v61  ;;  %4360 = vrcp.f32 %v6625_v12  ;;  %vm3028_vm3 = vweird.f32 %v4353_v21 }
 0x258   :  { %v551_v23 = vpop.f32.mrf.mxu0  ;;  %v2215_v20 = vadd.f32 %v5179_v42, %v6645_v47  ;;  %v4355_v19 = vpop.eup %4354  ;;  %v3034_v9 = vor.u32 1.1754944e-38, %v3033_v37  ;;  %vm3029_vm5 = vmor %vm3027_vm2, %vm3028_vm3  ;;  %vm3042_vm6 = vweird.f32 %v6634_v14  ;;  %v3046_v54 = vand.u32 2147483647, %v6634_v14 }
 0x259   :  { %v720_v29 = vpop.f32.mrf.mxu1  ;;  %v3556_v62 = vadd.f32 %v3492_v38, %v5091_v2  ;;  %v552_v35 = vadd.f32 %v551_v23, %v4745_v52  ;;  %v3024_v31 = vsub.f32 1.0, %v3023_v26  ;;  %v6674_v26 = vadd.f32 1.0, %v4355_v19 }
 0x25a   :  { %v721_v59 = vadd.f32 %v720_v29, %v4748_v53  ;;  %v4060_v1 = vmul.f32 -1.442695, %v2215_v20  ;;  %vm6690_vm9 = vcmp.eq.f32.partialorder %v3046_v54, 8.507059e+37 }
 0x25b   :  { %v3622_v5 = vsel %vm3457_vm8, %v3556_v62, %v6502_v0  ;;  %v852_v11 = vmax.f32 %v552_v35, 0.0  ;;  %v4357_v57 = vpop.eup %4356  ;;  %v3025_v46 = vmul.f32 %v4353_v21, %v3024_v31  ;;  %v1168_v3 = vpop.f32.mrf.mxu2  ;;  %v3048_v62 = vand.u32 2147483648, %v6634_v14 }
 0x25c   :  { %v853_v50 = vmax.f32 %v721_v59, 0.0  ;;  %3686 = vst [vmem:[#allocation2 + $0x110] sm:$0xff] %v3622_v5  ;;  %v1337_v6 = vpop.f32.mrf.mxu3  ;;  %v4359_v42 = vpop.eup %4358  ;;  %v6662_v16 = vadd.f32 1.0, %v4357_v57  ;;  %v1169_v0 = vadd.f32 %v6564_v30, %v1168_v3  ;;  %4362 = vpow2.f32 %v4060_v1 }
 0x25d   :  { %v922_v25 = vpack.c.bf16 %v852_v11, %v850_v4  ;;  %v6665_v10 = vpop.eup %4360  ;;  %v3026_v44 = vadd.f32 %v4353_v21, %v3025_v46  ;;  %v3038_v38 = vmul.f32 %v4359_v42, %v6634_v14  ;;  %vm3043_vm7 = vweird.f32 %v4359_v42 }
 0x25e   :  { %v923_v27 = vpack.c.bf16 %v853_v50, %v851_v51  ;;  %4364 = vrcp.f32 %v6662_v16  ;;  %v6677_v35 = vadd.f32 %v1337_v6, %v1169_v0  ;;  %v3061_v31 = vand.u32 2147483647, %v6662_v16  ;;  %vm3044_vm10 = vmor %vm3042_vm6, %vm3043_vm7 }
 0x25f   :  { %v3030_v8 = vsel %vm3029_vm5, %v4353_v21, %v3026_v44  ;;  %v3039_v29 = vsub.f32 1.0, %v3038_v38  ;;  %v6684_v37 = vmul.f32 %v6665_v10, %v6625_v12  ;;  %v3063_v20 = vand.u32 2147483648, %v6662_v16 }
 0x260   :  { %v554_v23 = vpop.f32.mrf.mxu0  ;;  %v3035_v61 = vsel %vm6658_vm4, %v3034_v9, %v3030_v8  ;;  %1210 = vmatmul.bf16.gmra.mxu2 %v922_v25  ;;  %v2216_v19 = vadd.f32 %v5251_v22, %v6677_v35  ;;  %4366 = vrcp.f32 %v6674_v26  ;;  %v3049_v39 = vor.u32 1.1754944e-38, %v3048_v62 }
 0x261   :  { %v723_v59 = vpop.f32.mrf.mxu1  ;;  %1379 = vmatmul.bf16.gmra.mxu3 %v923_v27  ;;  %v3493_v21 = vmul.f32 %v3035_v61, %v5087_v18  ;;  %v3040_v4 = vmul.f32 %v4359_v42, %v3039_v29  ;;  %v555_v51 = vadd.f32 %v554_v23, %v4745_v52  ;;  %vm3057_vm11 = vweird.f32 %v6662_v16 }
 0x262   :  { %v724_v11 = vadd.f32 %v723_v59, %v4748_v53  ;;  %v4363_v50 = vpop.eup %4362  ;;  %v4061_v1 = vmul.f32 -1.442695, %v2216_v19  ;;  %v1849_v0 = vsub.f32 1.0, %v6684_v37  ;;  %vm6710_vm12 = vcmp.eq.f32.partialorder %v3061_v31, 8.507059e+37 }
 0x263   :  { %v3557_v57 = vadd.f32 %v3493_v21, %v5091_v2  ;;  %v3041_v46 = vadd.f32 %v4359_v42, %v3040_v4  ;;  %v1171_v3 = vpop.f32.mrf.mxu2  ;;  %v6702_v22 = vadd.f32 1.0, %v4363_v50  ;;  %v3064_v14 = vor.u32 1.1754944e-38, %v3063_v20 }
 0x264   :  { %v1340_v6 = vpop.f32.mrf.mxu3  ;;  %v4365_v25 = vpop.eup %4364  ;;  %v1172_v27 = vadd.f32 %v6564_v30, %v1171_v3  ;;  %v854_v8 = vmax.f32 %v555_v51, 0.0  ;;  %v855_v29 = vmax.f32 %v724_v11, 0.0  ;;  %v2731_v61 = vand.u32 2147483647, %v6674_v26 }
 0x265   :  { %v3623_v44 = vsel %vm3457_vm8, %v3557_v57, %v6537_v48  ;;  %v3045_v9 = vsel %vm3044_vm10, %v4359_v42, %v3041_v46  ;;  %v3053_v38 = vmul.f32 %v4365_v25, %v6662_v16  ;;  %4368 = vrcp.f32 %v6702_v22 }
 0x266   :  { %3687 = vst [vmem:[#allocation2 + $0x118] sm:$0xff] %v3623_v44  ;;  %v3050_v23 = vsel %vm6690_vm9, %v3049_v39, %v3045_v9  ;;  %4370 = vpow2.f32 %v4061_v1  ;;  %v4367_v31 = vpop.eup %4366  ;;  %v6719_v21 = vadd.f32 %v1340_v6, %v1172_v27  ;;  %vm2727_vm13 = vweird.f32 %v6674_v26 }
 0x267   :  { %v3494_v59 = vmul.f32 %v3050_v23, %v5087_v18  ;;  %v3054_v48 = vsub.f32 1.0, %v3053_v38  ;;  %vm3058_vm14 = vweird.f32 %v4365_v25  ;;  %v2723_v51 = vmul.f32 %v4367_v31, %v6674_v26 }
 0x268   :  { %v556_v62 = vpop.f32.mrf.mxu0  ;;  %v2217_v11 = vadd.f32 %v5328_v55, %v6719_v21  ;;  %v2733_v46 = vand.u32 2147483648, %v6674_v26  ;;  %vm6732_vm0 = vcmp.eq.f32.partialorder %v2731_v61, 8.507059e+37  ;;  %vm3059_vm1 = vmor %vm3057_vm11, %vm3058_vm14  ;;  %vm2728_vm2 = vweird.f32 %v4367_v31 }
 0x269   :  { %v725_v42 = vpop.f32.mrf.mxu1  ;;  %v557_v4 = vadd.f32 %v556_v62, %v4745_v52  ;;  %v3558_v19 = vadd.f32 %v3494_v59, %v5091_v2  ;;  %v3055_v5 = vmul.f32 %v4365_v25, %v3054_v48  ;;  %v2724_v27 = vsub.f32 1.0, %v2723_v51  ;;  %vm2729_vm4 = vmor %vm2727_vm13, %vm2728_vm2 }
 0x26a   :  { %v726_v20 = vadd.f32 %v725_v42, %v4748_v53  ;;  %v4062_v55 = vmul.f32 -1.442695, %v2217_v11  ;;  %v2734_v54 = vor.u32 1.1754944e-38, %v2733_v46  ;;  %vm3072_vm5 = vweird.f32 %v6702_v22 }
 0x26b   :  { %v856_v50 = vmax.f32 %v557_v4, 0.0  ;;  %v3624_v39 = vsel %vm3457_vm8, %v3558_v19, %v6580_v43  ;;  %v3056_v1 = vadd.f32 %v4365_v25, %v3055_v5  ;;  %v1173_v3 = vpop.f32.mrf.mxu2  ;;  %v4369_v9 = vpop.eup %4368  ;;  %v2725_v42 = vmul.f32 %v4367_v31, %v2724_v27 }
 0x26c   :  { %v857_v57 = vmax.f32 %v726_v20, 0.0  ;;  %v1342_v6 = vpop.f32.mrf.mxu3  ;;  %3688 = vst [vmem:[#allocation2 + $0x120] sm:$0xff] %v3624_v39  ;;  %v1174_v62 = vadd.f32 %v6564_v30, %v1173_v3  ;;  %v4371_v59 = vpop.eup %4370  ;;  %v3068_v48 = vmul.f32 %v4369_v9, %v6702_v22  ;;  %4372 = vpow2.f32 %v4062_v55 }
 0x26d   :  { %v924_v38 = vpack.c.bf16 %v856_v50, %v854_v8  ;;  %v3060_v43 = vsel %vm3059_vm1, %v4365_v25, %v3056_v1  ;;  %v6742_v4 = vadd.f32 1.0, %v4371_v59  ;;  %v2726_v19 = vadd.f32 %v4367_v31, %v2725_v42 }
 0x26e   :  { %v925_v23 = vpack.c.bf16 %v857_v57, %v855_v29  ;;  %v3065_v61 = vsel %vm6710_vm12, %v3064_v14, %v3060_v43  ;;  %v6744_v20 = vadd.f32 %v1342_v6, %v1174_v62  ;;  %v3069_v8 = vsub.f32 1.0, %v3068_v48  ;;  %v1419_v48 = vld [vmem:[%s7718_s1 + $0x98] sm:$0xff] }
 0x26f   :  { %v3495_v16 = vmul.f32 %v3065_v61, %v5087_v18  ;;  %v3076_v29 = vand.u32 2147483647, %v6702_v22  ;;  %vm3073_vm3 = vweird.f32 %v4369_v9  ;;  %v3078_v25 = vand.u32 2147483648, %v6702_v22 }
 0x270   :  { %4374 = vrcp.f32 %v6742_v4  ;;  %1215 = vmatmul.bf16.gmra.mxu2 %v924_v38  ;;  %v3070_v5 = vmul.f32 %v4369_v9, %v3069_v8  ;;  %v2218_v51 = vadd.f32 %v6201_v24, %v6744_v20  ;;  %v2730_v11 = vsel %vm2729_vm4, %v4367_v31, %v2726_v19  ;;  %vm3074_vm6 = vmor %vm3072_vm5, %vm3073_vm3  ;;  %v559_v22 = vpop.f32.mrf.mxu0 }
 0x271   :  { %1384 = vmatmul.bf16.gmra.mxu3 %v925_v23  ;;  %v3559_v14 = vadd.f32 %v3495_v16, %v5091_v2  ;;  %v2735_v50 = vsel %vm6732_vm0, %v2734_v54, %v2730_v11  ;;  %v1513_v57 = vmax.f32 %v6508_v60, 1e-05  ;;  %vm3077_vm7 = vcmp.eq.f32.partialorder %v3076_v29, 8.507059e+37  ;;  %v728_v31 = vpop.f32.mrf.mxu1 }
 0x272   :  { %v3071_v39 = vadd.f32 %v4369_v9, %v3070_v5  ;;  %v4063_v46 = vmul.f32 -1.442695, %v2218_v51  ;;  %v3473_v1 = vmul.f32 %v2735_v50, %v5087_v18  ;;  %v4373_v3 = vpop.eup %4372  ;;  %v3079_v24 = vor.u32 1.1754944e-38, %v3078_v25 }
 0x273   :  { %v3625_v26 = vsel %vm3457_vm8, %v3559_v14, %v6616_v13  ;;  %v1850_v6 = vmul.f32 %v6665_v10, %v1849_v0  ;;  %vm1852_vm9 = vweird.f32 %v6625_v12  ;;  %v3091_v13 = vand.u32 2147483647, %v6742_v4  ;;  %v1176_v55 = vpop.f32.mrf.mxu2 }
 0x274   :  { %3689 = vst [vmem:[#allocation2 + $0x128] sm:$0xff] %v3625_v26  ;;  %v3075_v27 = vsel %vm3074_vm6, %v4369_v9, %v3071_v39  ;;  %v6769_v44 = vadd.f32 1.0, %v4373_v3  ;;  %4376 = vpow2.f32 %v4063_v46  ;;  %v1345_v38 = vpop.f32.mrf.mxu3  ;;  %v1177_v59 = vadd.f32 %v6564_v30, %v1176_v55 }
 0x275   :  { %v3080_v62 = vsel %vm3077_vm7, %v3079_v24, %v3075_v27  ;;  %v3537_v43 = vadd.f32 %v3473_v1, %v5091_v2  ;;  %vm1853_vm10 = vweird.f32 %v6665_v10  ;;  %v1858_v9 = vand.u32 2147483648, %v6625_v12 }
 0x276   :  { %v4375_v23 = vpop.eup %4374  ;;  %v3496_v37 = vmul.f32 %v3080_v62, %v5087_v18  ;;  %4378 = vrcp.f32 %v6769_v44  ;;  %vm3087_vm11 = vweird.f32 %v6742_v4  ;;  %v3093_v42 = vand.u32 2147483648, %v6742_v4  ;;  %vm6794_vm13 = vmor %vm1852_vm9, %vm1853_vm10 }
 0x277   :  { %v3083_v0 = vmul.f32 %v4375_v23, %v6742_v4  ;;  %v1851_v61 = vadd.f32 %v6665_v10, %v1850_v6  ;;  %v1856_v16 = vand.u32 2147483647, %v6625_v12  ;;  %vm6786_vm12 = vcmp.eq.f32.partialorder %v3091_v13, 8.507059e+37 }
 0x278   :  { %v3560_v8 = vadd.f32 %v3496_v37, %v5091_v2  ;;  %v6790_v25 = vadd.f32 %v1345_v38, %v1177_v59  ;;  %vm3088_vm14 = vweird.f32 %v4375_v23  ;;  %v560_v14 = vadd.f32 %v559_v22, %v4745_v52  ;;  %v561_v55 = vpop.f32.mrf.mxu0 }
 0x279   :  { %v3084_v29 = vsub.f32 1.0, %v3083_v0  ;;  %v3603_v5 = vsel %vm3457_vm8, %v3537_v43, %v5647_v32  ;;  %v1451_v51 = vmax.f32 %v1419_v48, 0.0  ;;  %v1859_v39 = vor.u32 1.1754944e-38, %v1858_v9  ;;  %vm3089_vm1 = vmor %vm3087_vm11, %vm3088_vm14  ;;  %v730_v38 = vpop.f32.mrf.mxu1 }
 0x27a   :  { %v4377_v11 = vpop.eup %4376  ;;  %v3626_v50 = vsel %vm3457_vm8, %v3560_v8, %v6645_v47  ;;  %v2219_v12 = vadd.f32 %v5519_v15, %v6790_v25  ;;  %3667 = vst [vmem:[#allocation2 + $0x78] sm:$0xff] %v3603_v5  ;;  %v3094_v46 = vor.u32 1.1754944e-38, %v3093_v42  ;;  %v1855_v32 = vsel %vm6794_vm13, %v6665_v10, %v1851_v61 }
 0x27b   :  { %v3085_v26 = vmul.f32 %v4375_v23, %v3084_v29  ;;  %3690 = vst [vmem:[#allocation2 + $0x130] sm:$0xff] %v3626_v50  ;;  %v6807_v1 = vadd.f32 1.0, %v4377_v11  ;;  %vm6812_vm0 = vcmp.eq.f32.partialorder %v1856_v16, 8.507059e+37  ;;  %v3106_v22 = vand.u32 2147483647, %v6769_v44  ;;  %v1178_v59 = vpop.f32.mrf.mxu2 }
 0x27c   :  { %v4379_v24 = vpop.eup %4378  ;;  %v729_v15 = vadd.f32 %v728_v31, %v4748_v53  ;;  %v4064_v6 = vmul.f32 -1.442695, %v2219_v12  ;;  %v3108_v13 = vand.u32 2147483648, %v6769_v44  ;;  %v858_v10 = vmax.f32 %v560_v14, 0.0  ;;  %v1347_v43 = vpop.f32.mrf.mxu3 }
 0x27d   :  { %v3086_v47 = vadd.f32 %v4375_v23, %v3085_v26  ;;  %v3098_v27 = vmul.f32 %v4379_v24, %v6769_v44  ;;  %4380 = vrcp.f32 %v6807_v1  ;;  %v1860_v31 = vsel %vm6812_vm0, %v1859_v39, %v1855_v32 }
 0x27e   :  { %4382 = vpow2.f32 %v4064_v6  ;;  %v6826_v37 = vmin.f32 %v1451_v51, 1.0  ;;  %v562_v9 = vadd.f32 %v561_v55, %v4745_v52  ;;  %v731_v48 = vadd.f32 %v730_v38, %v4748_v53 }
 0x27f   :  { %v3090_v62 = vsel %vm3089_vm1, %v4375_v23, %v3086_v47  ;;  %v3099_v0 = vsub.f32 1.0, %v3098_v27  ;;  %vm3103_vm2 = vweird.f32 %v4379_v24  ;;  %v859_v23 = vmax.f32 %v729_v15, 0.0 }
 0x280   :  { %v3095_v4 = vsel %vm6786_vm12, %v3094_v46, %v3090_v62  ;;  %v1179_v61 = vadd.f32 %v6564_v30, %v1178_v59  ;;  %v860_v8 = vmax.f32 %v562_v9, 0.0  ;;  %v861_v29 = vmax.f32 %v731_v48, 0.0 }
 0x281   :  { %v3497_v42 = vmul.f32 %v3095_v4, %v5087_v18  ;;  %v3100_v16 = vmul.f32 %v4379_v24, %v3099_v0  ;;  %v1861_v54 = vmul.f32 %v1860_v31, %v1513_v57  ;;  %vm3102_vm3 = vweird.f32 %v6769_v44  ;;  %v1421_v31 = vld [vmem:[%s7718_s1 + $0xa8] sm:$0xff] }
 0x282   :  { %v6838_v14 = vadd.f32 %v1347_v43, %v1179_v61  ;;  %v1547_v5 = vsub.f32 1.0, %v6826_v37  ;;  %v926_v50 = vpack.c.bf16 %v860_v8, %v858_v10  ;;  %v927_v26 = vpack.c.bf16 %v861_v29, %v859_v23  ;;  %vm3104_vm4 = vmor %vm3102_vm3, %vm3103_vm2 }
 0x283   :  { %v3561_v19 = vadd.f32 %v3497_v42, %v5091_v2  ;;  %v4381_v51 = vpop.eup %4380  ;;  %v3101_v11 = vadd.f32 %v4379_v24, %v3100_v16  ;;  %4384 = vlog2.f32 %v1861_v54  ;;  %v3109_v60 = vor.u32 1.1754944e-38, %v3108_v13  ;;  %v564_v13 = vpop.f32.mrf.mxu0 }
 0x284   :  { %v4383_v12 = vpop.eup %4382  ;;  %v3113_v57 = vmul.f32 %v4381_v51, %v6807_v1  ;;  %v2220_v44 = vadd.f32 %v6342_v17, %v6838_v14  ;;  %vm3107_vm5 = vcmp.eq.f32.partialorder %v3106_v22, 8.507059e+37  ;;  %v3121_v32 = vand.u32 2147483647, %v6807_v1  ;;  %1220 = vmatmul.bf16.gmra.mxu2 %v926_v50  ;;  %1389 = vmatmul.bf16.gmra.mxu3 %v927_v26  ;;  %v733_v17 = vpop.f32.mrf.mxu1 }
 0x285   :  { %v3627_v39 = vsel %vm3457_vm8, %v3561_v19, %v6677_v35  ;;  %v3105_v46 = vsel %vm3104_vm4, %v4379_v24, %v3101_v11  ;;  %v6849_v3 = vadd.f32 1.0, %v4383_v12  ;;  %v3123_v35 = vand.u32 2147483648, %v6807_v1  ;;  %v1181_v22 = vpop.f32.mrf.mxu2  ;;  %v1350_v55 = vpop.f32.mrf.mxu3 }
 0x286   :  { %3691 = vst [vmem:[#allocation2 + $0x138] sm:$0xff] %v3627_v39  ;;  %v3110_v47 = vsel %vm3107_vm5, %v3109_v60, %v3105_v46  ;;  %v3114_v15 = vsub.f32 1.0, %v3113_v57  ;;  %v4065_v6 = vmul.f32 -1.442695, %v2220_v44  ;;  %v6854_v10 = vmax.f32 %v1547_v5, 1e-05 }
 0x287   :  { %v3498_v27 = vmul.f32 %v3110_v47, %v5087_v18  ;;  %4386 = vrcp.f32 %v6849_v3  ;;  %vm3118_vm6 = vweird.f32 %v4381_v51  ;;  %vm3117_vm7 = vweird.f32 %v6807_v1 }
 0x288   :  { %v3115_v24 = vmul.f32 %v4381_v51, %v3114_v15  ;;  %4388 = vpow2.f32 %v4065_v6  ;;  %vm6858_vm9 = vcmp.eq.f32.partialorder %v3121_v32, 8.507059e+37  ;;  %v1182_v43 = vadd.f32 %v6564_v30, %v1181_v22  ;;  %vm3119_vm10 = vmor %vm3117_vm7, %vm3118_vm6 }
 0x289   :  { %v4385_v38 = vpop.eup %4384  ;;  %v3562_v62 = vadd.f32 %v3498_v27, %v5091_v2  ;;  %v3124_v0 = vor.u32 1.1754944e-38, %v3123_v35  ;;  %v3136_v9 = vand.u32 2147483647, %v6849_v3  ;;  %v3138_v1 = vand.u32 2147483648, %v6849_v3 }
 0x28a   :  { %v3116_v4 = vadd.f32 %v4381_v51, %v3115_v24  ;;  %v2107_v48 = vmul.f32 0.6931472, %v4385_v38  ;;  %v6872_v23 = vadd.f32 %v1350_v55, %v1182_v43  ;;  %4390 = vrcp.f32 %v6854_v10 }
 0x28b   :  { %v3628_v42 = vsel %vm3457_vm8, %v3562_v62, %v6719_v21  ;;  %v565_v16 = vadd.f32 %v564_v13, %v4745_v52  ;;  %v1453_v29 = vmax.f32 %v1421_v31, 0.0  ;;  %v734_v19 = vadd.f32 %v733_v17, %v4748_v53  ;;  %v566_v35 = vpop.f32.mrf.mxu0 }
 0x28c   :  { %3692 = vst [vmem:[#allocation2 + $0x140] sm:$0xff] %v3628_v42  ;;  %v3120_v61 = vsel %vm3119_vm10, %v4381_v51, %v3116_v4  ;;  %v6877_v8 = vsel %vm2136_vm15, %v2107_v48, 0.0  ;;  %v2221_v5 = vadd.f32 %v5615_v41, %v6872_v23  ;;  %vm3132_vm11 = vweird.f32 %v6849_v3  ;;  %v735_v6 = vpop.f32.mrf.mxu1 }
 0x28d   :  { %v4387_v54 = vpop.eup %4386  ;;  %v3125_v21 = vsel %vm6858_vm9, %v3124_v0, %v3120_v61  ;;  %v2194_v11 = vadd.f32 %v6877_v8, %v5733_v49  ;;  %vm6889_vm12 = vcmp.eq.f32.partialorder %v3136_v9, 8.507059e+37  ;;  %v3139_v39 = vor.u32 1.1754944e-38, %v3138_v1  ;;  %v1183_v22 = vpop.f32.mrf.mxu2 }
 0x28e   :  { %v4389_v50 = vpop.eup %4388  ;;  %v3499_v51 = vmul.f32 %v3125_v21, %v5087_v18  ;;  %v3128_v26 = vmul.f32 %v4387_v54, %v6849_v3  ;;  %v4066_v57 = vmul.f32 -1.442695, %v2221_v5  ;;  %v862_v46 = vmax.f32 %v565_v16, 0.0  ;;  %v1352_v55 = vpop.f32.mrf.mxu3 }
 0x28f   :  { %v6893_v60 = vadd.f32 1.0, %v4389_v50  ;;  %v4039_v32 = vmul.f32 -1.442695, %v2194_v11  ;;  %vm3133_vm13 = vweird.f32 %v4387_v54  ;;  %v863_v15 = vmax.f32 %v734_v19, 0.0 }
 0x290   :  { %v3563_v41 = vadd.f32 %v3499_v51, %v5091_v2  ;;  %v3129_v44 = vsub.f32 1.0, %v3128_v26  ;;  %v6896_v47 = vpop.eup %4390  ;;  %v6899_v27 = vmin.f32 %v1453_v29, 1.0  ;;  %v567_v24 = vadd.f32 %v566_v35, %v4745_v52  ;;  %vm3134_vm0 = vmor %vm3132_vm11, %vm3133_vm13 }
 0x291   :  { %4392 = vrcp.f32 %v6893_v60  ;;  %v736_v38 = vadd.f32 %v735_v6, %v4748_v53  ;;  %v1184_v62 = vadd.f32 %v6564_v30, %v1183_v22  ;;  %vm1882_vm14 = vweird.f32 %v6854_v10  ;;  %v6952_v6 = vld [vmem:[%s7718_s1 + $0xb8] sm:$0xff] }
 0x292   :  { %v3629_v13 = vsel %vm3457_vm8, %v3563_v41, %v6744_v20  ;;  %v3130_v17 = vmul.f32 %v4387_v54, %v3129_v44  ;;  %4394 = vpow2.f32 %v4066_v57  ;;  %v1886_v59 = vand.u32 2147483647, %v6854_v10 }
 0x293   :  { %3693 = vst [vmem:[#allocation2 + $0x148] sm:$0xff] %v3629_v13  ;;  %v864_v31 = vmax.f32 %v567_v24, 0.0  ;;  %4396 = vpow2.f32 %v4039_v32  ;;  %v1878_v20 = vmul.f32 %v6896_v47, %v6854_v10  ;;  %v865_v52 = vmax.f32 %v736_v38, 0.0 }
 0x294   :  { %v3131_v43 = vadd.f32 %v4387_v54, %v3130_v17  ;;  %v6914_v4 = vadd.f32 %v1352_v55, %v1184_v62  ;;  %v1888_v53 = vand.u32 2147483648, %v6854_v10  ;;  %v1549_v0 = vsub.f32 1.0, %v6899_v27 }
 0x295   :  { %v928_v48 = vpack.c.bf16 %v864_v31, %v862_v46  ;;  %v1879_v42 = vsub.f32 1.0, %v1878_v20  ;;  %vm1883_vm1 = vweird.f32 %v6896_v47  ;;  %v929_v16 = vpack.c.bf16 %v865_v52, %v863_v15  ;;  %v1186_v46 = vpop.f32.mrf.mxu2 }
 0x296   :  { %v3135_v9 = vsel %vm3134_vm0, %v4387_v54, %v3131_v43  ;;  %v2222_v3 = vadd.f32 %v6454_v63, %v6914_v4  ;;  %v6923_v29 = vmax.f32 %v1549_v0, 1e-05  ;;  %v1515_v54 = vmax.f32 %v6826_v37, 1e-05  ;;  %vm6939_vm2 = vmor %vm1882_vm14, %vm1883_vm1  ;;  %v1355_v32 = vpop.f32.mrf.mxu3 }
 0x297   :  { %v4393_v1 = vpop.eup %4392  ;;  %v3140_v61 = vsel %vm6889_vm12, %v3139_v39, %v3135_v9  ;;  %1225 = vmatmul.bf16.gmra.mxu2 %v928_v48  ;;  %v1880_v11 = vmul.f32 %v6896_v47, %v1879_v42  ;;  %1394 = vmatmul.bf16.gmra.mxu3 %v929_v16  ;;  %v1889_v26 = vor.u32 1.1754944e-38, %v1888_v53  ;;  %v3151_v57 = vand.u32 2147483647, %v6893_v60 }
 0x298   :  { %v4395_v21 = vpop.eup %4394  ;;  %v3500_v19 = vmul.f32 %v3140_v61, %v5087_v18  ;;  %v3143_v5 = vmul.f32 %v4393_v1, %v6893_v60  ;;  %v4067_v51 = vmul.f32 -1.442695, %v2222_v3  ;;  %4398 = vrcp.f32 %v6923_v29 }
 0x299   :  { %v6929_v50 = vadd.f32 1.0, %v4395_v21  ;;  %v4397_v63 = vpop.eup %4396  ;;  %v1881_v41 = vadd.f32 %v6896_v47, %v1880_v11  ;;  %vm3148_vm3 = vweird.f32 %v4393_v1  ;;  %v3153_v44 = vand.u32 2147483648, %v6893_v60 }
 0x29a   :  { %v3564_v12 = vadd.f32 %v3500_v19, %v5091_v2  ;;  %v3144_v39 = vsub.f32 1.0, %v3143_v5  ;;  %vm1887_vm4 = vcmp.eq.f32.partialorder %v1886_v59, 8.507059e+37  ;;  %v1187_v10 = vadd.f32 %v6564_v30, %v1186_v46 }
 0x29b   :  { %4400 = vrcp.f32 %v6929_v50  ;;  %vm3147_vm5 = vweird.f32 %v6893_v60  ;;  %v6955_v13 = vadd.f32 1.0, %v4397_v63  ;;  %v1885_v17 = vsel %vm6939_vm2, %v6896_v47, %v1881_v41 }
 0x29c   :  { %v3630_v15 = vsel %vm3457_vm8, %v3564_v12, %v6790_v25  ;;  %v3145_v35 = vmul.f32 %v4393_v1, %v3144_v39  ;;  %4402 = vpow2.f32 %v4067_v51  ;;  %vm3152_vm6 = vcmp.eq.f32.partialorder %v3151_v57, 8.507059e+37  ;;  %vm3149_vm7 = vmor %vm3147_vm5, %vm3148_vm3 }
 0x29d   :  { %3694 = vst [vmem:[#allocation2 + $0x150] sm:$0xff] %v3630_v15  ;;  %v6960_v25 = vadd.f32 %v1355_v32, %v1187_v10  ;;  %v1890_v22 = vsel %vm1887_vm4, %v1889_v26, %v1885_v17  ;;  %v3154_v38 = vor.u32 1.1754944e-38, %v3153_v44  ;;  %4404 = vrcp.f32 %v6955_v13  ;;  %v1188_v61 = vpop.f32.mrf.mxu2 }
 0x29e   :  { %v3146_v24 = vadd.f32 %v4393_v1, %v3145_v35  ;;  %v6962_v55 = vpop.eup %4398  ;;  %vm1912_vm9 = vweird.f32 %v6923_v29  ;;  %v1455_v60 = vmax.f32 %v6952_v6, 0.0  ;;  %v1891_v59 = vmul.f32 %v1890_v22, %v1515_v54  ;;  %v1357_v16 = vpop.f32.mrf.mxu3 }
 0x29f   :  { %v2223_v47 = vadd.f32 %v5681_v40, %v6960_v25  ;;  %v1908_v43 = vmul.f32 %v6962_v55, %v6923_v29  ;;  %vm3162_vm10 = vweird.f32 %v6929_v50  ;;  %v3166_v52 = vand.u32 2147483647, %v6929_v50 }
 0x2a0   :  { %v3150_v62 = vsel %vm3149_vm7, %v4393_v1, %v3146_v24  ;;  %v1517_v53 = vmax.f32 %v6899_v27, 1e-05  ;;  %v3168_v42 = vand.u32 2147483648, %v6929_v50  ;;  %4406 = vlog2.f32 %v1891_v59 }
 0x2a1   :  { %v4401_v31 = vpop.eup %4400  ;;  %v3155_v20 = vsel %vm3152_vm6, %v3154_v38, %v3150_v62  ;;  %v4068_v40 = vmul.f32 -1.442695, %v2223_v47  ;;  %v1909_v3 = vsub.f32 1.0, %v1908_v43  ;;  %v1916_v21 = vand.u32 2147483647, %v6923_v29 }
 0x2a2   :  { %v4403_v0 = vpop.eup %4402  ;;  %v3501_v9 = vmul.f32 %v3155_v20, %v5087_v18  ;;  %v3158_v48 = vmul.f32 %v4401_v31, %v6929_v50  ;;  %v1189_v54 = vadd.f32 %v6564_v30, %v1188_v61  ;;  %vm3163_vm11 = vweird.f32 %v4401_v31 }
 0x2a3   :  { %v6978_v1 = vadd.f32 1.0, %v4403_v0  ;;  %4408 = vpow2.f32 %v4068_v40  ;;  %v6983_v11 = vpop.eup %4404  ;;  %v2761_v51 = vand.u32 2147483647, %v6955_v13  ;;  %vm1913_vm12 = vweird.f32 %v6962_v55  ;;  %vm3164_vm1 = vmor %vm3162_vm10, %vm3163_vm11 }
 0x2a4   :  { %v3565_v19 = vadd.f32 %v3501_v9, %v5091_v2  ;;  %v3159_v5 = vsub.f32 1.0, %v3158_v48  ;;  %v6991_v12 = vadd.f32 %v1357_v16, %v1189_v54  ;;  %v2753_v39 = vmul.f32 %v6983_v11, %v6955_v13  ;;  %vm7005_vm0 = vmor %vm1912_vm9, %vm1913_vm12 }
 0x2a5   :  { %4410 = vrcp.f32 %v6978_v1  ;;  %vm6995_vm13 = vcmp.eq.f32.partialorder %v3166_v52, 8.507059e+37  ;;  %v3169_v57 = vor.u32 1.1754944e-38, %v3168_v42  ;;  %vm2757_vm14 = vweird.f32 %v6955_v13  ;;  %v1191_v59 = vpop.f32.mrf.mxu2 }
 0x2a6   :  { %v3631_v26 = vsel %vm3457_vm8, %v3565_v19, %v6838_v14  ;;  %v3160_v63 = vmul.f32 %v4401_v31, %v3159_v5  ;;  %v1910_v41 = vmul.f32 %v6962_v55, %v1909_v3  ;;  %v2224_v14 = vadd.f32 %v6586_v7, %v6991_v12  ;;  %v4407_v15 = vpop.eup %4406  ;;  %v1360_v43 = vpop.f32.mrf.mxu3  ;;  %v7041_v3 = vld [vmem:[%s7722_s5] ss:$0 sm:$0xff] }
 0x2a7   :  { %3695 = vst [vmem:[#allocation2 + $0x158] sm:$0xff] %v3631_v26  ;;  %v2754_v44 = vsub.f32 1.0, %v2753_v39  ;;  %v1918_v32 = vand.u32 2147483648, %v6923_v29  ;;  %vm7013_vm2 = vcmp.eq.f32.partialorder %v2761_v51, 8.507059e+37  ;;  %v2763_v7 = vand.u32 2147483648, %v6955_v13 }
 0x2a8   :  { %v3161_v37 = vadd.f32 %v4401_v31, %v3160_v63  ;;  %v1911_v10 = vadd.f32 %v6962_v55, %v1910_v41  ;;  %vm7019_vm3 = vcmp.eq.f32.partialorder %v1916_v21, 8.507059e+37  ;;  %v4069_v29 = vmul.f32 -1.442695, %v2224_v14 }
 0x2a9   :  { %v4409_v24 = vpop.eup %4408  ;;  %v2755_v38 = vmul.f32 %v6983_v11, %v2754_v44  ;;  %vm2758_vm4 = vweird.f32 %v6983_v11  ;;  %v2111_v20 = vmul.f32 0.6931472, %v4407_v15  ;;  %v1919_v52 = vor.u32 1.1754944e-38, %v1918_v32 }
 0x2aa   :  { %v3165_v22 = vsel %vm3164_vm1, %v4401_v31, %v3161_v37  ;;  %v7027_v47 = vadd.f32 1.0, %v4409_v24  ;;  %4412 = vpow2.f32 %v4069_v29  ;;  %v1915_v31 = vsel %vm7005_vm0, %v6962_v55, %v1911_v10  ;;  %vm2759_vm6 = vmor %vm2757_vm14, %vm2758_vm4 }
 0x2ab   :  { %v4411_v50 = vpop.eup %4410  ;;  %v3170_v62 = vsel %vm6995_vm13, %v3169_v57, %v3165_v22  ;;  %v3181_v48 = vand.u32 2147483647, %v6978_v1  ;;  %v3183_v42 = vand.u32 2147483648, %v6978_v1  ;;  %v2764_v40 = vor.u32 1.1754944e-38, %v2763_v7 }
 0x2ac   :  { %v3502_v0 = vmul.f32 %v3170_v62, %v5087_v18  ;;  %v3173_v9 = vmul.f32 %v4411_v50, %v6978_v1  ;;  %4414 = vrcp.f32 %v7027_v47  ;;  %v1192_v21 = vadd.f32 %v7041_v3, %v1191_v59 }
 0x2ad   :  { %v2756_v19 = vadd.f32 %v6983_v11, %v2755_v38  ;;  %vm3178_vm5 = vweird.f32 %v4411_v50  ;;  %v7050_v55 = vsel %vm2136_vm15, %v2111_v20, 0.0  ;;  %v1920_v5 = vsel %vm7019_vm3, %v1919_v52, %v1915_v31  ;;  %v1193_v15 = vpop.f32.mrf.mxu2 }
 0x2ae   :  { %v3566_v61 = vadd.f32 %v3502_v0, %v5091_v2  ;;  %v3174_v16 = vsub.f32 1.0, %v3173_v9  ;;  %v7056_v54 = vmin.f32 %v1455_v60, 1.0  ;;  %v7061_v63 = vadd.f32 %v1360_v43, %v1192_v21 }
 0x2af   :  { %v2760_v13 = vsel %vm2759_vm6, %v6983_v11, %v2756_v19  ;;  %vm3177_vm7 = vweird.f32 %v6978_v1  ;;  %v2196_v6 = vadd.f32 %v7050_v55, %v5814_v56  ;;  %v1921_v60 = vmul.f32 %v1920_v5, %v1517_v53 }
 0x2b0   :  { %v3632_v51 = vsel %vm3457_vm8, %v3566_v61, %v6872_v23  ;;  %v3175_v26 = vmul.f32 %v4411_v50, %v3174_v16  ;;  %v2765_v39 = vsel %vm7013_vm2, %v2764_v40, %v2760_v13  ;;  %v4413_v30 = vpop.eup %4412  ;;  %vm3182_vm9 = vcmp.eq.f32.partialorder %v3181_v48, 8.507059e+37  ;;  %vm3179_vm10 = vmor %vm3177_vm7, %vm3178_vm5 }
 0x2b1   :  { %3696 = vst [vmem:[#allocation2 + $0x160] sm:$0xff] %v3632_v51  ;;  %v3184_v23 = vor.u32 1.1754944e-38, %v3183_v42  ;;  %v2225_v41 = vadd.f32 %v5721_v28, %v7061_v63  ;;  %v7074_v1 = vadd.f32 1.0, %v4413_v30  ;;  %v3475_v37 = vmul.f32 %v2765_v39, %v5087_v18  ;;  %v1362_v28 = vpop.f32.mrf.mxu3 }
 0x2b2   :  { %v3176_v57 = vadd.f32 %v4411_v50, %v3175_v26  ;;  %v4415_v11 = vpop.eup %4414  ;;  %v4041_v14 = vmul.f32 -1.442695, %v2196_v6  ;;  %4416 = vlog2.f32 %v1921_v60  ;;  %v1551_v46 = vsub.f32 1.0, %v7056_v54 }
 0x2b3   :  { %v3188_v27 = vmul.f32 %v4415_v11, %v7027_v47  ;;  %v4070_v53 = vmul.f32 -1.442695, %v2225_v41  ;;  %4418 = vrcp.f32 %v7074_v1  ;;  %v3196_v10 = vand.u32 2147483647, %v7027_v47 }
 0x2b4   :  { %v3180_v44 = vsel %vm3179_vm10, %v4411_v50, %v3176_v57  ;;  %v3198_v17 = vand.u32 2147483648, %v7027_v47  ;;  %v1194_v24 = vadd.f32 %v7041_v3, %v1193_v15  ;;  %v3539_v22 = vadd.f32 %v3475_v37, %v5091_v2  ;;  %v7901_v15 = vld [vmem:[#allocation5_spill] sm:$0xff] }
 0x2b5   :  { %v3185_v32 = vsel %vm3182_vm9, %v3184_v23, %v3180_v44  ;;  %v3189_v7 = vsub.f32 1.0, %v3188_v27  ;;  %4420 = vpow2.f32 %v4070_v53  ;;  %vm3193_vm11 = vweird.f32 %v4415_v11  ;;  %v1196_v13 = vpop.f32.mrf.mxu2 }
 0x2b6   :  { %v3503_v35 = vmul.f32 %v3185_v32, %v5087_v18  ;;  %4422 = vpow2.f32 %v4041_v14  ;;  %v7086_v50 = vmax.f32 %v1551_v46, 1e-05  ;;  %vm3192_vm12 = vweird.f32 %v7027_v47 }
 0x2b7   :  { %v3190_v38 = vmul.f32 %v4415_v11, %v3189_v7  ;;  %v7089_v59 = vadd.f32 %v1362_v28, %v1194_v24  ;;  %v3605_v43 = vsel %vm3457_vm8, %v3539_v22, %v5733_v49  ;;  %vm3194_vm13 = vmor %vm3192_vm12, %vm3193_vm11  ;;  %v3199_v31 = vor.u32 1.1754944e-38, %v3198_v17 }
 0x2b8   :  { %v3567_v29 = vadd.f32 %v3503_v35, %v5091_v2  ;;  %v4417_v62 = vpop.eup %4416  ;;  %3669 = vst [vmem:[#allocation2 + $0x88] sm:$0xff] %v3605_v43  ;;  %4424 = vrcp.f32 %v7086_v50  ;;  %vm3197_vm14 = vcmp.eq.f32.partialorder %v3196_v10, 8.507059e+37  ;;  %v3211_v51 = vand.u32 2147483647, %v7074_v1 }
 0x2b9   :  { %v3191_v52 = vadd.f32 %v4415_v11, %v3190_v38  ;;  %v2115_v0 = vmul.f32 0.6931472, %v4417_v62  ;;  %v4419_v9 = vpop.eup %4418  ;;  %v2226_v47 = vadd.f32 %v6877_v8, %v7089_v59  ;;  %v3213_v8 = vand.u32 2147483648, %v7074_v1  ;;  %v1365_v39 = vpop.f32.mrf.mxu3 }
 0x2ba   :  { %v3633_v20 = vsel %vm3457_vm8, %v3567_v29, %v6914_v4  ;;  %v3203_v49 = vmul.f32 %v4419_v9, %v7074_v1  ;;  %vm3208_vm0 = vweird.f32 %v4419_v9  ;;  %v1197_v23 = vadd.f32 %v7041_v3, %v1196_v13 }
 0x2bb   :  { %3697 = vst [vmem:[#allocation2 + $0x168] sm:$0xff] %v3633_v20  ;;  %v4421_v48 = vpop.eup %4420  ;;  %v3195_v42 = vsel %vm3194_vm13, %v4415_v11, %v3191_v52  ;;  %v7102_v40 = vsel %vm2136_vm15, %v2115_v0, 0.0  ;;  %v4071_v21 = vmul.f32 -1.442695, %v2226_v47  ;;  %v1519_v41 = vmax.f32 %v7056_v54, 1e-05 }
 0x2bc   :  { %v4423_v4 = vpop.eup %4422  ;;  %v3200_v61 = vsel %vm3197_vm14, %v3199_v31, %v3195_v42  ;;  %v7104_v16 = vadd.f32 1.0, %v4421_v48  ;;  %v3204_v5 = vsub.f32 1.0, %v3203_v49  ;;  %v2198_v6 = vadd.f32 %v7102_v40, %v5906_v34  ;;  %v7123_v11 = vld [vmem:[%s7718_s1 + $0xc8] sm:$0xff] }
 0x2bd   :  { %v3504_v19 = vmul.f32 %v3200_v61, %v5087_v18  ;;  %v7108_v26 = vadd.f32 1.0, %v4423_v4  ;;  %vm3207_vm1 = vweird.f32 %v7074_v1  ;;  %v7129_v44 = vadd.f32 %v1365_v39, %v1197_v23  ;;  %v1198_v52 = vpop.f32.mrf.mxu2 }
 0x2be   :  { %4426 = vrcp.f32 %v7104_v16  ;;  %v7114_v60 = vpop.eup %4424  ;;  %v3205_v57 = vmul.f32 %v4419_v9, %v3204_v5  ;;  %vm3209_vm2 = vmor %vm3207_vm1, %vm3208_vm0  ;;  %vm3212_vm3 = vcmp.eq.f32.partialorder %v3211_v51, 8.507059e+37  ;;  %v3214_v27 = vor.u32 1.1754944e-38, %v3213_v8 }
 0x2bf   :  { %v3568_v30 = vadd.f32 %v3504_v19, %v5091_v2  ;;  %4428 = vpow2.f32 %v4071_v21  ;;  %v4043_v53 = vmul.f32 -1.442695, %v2198_v6  ;;  %v1938_v46 = vmul.f32 %v7114_v60, %v7086_v50 }
 0x2c0   :  { %4430 = vrcp.f32 %v7108_v26  ;;  %v3206_v14 = vadd.f32 %v4419_v9, %v3205_v57  ;;  %v2227_v28 = vadd.f32 %v7901_v15, %v7129_v44  ;;  %v1457_v35 = vmax.f32 %v7123_v11, 0.0 }
 0x2c1   :  { %v3634_v37 = vsel %vm3457_vm8, %v3568_v30, %v6960_v25  ;;  %v1946_v25 = vand.u32 2147483647, %v7086_v50  ;;  %v3226_v10 = vand.u32 2147483647, %v7104_v16  ;;  %4432 = vpow2.f32 %v4043_v53  ;;  %v1367_v42 = vpop.f32.mrf.mxu3 }
 0x2c2   :  { %3698 = vst [vmem:[#allocation2 + $0x170] sm:$0xff] %v3634_v37  ;;  %v3210_v32 = vsel %vm3209_vm2, %v4419_v9, %v3206_v14  ;;  %vm1942_vm4 = vweird.f32 %v7086_v50  ;;  %v1948_v17 = vand.u32 2147483648, %v7086_v50  ;;  %vm3222_vm5 = vweird.f32 %v7104_v16 }
 0x2c3   :  { %v3215_v7 = vsel %vm3212_vm3, %v3214_v27, %v3210_v32  ;;  %v4072_v38 = vmul.f32 -1.442695, %v2227_v28  ;;  %v3228_v43 = vand.u32 2147483648, %v7104_v16  ;;  %v2791_v0 = vand.u32 2147483647, %v7108_v26 }
 0x2c4   :  { %v4427_v1 = vpop.eup %4426  ;;  %v3505_v22 = vmul.f32 %v3215_v7, %v5087_v18  ;;  %v1939_v9 = vsub.f32 1.0, %v1938_v46  ;;  %v1199_v48 = vadd.f32 %v7041_v3, %v1198_v52  ;;  %vm7152_vm7 = vcmp.eq.f32.partialorder %v3226_v10, 8.507059e+37 }
 0x2c5   :  { %v4429_v24 = vpop.eup %4428  ;;  %v3218_v29 = vmul.f32 %v4427_v1, %v7104_v16  ;;  %4434 = vpow2.f32 %v4072_v38  ;;  %vm3223_vm6 = vweird.f32 %v4427_v1  ;;  %v2793_v4 = vand.u32 2147483648, %v7108_v26  ;;  %v1201_v16 = vpop.f32.mrf.mxu2 }
 0x2c6   :  { %v7144_v62 = vpop.eup %4430  ;;  %v7147_v20 = vadd.f32 1.0, %v4429_v24  ;;  %v3569_v31 = vadd.f32 %v3505_v22, %v5091_v2  ;;  %v7161_v19 = vadd.f32 %v1367_v42, %v1199_v48  ;;  %v3229_v8 = vor.u32 1.1754944e-38, %v3228_v43  ;;  %vm3224_vm13 = vmor %vm3222_vm5, %vm3223_vm6 }
 0x2c7   :  { %v3219_v47 = vsub.f32 1.0, %v3218_v29  ;;  %v2783_v5 = vmul.f32 %v7144_v62, %v7108_v26  ;;  %v4433_v51 = vpop.eup %4432  ;;  %vm2787_vm9 = vweird.f32 %v7108_v26  ;;  %v1940_v13 = vmul.f32 %v7114_v60, %v1939_v9 }
 0x2c8   :  { %4436 = vrcp.f32 %v7147_v20  ;;  %v3635_v61 = vsel %vm3457_vm8, %v3569_v31, %v6991_v12  ;;  %vm1943_vm10 = vweird.f32 %v7114_v60  ;;  %vm7168_vm11 = vcmp.eq.f32.partialorder %v1946_v25, 8.507059e+37 }
 0x2c9   :  { %v3220_v21 = vmul.f32 %v4427_v1, %v3219_v47  ;;  %3699 = vst [vmem:[#allocation2 + $0x178] sm:$0xff] %v3635_v61  ;;  %v2228_v6 = vadd.f32 %v7050_v55, %v7161_v19  ;;  %v2784_v30 = vsub.f32 1.0, %v2783_v5  ;;  %vm7174_vm12 = vcmp.eq.f32.partialorder %v2791_v0, 8.507059e+37  ;;  %vm7201_vm0 = vmor %vm1942_vm4, %vm1943_vm10  ;;  %v1370_v0 = vpop.f32.mrf.mxu3 }
 0x2ca   :  { %v7178_v23 = vadd.f32 1.0, %v4433_v51  ;;  %v3241_v11 = vand.u32 2147483647, %v7147_v20  ;;  %v3243_v37 = vand.u32 2147483648, %v7147_v20  ;;  %v2794_v14 = vor.u32 1.1754944e-38, %v2793_v4 }
 0x2cb   :  { %v3221_v12 = vadd.f32 %v4427_v1, %v3220_v21  ;;  %v1949_v27 = vor.u32 1.1754944e-38, %v1948_v17  ;;  %v4435_v53 = vpop.eup %4434  ;;  %v4073_v55 = vmul.f32 -1.442695, %v2228_v6  ;;  %v2785_v32 = vmul.f32 %v7144_v62, %v2784_v30 }
 0x2cc   :  { %4438 = vrcp.f32 %v7178_v23  ;;  %v7189_v25 = vadd.f32 1.0, %v4435_v53  ;;  %v1941_v7 = vadd.f32 %v7114_v60, %v1940_v13  ;;  %v7192_v10 = vmin.f32 %v1457_v35, 1.0  ;;  %v7208_v35 = vld [vmem:[%s7718_s1 + $0xd8] sm:$0xff] }
 0x2cd   :  { %v3225_v46 = vsel %vm3224_vm13, %v4427_v1, %v3221_v12  ;;  %4440 = vpow2.f32 %v4073_v55  ;;  %vm2788_vm14 = vweird.f32 %v7144_v62  ;;  %vm3237_vm1 = vweird.f32 %v7147_v20 }
 0x2ce   :  { %v4437_v15 = vpop.eup %4436  ;;  %v3230_v28 = vsel %vm7152_vm7, %v3229_v8, %v3225_v46  ;;  %vm7211_vm2 = vcmp.eq.f32.partialorder %v3241_v11, 8.507059e+37  ;;  %v3244_v29 = vor.u32 1.1754944e-38, %v3243_v37  ;;  %4442 = vrcp.f32 %v7189_v25  ;;  %vm2789_vm4 = vmor %vm2787_vm9, %vm2788_vm14 }
 0x2cf   :  { %v3506_v17 = vmul.f32 %v3230_v28, %v5087_v18  ;;  %v3233_v1 = vmul.f32 %v4437_v15, %v7147_v20  ;;  %v2786_v43 = vadd.f32 %v7144_v62, %v2785_v32  ;;  %v1202_v52 = vadd.f32 %v7041_v3, %v1201_v16  ;;  %v1203_v28 = vpop.f32.mrf.mxu2 }
 0x2d0   :  { %vm3238_vm3 = vweird.f32 %v4437_v15  ;;  %v1945_v9 = vsel %vm7201_vm0, %v7114_v60, %v1941_v7  ;;  %v1553_v31 = vsub.f32 1.0, %v7192_v10  ;;  %v1459_v47 = vmax.f32 %v7208_v35, 0.0 }
 0x2d1   :  { %v3570_v50 = vadd.f32 %v3506_v17, %v5091_v2  ;;  %v3234_v38 = vsub.f32 1.0, %v3233_v1  ;;  %v2790_v4 = vsel %vm2789_vm4, %v7144_v62, %v2786_v43  ;;  %v7232_v61 = vadd.f32 %v1370_v0, %v1202_v52  ;;  %vm3239_vm7 = vmor %vm3237_vm1, %vm3238_vm3  ;;  %v1372_v16 = vpop.f32.mrf.mxu3 }
 0x2d2   :  { %v7226_v48 = vpop.eup %4438  ;;  %v2795_v26 = vsel %vm7174_vm12, %v2794_v14, %v2790_v4  ;;  %vm2817_vm5 = vweird.f32 %v7178_v23  ;;  %v2821_v21 = vand.u32 2147483647, %v7178_v23  ;;  %vm3252_vm6 = vweird.f32 %v7189_v25 }
 0x2d3   :  { %v3636_v42 = vsel %vm3457_vm8, %v3570_v50, %v7061_v63  ;;  %v3235_v49 = vmul.f32 %v4437_v15, %v3234_v38  ;;  %v2813_v60 = vmul.f32 %v7226_v48, %v7178_v23  ;;  %v4441_v5 = vpop.eup %4440  ;;  %v3477_v63 = vmul.f32 %v2795_v26, %v5087_v18 }
 0x2d4   :  { %3700 = vst [vmem:[#allocation2 + $0x180] sm:$0xff] %v3636_v42  ;;  %v1950_v62 = vsel %vm7168_vm11, %v1949_v27, %v1945_v9  ;;  %v4443_v8 = vpop.eup %4442  ;;  %v7247_v13 = vadd.f32 1.0, %v4441_v5  ;;  %v2229_v12 = vadd.f32 %v5880_v36, %v7232_v61  ;;  %v7255_v37 = vmax.f32 %v1553_v31, 1e-05 }
 0x2d5   :  { %v3236_v51 = vadd.f32 %v4437_v15, %v3235_v49  ;;  %v2814_v6 = vsub.f32 1.0, %v2813_v60  ;;  %v1951_v30 = vmul.f32 %v1950_v62, %v1519_v41  ;;  %v3248_v11 = vmul.f32 %v4443_v8, %v7189_v25 }
 0x2d6   :  { %v3541_v39 = vadd.f32 %v3477_v63, %v5091_v2  ;;  %v3256_v14 = vand.u32 2147483647, %v7189_v25  ;;  %v3258_v27 = vand.u32 2147483648, %v7189_v25  ;;  %4444 = vrcp.f32 %v7247_v13 }
 0x2d7   :  { %v3240_v57 = vsel %vm3239_vm7, %v4437_v15, %v3236_v51  ;;  %v3249_v54 = vsub.f32 1.0, %v3248_v11  ;;  %v2823_v53 = vand.u32 2147483648, %v7178_v23  ;;  %v4074_v46 = vmul.f32 -1.442695, %v2229_v12 }
 0x2d8   :  { %v3245_v20 = vsel %vm7211_vm2, %v3244_v29, %v3240_v57  ;;  %v3607_v41 = vsel %vm3457_vm8, %v3541_v39, %v5814_v56  ;;  %v2815_v55 = vmul.f32 %v7226_v48, %v2814_v6  ;;  %vm2818_vm9 = vweird.f32 %v7226_v48  ;;  %v1206_v6 = vpop.f32.mrf.mxu2 }
 0x2d9   :  { %v3507_v36 = vmul.f32 %v3245_v20, %v5087_v18  ;;  %3671 = vst [vmem:[#allocation2 + $0x98] sm:$0xff] %v3607_v41  ;;  %4446 = vlog2.f32 %v1951_v30  ;;  %v3250_v15 = vmul.f32 %v4443_v8, %v3249_v54  ;;  %vm3253_vm10 = vweird.f32 %v4443_v8  ;;  %vm2819_vm12 = vmor %vm2817_vm5, %vm2818_vm9  ;;  %v1375_v30 = vpop.f32.mrf.mxu3 }
 0x2da   :  { %4448 = vrcp.f32 %v7255_v37  ;;  %vm7271_vm11 = vcmp.eq.f32.partialorder %v3256_v14, 8.507059e+37  ;;  %v1204_v56 = vadd.f32 %v7041_v3, %v1203_v28  ;;  %v2816_v17 = vadd.f32 %v7226_v48, %v2815_v55  ;;  %vm3254_vm13 = vmor %vm3252_vm6, %vm3253_vm10 }
 0x2db   :  { %v3571_v32 = vadd.f32 %v3507_v36, %v5091_v2  ;;  %4450 = vpow2.f32 %v4074_v46  ;;  %v3251_v24 = vadd.f32 %v4443_v8, %v3250_v15  ;;  %v3259_v22 = vor.u32 1.1754944e-38, %v3258_v27  ;;  %v7914_v46 = vld [vmem:[#allocation6_spill] sm:$0xff] }
 0x2dc   :  { %v2824_v29 = vor.u32 1.1754944e-38, %v2823_v53  ;;  %v4445_v50 = vpop.eup %4444  ;;  %vm3267_vm14 = vweird.f32 %v7247_v13  ;;  %v7288_v38 = vadd.f32 %v1372_v16, %v1204_v56  ;;  %vm2822_vm0 = vcmp.eq.f32.partialorder %v2821_v21, 8.507059e+37 }
 0x2dd   :  { %v3637_v1 = vsel %vm3457_vm8, %v3571_v32, %v7089_v59  ;;  %v2820_v59 = vsel %vm2819_vm12, %v7226_v48, %v2816_v17  ;;  %v3255_v43 = vsel %vm3254_vm13, %v4443_v8, %v3251_v24  ;;  %v3263_v52 = vmul.f32 %v4445_v50, %v7247_v13 }
 0x2de   :  { %3701 = vst [vmem:[#allocation2 + $0x188] sm:$0xff] %v3637_v1  ;;  %v3271_v23 = vand.u32 2147483647, %v7247_v13  ;;  %v2825_v0 = vsel %vm2822_vm0, %v2824_v29, %v2820_v59  ;;  %v3260_v31 = vsel %vm7271_vm11, %v3259_v22, %v3255_v43  ;;  %v3273_v25 = vand.u32 2147483648, %v7247_v13 }
 0x2df   :  { %v4447_v9 = vpop.eup %4446  ;;  %v2230_v42 = vadd.f32 %v7102_v40, %v7288_v38  ;;  %v3479_v49 = vmul.f32 %v2825_v0, %v5087_v18  ;;  %v3508_v48 = vmul.f32 %v3260_v31, %v5087_v18  ;;  %v3264_v26 = vsub.f32 1.0, %v3263_v52 }
 0x2e0   :  { %v7299_v4 = vpop.eup %4448  ;;  %v2119_v60 = vmul.f32 0.6931472, %v4447_v9  ;;  %v7304_v21 = vmin.f32 %v1459_v47, 1.0  ;;  %vm3268_vm1 = vweird.f32 %v4445_v50  ;;  %v1207_v47 = vadd.f32 %v7041_v3, %v1206_v6  ;;  %v1208_v24 = vpop.f32.mrf.mxu2 }
 0x2e1   :  { %v4451_v5 = vpop.eup %4450  ;;  %v4075_v51 = vmul.f32 -1.442695, %v2230_v42  ;;  %v3543_v63 = vadd.f32 %v3479_v49, %v5091_v2  ;;  %v1968_v40 = vmul.f32 %v7299_v4, %v7255_v37  ;;  %v3572_v62 = vadd.f32 %v3508_v48, %v5091_v2  ;;  %vm3269_vm3 = vmor %vm3267_vm14, %vm3268_vm1  ;;  %v1377_v52 = vpop.f32.mrf.mxu3 }
 0x2e2   :  { %v3265_v8 = vmul.f32 %v4445_v50, %v3264_v26  ;;  %v7310_v12 = vadd.f32 1.0, %v4451_v5  ;;  %v2160_v57 = vsel %vm2136_vm15, %v2119_v60, 0.0  ;;  %vm3272_vm2 = vcmp.eq.f32.partialorder %v3271_v23, 8.507059e+37 }
 0x2e3   :  { %4452 = vpow2.f32 %v4075_v51  ;;  %v3609_v35 = vsel %vm3457_vm8, %v3543_v63, %v5906_v34  ;;  %v2200_v11 = vadd.f32 %v2160_v57, %v6010_v33  ;;  %v3638_v39 = vsel %vm3457_vm8, %v3572_v62, %v7129_v44 }
 0x2e4   :  { %v3266_v20 = vadd.f32 %v4445_v50, %v3265_v8  ;;  %4454 = vrcp.f32 %v7310_v12  ;;  %3673 = vst [vmem:[#allocation2 + $0xa8] sm:$0xff] %v3609_v35  ;;  %v3274_v14 = vor.u32 1.1754944e-38, %v3273_v25  ;;  %v7325_v34 = vadd.f32 %v1375_v30, %v1207_v47 }
 0x2e5   :  { %3702 = vst [vmem:[#allocation2 + $0x190] sm:$0xff] %v3638_v39  ;;  %v4045_v27 = vmul.f32 -1.442695, %v2200_v11  ;;  %vm1972_vm4 = vweird.f32 %v7255_v37  ;;  %v1969_v54 = vsub.f32 1.0, %v1968_v40  ;;  %v1978_v44 = vand.u32 2147483648, %v7255_v37 }
 0x2e6   :  { %v3270_v36 = vsel %vm3269_vm3, %v4445_v50, %v3266_v20  ;;  %v1555_v41 = vsub.f32 1.0, %v7304_v21  ;;  %v2231_v55 = vadd.f32 %v7914_v46, %v7325_v34  ;;  %vm1973_vm5 = vweird.f32 %v7299_v4 }
 0x2e7   :  { %v3275_v53 = vsel %vm3272_vm2, %v3274_v14, %v3270_v36  ;;  %v1976_v13 = vand.u32 2147483647, %v7255_v37  ;;  %4456 = vpow2.f32 %v4045_v27  ;;  %v1970_v15 = vmul.f32 %v7299_v4, %v1969_v54  ;;  %vm7344_vm6 = vmor %vm1972_vm4, %vm1973_vm5 }
 0x2e8   :  { %v3509_v32 = vmul.f32 %v3275_v53, %v5087_v18  ;;  %v4076_v16 = vmul.f32 -1.442695, %v2231_v55  ;;  %v7336_v7 = vmax.f32 %v1555_v41, 1e-05  ;;  %v1979_v50 = vor.u32 1.1754944e-38, %v1978_v44  ;;  %v1211_v27 = vpop.f32.mrf.mxu2 }
 0x2e9   :  { %v4453_v28 = vpop.eup %4452  ;;  %v1971_v22 = vadd.f32 %v7299_v4, %v1970_v15  ;;  %v1209_v43 = vadd.f32 %v7041_v3, %v1208_v24  ;;  %vm1977_vm7 = vcmp.eq.f32.partialorder %v1976_v13, 8.507059e+37  ;;  %v3286_v0 = vand.u32 2147483647, %v7310_v12  ;;  %v1380_v55 = vpop.f32.mrf.mxu3 }
 0x2ea   :  { %v4455_v56 = vpop.eup %4454  ;;  %v3573_v17 = vadd.f32 %v3509_v32, %v5091_v2  ;;  %v7339_v1 = vadd.f32 1.0, %v4453_v28  ;;  %4458 = vpow2.f32 %v4076_v16  ;;  %v1521_v37 = vmax.f32 %v7192_v10, 1e-05  ;;  %v1429_v10 = vld [vmem:[%s7718_s1 + $0xe8] sm:$0xff] }
 0x2eb   :  { %v3278_v59 = vmul.f32 %v4455_v56, %v7310_v12  ;;  %v7356_v31 = vadd.f32 %v1377_v52, %v1209_v43  ;;  %v1975_v25 = vsel %vm7344_vm6, %v7299_v4, %v1971_v22  ;;  %vm3282_vm9 = vweird.f32 %v7310_v12 }
 0x2ec   :  { %v3639_v23 = vsel %vm3457_vm8, %v3573_v17, %v7161_v19  ;;  %4460 = vrcp.f32 %v7339_v1  ;;  %vm3283_vm10 = vweird.f32 %v4455_v56  ;;  %v3288_v19 = vand.u32 2147483648, %v7310_v12 }
 0x2ed   :  { %3703 = vst [vmem:[#allocation2 + $0x198] sm:$0xff] %v3639_v23  ;;  %v3279_v9 = vsub.f32 1.0, %v3278_v59  ;;  %4462 = vrcp.f32 %v7336_v7  ;;  %v4457_v42 = vpop.eup %4456  ;;  %v1980_v49 = vsel %vm1977_vm7, %v1979_v50, %v1975_v25  ;;  %v3301_v26 = vand.u32 2147483647, %v7339_v1  ;;  %vm3284_vm12 = vmor %vm3282_vm9, %vm3283_vm10 }
 0x2ee   :  { %v2232_v60 = vadd.f32 %v2160_v57, %v7356_v31  ;;  %v7369_v5 = vadd.f32 1.0, %v4457_v42  ;;  %vm7371_vm11 = vcmp.eq.f32.partialorder %v3286_v0, 8.507059e+37  ;;  %v3303_v51 = vand.u32 2147483648, %v7339_v1 }
 0x2ef   :  { %v3280_v48 = vmul.f32 %v4455_v56, %v3279_v9  ;;  %v1981_v63 = vmul.f32 %v1980_v49, %v1521_v37  ;;  %v1523_v40 = vmax.f32 %v7304_v21, 1e-05  ;;  %v1461_v30 = vmax.f32 %v1429_v10, 0.0  ;;  %v7925_v10 = vld [vmem:[#allocation7_spill] sm:$0xff] }
 0x2f0   :  { %v4459_v62 = vpop.eup %4458  ;;  %v4077_v6 = vmul.f32 -1.442695, %v2232_v60  ;;  %4464 = vrcp.f32 %v7369_v5  ;;  %v3289_v57 = vor.u32 1.1754944e-38, %v3288_v19  ;;  %vm3297_vm13 = vweird.f32 %v7339_v1 }
 0x2f1   :  { %v3281_v8 = vadd.f32 %v4455_v56, %v3280_v48  ;;  %v7382_v47 = vadd.f32 1.0, %v4459_v62  ;;  %4466 = vlog2.f32 %v1981_v63  ;;  %vm7387_vm14 = vcmp.eq.f32.partialorder %v3301_v26, 8.507059e+37 }
 0x2f2   :  { %v4461_v35 = vpop.eup %4460  ;;  %4468 = vpow2.f32 %v4077_v6  ;;  %vm2002_vm0 = vweird.f32 %v7336_v7  ;;  %v2006_v12 = vand.u32 2147483647, %v7336_v7  ;;  %v3304_v54 = vor.u32 1.1754944e-38, %v3303_v51 }
 0x2f3   :  { %v7384_v11 = vpop.eup %4462  ;;  %v3285_v39 = vsel %vm3284_vm12, %v4455_v56, %v3281_v8  ;;  %v3293_v20 = vmul.f32 %v4461_v35, %v7339_v1  ;;  %4470 = vrcp.f32 %v7382_v47  ;;  %v2008_v44 = vand.u32 2147483648, %v7336_v7 }
 0x2f4   :  { %v3290_v36 = vsel %vm7371_vm11, %v3289_v57, %v3285_v39  ;;  %v2851_v46 = vand.u32 2147483647, %v7369_v5  ;;  %v7399_v13 = vmin.f32 %v1461_v30, 1.0  ;;  %vm2847_vm1 = vweird.f32 %v7369_v5  ;;  %v7926_v57 = vld [vmem:[#allocation8_spill] sm:$0xff] }
 0x2f5   :  { %v3510_v41 = vmul.f32 %v3290_v36, %v5087_v18  ;;  %v3294_v53 = vsub.f32 1.0, %v3293_v20  ;;  %v2853_v32 = vand.u32 2147483648, %v7369_v5  ;;  %v1212_v15 = vadd.f32 %v7041_v3, %v1211_v27 }
 0x2f6   :  { %v1998_v28 = vmul.f32 %v7384_v11, %v7336_v7  ;;  %v4465_v16 = vpop.eup %4464  ;;  %vm3298_vm2 = vweird.f32 %v4461_v35  ;;  %v3316_v24 = vand.u32 2147483647, %v7382_v47  ;;  %vm7408_vm3 = vcmp.eq.f32.partialorder %v2006_v12, 8.507059e+37 }
 0x2f7   :  { %v3574_v56 = vadd.f32 %v3510_v41, %v5091_v2  ;;  %v3295_v17 = vmul.f32 %v4461_v35, %v3294_v53  ;;  %v4467_v29 = vpop.eup %4466  ;;  %v3318_v50 = vand.u32 2147483648, %v7382_v47  ;;  %v2843_v59 = vmul.f32 %v4465_v16, %v7369_v5  ;;  %vm3299_vm6 = vmor %vm3297_vm13, %vm3298_vm2 }
 0x2f8   :  { %v7414_v43 = vadd.f32 %v1380_v55, %v1212_v15  ;;  %v1999_v52 = vsub.f32 1.0, %v1998_v28  ;;  %v4469_v23 = vpop.eup %4468  ;;  %vm3312_vm4 = vweird.f32 %v7382_v47  ;;  %vm7420_vm5 = vcmp.eq.f32.partialorder %v2851_v46, 8.507059e+37 }
 0x2f9   :  { %v3640_v0 = vsel %vm3457_vm8, %v3574_v56, %v7232_v61  ;;  %v3296_v37 = vadd.f32 %v4461_v35, %v3295_v17  ;;  %v2123_v25 = vmul.f32 0.6931472, %v4467_v29  ;;  %v4471_v42 = vpop.eup %4470  ;;  %v7427_v19 = vadd.f32 1.0, %v4469_v23 }
 0x2fa   :  { %3704 = vst [vmem:[#allocation2 + $0x1a0] sm:$0xff] %v3640_v0  ;;  %v2844_v49 = vsub.f32 1.0, %v2843_v59  ;;  %v2233_v61 = vadd.f32 %v7925_v10, %v7414_v43  ;;  %v2000_v48 = vmul.f32 %v7384_v11, %v1999_v52  ;;  %v3308_v60 = vmul.f32 %v4471_v42, %v7382_v47 }
 0x2fb   :  { %v3300_v26 = vsel %vm3299_vm6, %v4461_v35, %v3296_v37  ;;  %v2162_v4 = vsel %vm2136_vm15, %v2123_v25, 0.0  ;;  %vm2003_vm7 = vweird.f32 %v7384_v11  ;;  %vm2848_vm9 = vweird.f32 %v4465_v16 }
 0x2fc   :  { %v3305_v51 = vsel %vm7387_vm14, %v3304_v54, %v3300_v26  ;;  %v2845_v1 = vmul.f32 %v4465_v16, %v2844_v49  ;;  %4472 = vrcp.f32 %v7427_v19  ;;  %v3309_v62 = vsub.f32 1.0, %v3308_v60  ;;  %vm7443_vm10 = vmor %vm2002_vm0, %vm2003_vm7  ;;  %v1213_v54 = vpop.f32.mrf.mxu2  ;;  %v1431_v26 = vld [vmem:[%s7718_s1 + $0xf8] sm:$0xff] }
 0x2fd   :  { %v3511_v63 = vmul.f32 %v3305_v51, %v5087_v18  ;;  %v2854_v8 = vor.u32 1.1754944e-38, %v2853_v32  ;;  %v2009_v6 = vor.u32 1.1754944e-38, %v2008_v44  ;;  %v4078_v35 = vmul.f32 -1.442695, %v2233_v61  ;;  %vm2849_vm12 = vmor %vm2847_vm1, %vm2848_vm9  ;;  %v1382_v44 = vpop.f32.mrf.mxu3 }
 0x2fe   :  { %v2846_v30 = vadd.f32 %v4465_v16, %v2845_v1  ;;  %v2202_v39 = vadd.f32 %v2162_v4, %v7926_v57  ;;  %v2001_v20 = vadd.f32 %v7384_v11, %v2000_v48  ;;  %v3310_v12 = vmul.f32 %v4471_v42, %v3309_v62 }
 0x2ff   :  { %v3575_v27 = vadd.f32 %v3511_v63, %v5091_v2  ;;  %vm3313_vm11 = vweird.f32 %v4471_v42  ;;  %v3319_v36 = vor.u32 1.1754944e-38, %v3318_v50  ;;  %4474 = vpow2.f32 %v4078_v35  ;;  %v7929_v35 = vld [vmem:[#allocation9_spill] sm:$0xff] }
 0x300   :  { %v2850_v41 = vsel %vm2849_vm12, %v4465_v16, %v2846_v30  ;;  %v1214_v53 = vadd.f32 %v7041_v3, %v1213_v54  ;;  %v4047_v7 = vmul.f32 -1.442695, %v2202_v39  ;;  %v3311_v55 = vadd.f32 %v4471_v42, %v3310_v12  ;;  %vm3314_vm13 = vmor %vm3312_vm4, %vm3313_vm11 }
 0x301   :  { %v3641_v46 = vsel %vm3457_vm8, %v3575_v27, %v7288_v38  ;;  %v2855_v32 = vsel %vm7420_vm5, %v2854_v8, %v2850_v41  ;;  %v2005_v5 = vsel %vm7443_vm10, %v7384_v11, %v2001_v20  ;;  %vm3317_vm14 = vcmp.eq.f32.partialorder %v3316_v24, 8.507059e+37 }
 0x302   :  { %v4473_v15 = vpop.eup %4472  ;;  %3705 = vst [vmem:[#allocation2 + $0x1a8] sm:$0xff] %v3641_v46  ;;  %v3481_v28 = vmul.f32 %v2855_v32, %v5087_v18  ;;  %v7464_v16 = vadd.f32 %v1382_v44, %v1214_v53  ;;  %4476 = vpow2.f32 %v4047_v7  ;;  %v2010_v38 = vsel %vm7408_vm3, %v2009_v6, %v2005_v5 }
 0x303   :  { %v3315_v56 = vsel %vm3314_vm13, %v4471_v42, %v3311_v55  ;;  %v3323_v17 = vmul.f32 %v4473_v15, %v7427_v19  ;;  %v2011_v11 = vmul.f32 %v2010_v38, %v1523_v40  ;;  %v3331_v50 = vand.u32 2147483647, %v7427_v19 }
 0x304   :  { %v3320_v29 = vsel %vm3317_vm14, %v3319_v36, %v3315_v56  ;;  %v3545_v47 = vadd.f32 %v3481_v28, %v5091_v2  ;;  %v2234_v59 = vadd.f32 %v2162_v4, %v7464_v16  ;;  %v1557_v22 = vsub.f32 1.0, %v7399_v13  ;;  %v1216_v42 = vpop.f32.mrf.mxu2 }
 0x305   :  { %v3512_v52 = vmul.f32 %v3320_v29, %v5087_v18  ;;  %v3324_v23 = vsub.f32 1.0, %v3323_v17  ;;  %4478 = vlog2.f32 %v2011_v11  ;;  %v4475_v0 = vpop.eup %4474  ;;  %vm3328_vm0 = vweird.f32 %v4473_v15  ;;  %v1385_v48 = vpop.f32.mrf.mxu3 }
 0x306   :  { %v3333_v24 = vand.u32 2147483648, %v7427_v19  ;;  %v3611_v21 = vsel %vm3457_vm8, %v3545_v47, %v6010_v33  ;;  %v4079_v40 = vmul.f32 -1.442695, %v2234_v59  ;;  %v7481_v25 = vadd.f32 1.0, %v4475_v0 }
 0x307   :  { %v3576_v37 = vadd.f32 %v3512_v52, %v5091_v2  ;;  %v3325_v9 = vmul.f32 %v4473_v15, %v3324_v23  ;;  %3675 = vst [vmem:[#allocation2 + $0xb8] sm:$0xff] %v3611_v21  ;;  %v7483_v49 = vmax.f32 %v1557_v22, 1e-05  ;;  %v1217_v61 = vadd.f32 %v7041_v3, %v1216_v42 }
 0x308   :  { %v4477_v10 = vpop.eup %4476  ;;  %4480 = vpow2.f32 %v4079_v40  ;;  %vm3327_vm1 = vweird.f32 %v7427_v19  ;;  %v3334_v4 = vor.u32 1.1754944e-38, %v3333_v24  ;;  %vm3332_vm3 = vcmp.eq.f32.partialorder %v3331_v50, 8.507059e+37  ;;  %v7932_v50 = vld [vmem:[#allocation10_spill] sm:$0xff] }
 0x309   :  { %v3642_v33 = vsel %vm3457_vm8, %v3576_v37, %v7325_v34  ;;  %v3326_v60 = vadd.f32 %v4473_v15, %v3325_v9  ;;  %4482 = vrcp.f32 %v7481_v25  ;;  %vm3329_vm2 = vmor %vm3327_vm1, %vm3328_vm0  ;;  %v7495_v51 = vadd.f32 1.0, %v4477_v10 }
 0x30a   :  { %3706 = vst [vmem:[#allocation2 + $0x1b0] sm:$0xff] %v3642_v33  ;;  %v7497_v1 = vadd.f32 %v1385_v48, %v1217_v61  ;;  %4484 = vrcp.f32 %v7483_v49  ;;  %v1463_v8 = vmax.f32 %v1431_v26, 0.0  ;;  %v3346_v6 = vand.u32 2147483647, %v7481_v25 }
 0x30b   :  { %v4479_v63 = vpop.eup %4478  ;;  %v3330_v62 = vsel %vm3329_vm2, %v4473_v15, %v3326_v60  ;;  %4486 = vrcp.f32 %v7495_v51  ;;  %v3348_v12 = vand.u32 2147483648, %v7481_v25  ;;  %vm3342_vm4 = vweird.f32 %v7481_v25 }
 0x30c   :  { %v3335_v34 = vsel %vm3332_vm3, %v3334_v4, %v3330_v62  ;;  %v2235_v39 = vadd.f32 %v7929_v35, %v7497_v1  ;;  %v2127_v20 = vmul.f32 0.6931472, %v4479_v63  ;;  %v7509_v54 = vmin.f32 %v1463_v8, 1.0  ;;  %v1218_v32 = vpop.f32.mrf.mxu2 }
 0x30d   :  { %v3513_v19 = vmul.f32 %v3335_v34, %v5087_v18  ;;  %vm7519_vm5 = vcmp.eq.f32.partialorder %v3346_v6, 8.507059e+37  ;;  %v2036_v5 = vand.u32 2147483647, %v7483_v49  ;;  %v2881_v38 = vand.u32 2147483647, %v7495_v51  ;;  %v1387_v17 = vpop.f32.mrf.mxu3 }
 0x30e   :  { %v4481_v30 = vpop.eup %4480  ;;  %v4080_v41 = vmul.f32 -1.442695, %v2235_v39  ;;  %v2164_v53 = vsel %vm2136_vm15, %v2127_v20, 0.0  ;;  %v1219_v56 = vadd.f32 %v7041_v3, %v1218_v32  ;;  %v3349_v11 = vor.u32 1.1754944e-38, %v3348_v12  ;;  %v7557_v6 = vld [vmem:[%s7722_s5] ss:$0 sm:$0xff] }
 0x30f   :  { %v4483_v14 = vpop.eup %4482  ;;  %v3577_v27 = vadd.f32 %v3513_v19, %v5091_v2  ;;  %v7507_v36 = vadd.f32 1.0, %v4481_v30  ;;  %v2883_v29 = vand.u32 2147483648, %v7495_v51  ;;  %v2204_v47 = vadd.f32 %v2164_v53, %v7932_v50  ;;  %s4565_s5 = smov [#allocation2]  }
 0x310   :  { %v3338_v44 = vmul.f32 %v4483_v14, %v7481_v25  ;;  %v7514_v7 = vpop.eup %4484  ;;  %vm2032_vm6 = vweird.f32 %v7483_v49  ;;  %vm3343_vm7 = vweird.f32 %v4483_v14  ;;  %v7531_v52 = vadd.f32 %v1387_v17, %v1219_v56  ;;  %v7937_v17 = vld [vmem:[#allocation11_spill] sm:$0xff]  ;;  %s3720_s16 = sshll.u32 %s4565_s5, 4  ;;  %s3721_s16 = int_to_ptr.vmem [resolvable:$true] %s3720_s16 }
 0x311   :  { %v3643_v46 = vsel %vm3457_vm8, %v3577_v27, %v7356_v31  ;;  %4488 = vrcp.f32 %v7507_v36  ;;  %v4487_v15 = vpop.eup %4486  ;;  %v2028_v23 = vmul.f32 %v7514_v7, %v7483_v49  ;;  %vm2877_vm9 = vweird.f32 %v7495_v51  ;;  %vm3344_vm11 = vmor %vm3342_vm4, %vm3343_vm7 }
 0x312   :  { %3707 = vst [vmem:[#allocation2 + $0x1b8] sm:$0xff] %v3643_v46  ;;  %v3339_v28 = vsub.f32 1.0, %v3338_v44  ;;  %4490 = vpow2.f32 %v4080_v41  ;;  %v2873_v31 = vmul.f32 %v4487_v15, %v7495_v51  ;;  %v4049_v3 = vmul.f32 -1.442695, %v2204_v47 }
 0x313   :  { %v2038_v0 = vand.u32 2147483648, %v7483_v49  ;;  %vm7537_vm10 = vcmp.eq.f32.partialorder %v2881_v38, 8.507059e+37  ;;  %v2236_v40 = vadd.f32 %v2164_v53, %v7531_v52  ;;  %v2029_v37 = vsub.f32 1.0, %v2028_v23 }
 0x314   :  { %v3340_v59 = vmul.f32 %v4483_v14, %v3339_v28  ;;  %v2874_v22 = vsub.f32 1.0, %v2873_v31  ;;  %vm2878_vm12 = vweird.f32 %v4487_v15  ;;  %v2884_v10 = vor.u32 1.1754944e-38, %v2883_v29  ;;  %v1221_v8 = vpop.f32.mrf.mxu2 }
 0x315   :  { %4492 = vpow2.f32 %v4049_v3  ;;  %v3361_v33 = vand.u32 2147483647, %v7507_v36  ;;  %v4081_v60 = vmul.f32 -1.442695, %v2236_v40  ;;  %v2030_v25 = vmul.f32 %v7514_v7, %v2029_v37  ;;  %vm2879_vm13 = vmor %vm2877_vm9, %vm2878_vm12  ;;  %v1390_v27 = vpop.f32.mrf.mxu3 }
 0x316   :  { %v3341_v24 = vadd.f32 %v4483_v14, %v3340_v59  ;;  %v2875_v42 = vmul.f32 %v4487_v15, %v2874_v22  ;;  %v1222_v30 = vadd.f32 %v7557_v6, %v1221_v8  ;;  %v3363_v39 = vand.u32 2147483648, %v7507_v36 }
 0x317   :  { %v4489_v9 = vpop.eup %4488  ;;  %4494 = vpow2.f32 %v4081_v60  ;;  %vm2033_vm14 = vweird.f32 %v7514_v7  ;;  %vm3357_vm1 = vweird.f32 %v7507_v36  ;;  %v1559_v53 = vsub.f32 1.0, %v7509_v54 }
 0x318   :  { %v4491_v61 = vpop.eup %4490  ;;  %v3345_v48 = vsel %vm3344_vm11, %v4483_v14, %v3341_v24  ;;  %v3353_v26 = vmul.f32 %v4489_v9, %v7507_v36  ;;  %v2876_v63 = vadd.f32 %v4487_v15, %v2875_v42  ;;  %vm3358_vm0 = vweird.f32 %v4489_v9  ;;  %vm7581_vm2 = vmor %vm2032_vm6, %vm2033_vm14 }
 0x319   :  { %v3350_v4 = vsel %vm7519_vm5, %v3349_v11, %v3345_v48  ;;  %v7548_v62 = vadd.f32 1.0, %v4491_v61  ;;  %v7568_v41 = vadd.f32 %v1390_v27, %v1222_v30  ;;  %vm3359_vm3 = vmor %vm3357_vm1, %vm3358_vm0  ;;  %vm3362_vm4 = vcmp.eq.f32.partialorder %v3361_v33, 8.507059e+37 }
 0x31a   :  { %v3514_v34 = vmul.f32 %v3350_v4, %v5087_v18  ;;  %v3354_v19 = vsub.f32 1.0, %v3353_v26  ;;  %v2880_v35 = vsel %vm2879_vm13, %v4487_v15, %v2876_v63  ;;  %v2031_v15 = vadd.f32 %v7514_v7, %v2030_v25 }
 0x31b   :  { %4496 = vrcp.f32 %v7548_v62  ;;  %v2885_v51 = vsel %vm7537_vm10, %v2884_v10, %v2880_v35  ;;  %v4493_v12 = vpop.eup %4492  ;;  %v3364_v28 = vor.u32 1.1754944e-38, %v3363_v39  ;;  %v2237_v11 = vadd.f32 %v7937_v17, %v7568_v41 }
 0x31c   :  { %v3578_v20 = vadd.f32 %v3514_v34, %v5091_v2  ;;  %v3355_v14 = vmul.f32 %v4489_v9, %v3354_v19  ;;  %v3483_v44 = vmul.f32 %v2885_v51, %v5087_v18  ;;  %v7574_v32 = vadd.f32 1.0, %v4493_v12  ;;  %v1223_v25 = vpop.f32.mrf.mxu2 }
 0x31d   :  { %v2039_v31 = vor.u32 1.1754944e-38, %v2038_v0  ;;  %v7594_v22 = vmax.f32 %v1559_v53, 1e-05  ;;  %v2035_v21 = vsel %vm7581_vm2, %v7514_v7, %v2031_v15  ;;  %vm2037_vm5 = vcmp.eq.f32.partialorder %v2036_v5, 8.507059e+37 }
 0x31e   :  { %v3644_v46 = vsel %vm3457_vm8, %v3578_v20, %v7414_v43  ;;  %v3356_v55 = vadd.f32 %v4489_v9, %v3355_v14  ;;  %v3547_v38 = vadd.f32 %v3483_v44, %v5091_v2  ;;  %v4495_v43 = vpop.eup %4494  ;;  %4498 = vrcp.f32 %v7574_v32 }
 0x31f   :  { %3708 = vst [vmem:[#allocation2 + $0x1c0] sm:$0xff] %v3644_v46  ;;  %v7592_v23 = vadd.f32 1.0, %v4495_v43  ;;  %v3376_v0 = vand.u32 2147483647, %v7548_v62  ;;  %v4082_v42 = vmul.f32 -1.442695, %v2237_v11  ;;  %v2040_v7 = vsel %vm2037_vm5, %v2039_v31, %v2035_v21 }
 0x320   :  { %v3360_v56 = vsel %vm3359_vm3, %v4489_v9, %v3356_v55  ;;  %v3613_v59 = vsel %vm3457_vm8, %v3547_v38, %v7926_v57  ;;  %v1525_v57 = vmax.f32 %v7399_v13, 1e-05  ;;  %v3378_v9 = vand.u32 2147483648, %v7548_v62 }
 0x321   :  { %v4497_v29 = vpop.eup %4496  ;;  %v3365_v47 = vsel %vm3362_vm4, %v3364_v28, %v3360_v56  ;;  %3677 = vst [vmem:[#allocation2 + $0xc8] sm:$0xff] %v3613_v59  ;;  %4500 = vrcp.f32 %v7592_v23  ;;  %v2911_v10 = vand.u32 2147483647, %v7574_v32  ;;  %v2913_v61 = vand.u32 2147483648, %v7574_v32  ;;  %v1392_v56 = vpop.f32.mrf.mxu3 }
 0x322   :  { %v3515_v3 = vmul.f32 %v3365_v47, %v5087_v18  ;;  %v3368_v24 = vmul.f32 %v4497_v29, %v7548_v62  ;;  %4502 = vrcp.f32 %v7594_v22  ;;  %vm3373_vm6 = vweird.f32 %v4497_v29 }
 0x323   :  { %4504 = vpow2.f32 %v4082_v42  ;;  %vm3372_vm7 = vweird.f32 %v7548_v62  ;;  %v2041_v26 = vmul.f32 %v2040_v7, %v1525_v57  ;;  %vm3377_vm9 = vcmp.eq.f32.partialorder %v3376_v0, 8.507059e+37 }
 0x324   :  { %v3579_v40 = vadd.f32 %v3515_v3, %v5091_v2  ;;  %v3369_v37 = vsub.f32 1.0, %v3368_v24  ;;  %v4499_v49 = vpop.eup %4498  ;;  %v3379_v60 = vor.u32 1.1754944e-38, %v3378_v9  ;;  %vm2907_vm10 = vweird.f32 %v7574_v32  ;;  %vm3374_vm11 = vmor %vm3372_vm7, %vm3373_vm6 }
 0x325   :  { %v2903_v13 = vmul.f32 %v4499_v49, %v7574_v32  ;;  %vm7617_vm12 = vcmp.eq.f32.partialorder %v2911_v10, 8.507059e+37  ;;  %4506 = vlog2.f32 %v2041_v26  ;;  %vm3387_vm13 = vweird.f32 %v7592_v23  ;;  %v7942_v10 = vld [vmem:[#allocation12_spill] sm:$0xff] }
 0x326   :  { %v3645_v5 = vsel %vm3457_vm8, %v3579_v40, %v7464_v16  ;;  %v3370_v48 = vmul.f32 %v4497_v29, %v3369_v37  ;;  %v2914_v16 = vor.u32 1.1754944e-38, %v2913_v61  ;;  %v3391_v19 = vand.u32 2147483647, %v7592_v23 }
 0x327   :  { %3709 = vst [vmem:[#allocation2 + $0x1c8] sm:$0xff] %v3645_v5  ;;  %v4501_v4 = vpop.eup %4500  ;;  %v2904_v63 = vsub.f32 1.0, %v2903_v13  ;;  %vm2908_vm14 = vweird.f32 %v4499_v49  ;;  %v3393_v20 = vand.u32 2147483648, %v7592_v23  ;;  %v1224_v12 = vadd.f32 %v7557_v6, %v1223_v25 }
 0x328   :  { %v3371_v33 = vadd.f32 %v4497_v29, %v3370_v48  ;;  %v3383_v62 = vmul.f32 %v4501_v4, %v7592_v23  ;;  %v4503_v30 = vpop.eup %4502  ;;  %vm2062_vm0 = vweird.f32 %v7594_v22  ;;  %v2068_v55 = vand.u32 2147483648, %v7594_v22  ;;  %vm2909_vm1 = vmor %vm2907_vm10, %vm2908_vm14 }
 0x329   :  { %v2905_v39 = vmul.f32 %v4499_v49, %v2904_v63  ;;  %v4505_v51 = vpop.eup %4504  ;;  %v2058_v44 = vmul.f32 %v4503_v30, %v7594_v22  ;;  %vm3388_vm2 = vweird.f32 %v4501_v4  ;;  %vm2063_vm3 = vweird.f32 %v4503_v30  ;;  %v1226_v63 = vpop.f32.mrf.mxu2 }
 0x32a   :  { %v3375_v34 = vsel %vm3374_vm11, %v4497_v29, %v3371_v33  ;;  %v3384_v27 = vsub.f32 1.0, %v3383_v62  ;;  %v7628_v46 = vadd.f32 1.0, %v4505_v51  ;;  %v2066_v17 = vand.u32 2147483647, %v7594_v22  ;;  %vm3389_vm4 = vmor %vm3387_vm13, %vm3388_vm2  ;;  %v1395_v62 = vpop.f32.mrf.mxu3 }
 0x32b   :  { %v3380_v35 = vsel %vm3377_vm9, %v3379_v60, %v3375_v34  ;;  %v2906_v53 = vadd.f32 %v4499_v49, %v2905_v39  ;;  %v2059_v28 = vsub.f32 1.0, %v2058_v44  ;;  %v4507_v38 = vpop.eup %4506  ;;  %v7642_v29 = vadd.f32 %v1392_v56, %v1224_v12  ;;  %vm7651_vm6 = vmor %vm2062_vm0, %vm2063_vm3 }
 0x32c   :  { %v3516_v14 = vmul.f32 %v3380_v35, %v5087_v18  ;;  %v3385_v36 = vmul.f32 %v4501_v4, %v3384_v27  ;;  %4508 = vrcp.f32 %v7628_v46  ;;  %v3394_v47 = vor.u32 1.1754944e-38, %v3393_v20  ;;  %v7943_v35 = vld [vmem:[#allocation13_spill] sm:$0xff] }
 0x32d   :  { %v2910_v43 = vsel %vm2909_vm1, %v4499_v49, %v2906_v53  ;;  %v2131_v3 = vmul.f32 0.6931472, %v4507_v38  ;;  %v2060_v24 = vmul.f32 %v4503_v30, %v2059_v28  ;;  %vm3392_vm5 = vcmp.eq.f32.partialorder %v3391_v19, 8.507059e+37 }
 0x32e   :  { %v3580_v15 = vadd.f32 %v3516_v14, %v5091_v2  ;;  %v2915_v31 = vsel %vm7617_vm12, %v2914_v16, %v2910_v43  ;;  %v3386_v32 = vadd.f32 %v4501_v4, %v3385_v36  ;;  %v1527_v0 = vmax.f32 %v7509_v54, 1e-05 }
 0x32f   :  { %v3485_v59 = vmul.f32 %v2915_v31, %v5087_v18  ;;  %v2069_v57 = vor.u32 1.1754944e-38, %v2068_v55  ;;  %v2166_v37 = vsel %vm2136_vm15, %v2131_v3, 0.0  ;;  %v2061_v9 = vadd.f32 %v4503_v30, %v2060_v24 }
 0x330   :  { %v3646_v11 = vsel %vm3457_vm8, %v3580_v15, %v7497_v1  ;;  %v3390_v21 = vsel %vm3389_vm4, %v4501_v4, %v3386_v32  ;;  %v2206_v61 = vadd.f32 %v2166_v37, %v7942_v10  ;;  %v2238_v54 = vadd.f32 %v2166_v37, %v7642_v29 }
 0x331   :  { %3710 = vst [vmem:[#allocation2 + $0x1d0] sm:$0xff] %v3646_v11  ;;  %v3395_v40 = vsel %vm3392_vm5, %v3394_v47, %v3390_v21  ;;  %v3549_v23 = vadd.f32 %v3485_v59, %v5091_v2  ;;  %vm2067_vm7 = vcmp.eq.f32.partialorder %v2066_v17, 8.507059e+37  ;;  %v2065_v49 = vsel %vm7651_vm6, %v4503_v30, %v2061_v9 }
 0x332   :  { %v3517_v42 = vmul.f32 %v3395_v40, %v5087_v18  ;;  %v4509_v7 = vpop.eup %4508  ;;  %v4051_v13 = vmul.f32 -1.442695, %v2206_v61  ;;  %v4083_v26 = vmul.f32 -1.442695, %v2238_v54  ;;  %v2070_v33 = vsel %vm2067_vm7, %v2069_v57, %v2065_v49  ;;  %v1397_v56 = vpop.f32.mrf.mxu3 }
 0x333   :  { %v3615_v22 = vsel %vm3457_vm8, %v3549_v23, %v7932_v50  ;;  %v3398_v48 = vmul.f32 %v4509_v7, %v7628_v46  ;;  %v2071_v8 = vmul.f32 %v2070_v33, %v1527_v0  ;;  %v3408_v50 = vand.u32 2147483648, %v7628_v46 }
 0x334   :  { %v3581_v5 = vadd.f32 %v3517_v42, %v5091_v2  ;;  %3679 = vst [vmem:[#allocation2 + $0xd8] sm:$0xff] %v3615_v22  ;;  %4510 = vpow2.f32 %v4051_v13  ;;  %v1227_v16 = vadd.f32 %v7557_v6, %v1226_v63  ;;  %vm3403_vm9 = vweird.f32 %v4509_v7 }
 0x335   :  { %v3399_v4 = vsub.f32 1.0, %v3398_v48  ;;  %4512 = vpow2.f32 %v4083_v26  ;;  %v3406_v34 = vand.u32 2147483647, %v7628_v46  ;;  %vm3402_vm10 = vweird.f32 %v7628_v46  ;;  %v1228_v46 = vpop.f32.mrf.mxu2 }
 0x336   :  { %v3647_v60 = vsel %vm3457_vm8, %v3581_v5, %v7531_v52  ;;  %v7673_v19 = vadd.f32 %v1395_v62, %v1227_v16  ;;  %4514 = vlog2.f32 %v2071_v8  ;;  %vm3404_vm11 = vmor %vm3402_vm10, %vm3403_vm9  ;;  %v3409_v52 = vor.u32 1.1754944e-38, %v3408_v50 }
 0x337   :  { %3711 = vst [vmem:[#allocation2 + $0x1d8] sm:$0xff] %v3647_v60  ;;  %v3400_v25 = vmul.f32 %v4509_v7, %v3399_v4  ;;  %vm3407_vm12 = vcmp.eq.f32.partialorder %v3406_v34, 8.507059e+37  ;;  %v1229_v38 = vadd.f32 %v7557_v6, %v1228_v46 }
 0x338   :  { %v2239_v39 = vadd.f32 %v7943_v35, %v7673_v19 }
 0x339   :  { %v3401_v30 = vadd.f32 %v4509_v7, %v3400_v25  ;;  %v7684_v17 = vadd.f32 %v1397_v56, %v1229_v38 }
 0x33a   :  { %v4511_v20 = vpop.eup %4510  ;;  %v4084_v44 = vmul.f32 -1.442695, %v2239_v39 }
 0x33b   :  { %v3405_v51 = vsel %vm3404_vm11, %v4509_v7, %v3401_v30  ;;  %v4513_v14 = vpop.eup %4512  ;;  %v2462_v12 = vadd.f32 1.0, %v4511_v20 }
 0x33c   :  { %v3410_v27 = vsel %vm3407_vm12, %v3409_v52, %v3405_v51  ;;  %v2494_v55 = vadd.f32 1.0, %v4513_v14  ;;  %v4515_v15 = vpop.eup %4514 }
 0x33d   :  { %v3518_v53 = vmul.f32 %v3410_v27, %v5087_v18  ;;  %4516 = vrcp.f32 %v2462_v12  ;;  %v2135_v43 = vmul.f32 0.6931472, %v4515_v15  ;;  %v2941_v57 = vand.u32 2147483647, %v2462_v12 }
 0x33e   :  { %4518 = vrcp.f32 %v2494_v55  ;;  %v2943_v40 = vand.u32 2147483648, %v2462_v12  ;;  %v3423_v9 = vand.u32 2147483648, %v2494_v55  ;;  %v3421_v61 = vand.u32 2147483647, %v2494_v55 }
 0x33f   :  { %v3582_v36 = vadd.f32 %v3518_v53, %v5091_v2  ;;  %4520 = vpow2.f32 %v4084_v44  ;;  %v2168_v11 = vsel %vm2136_vm15, %v2135_v43, 0.0  ;;  %vm2937_vm14 = vweird.f32 %v2462_v12 }
 0x340   :  { %v2208_v32 = vadd.f32 %v2168_v11, %v6386_v45  ;;  %v2240_v3 = vadd.f32 %v2168_v11, %v7684_v17  ;;  %v2944_v7 = vor.u32 1.1754944e-38, %v2943_v40  ;;  %vm3417_vm1 = vweird.f32 %v2494_v55 }
 0x341   :  { %v3648_v28 = vsel %vm3457_vm8, %v3582_v36, %v7568_v41  ;;  %vm2942_vm2 = vcmp.eq.f32.partialorder %v2941_v57, 8.507059e+37  ;;  %v3424_v5 = vor.u32 1.1754944e-38, %v3423_v9  ;;  %vm3422_vm4 = vcmp.eq.f32.partialorder %v3421_v61, 8.507059e+37 }
 0x342   :  { %3712 = vst [vmem:[#allocation2 + $0x1e0] sm:$0xff] %v3648_v28  ;;  %v4053_v0 = vmul.f32 -1.442695, %v2208_v32  ;;  %v4085_v6 = vmul.f32 -1.442695, %v2240_v3 }
 0x343   :  { %v4517_v31 = vpop.eup %4516 }
 0x344   :  { %v4519_v47 = vpop.eup %4518  ;;  %v2933_v59 = vmul.f32 %v4517_v31, %v2462_v12  ;;  %4522 = vpow2.f32 %v4053_v0  ;;  %vm2938_vm13 = vweird.f32 %v4517_v31 }
 0x345   :  { %v4521_v24 = vpop.eup %4520  ;;  %v3413_v21 = vmul.f32 %v4519_v47, %v2494_v55  ;;  %vm3418_vm15 = vweird.f32 %v4519_v47  ;;  %vm2939_vm0 = vmor %vm2937_vm14, %vm2938_vm13 }
 0x346   :  { %v2934_v41 = vsub.f32 1.0, %v2933_v59  ;;  %v2495_v1 = vadd.f32 1.0, %v4521_v24  ;;  %vm3419_vm3 = vmor %vm3417_vm1, %vm3418_vm15 }
 0x347   :  { %v3414_v23 = vsub.f32 1.0, %v3413_v21 }
 0x348   :  { %v2935_v37 = vmul.f32 %v4517_v31, %v2934_v41  ;;  %4524 = vrcp.f32 %v2495_v1  ;;  %v3438_v35 = vand.u32 2147483648, %v2495_v1  ;;  %v3436_v51 = vand.u32 2147483647, %v2495_v1 }
 0x349   :  { %v3415_v42 = vmul.f32 %v4519_v47, %v3414_v23  ;;  %4526 = vpow2.f32 %v4085_v6  ;;  %vm3432_vm6 = vweird.f32 %v2495_v1 }
 0x34a   :  { %v2936_v54 = vadd.f32 %v4517_v31, %v2935_v37  ;;  %v4523_v48 = vpop.eup %4522  ;;  %v3439_v12 = vor.u32 1.1754944e-38, %v3438_v35  ;;  %vm3437_vm9 = vcmp.eq.f32.partialorder %v3436_v51, 8.507059e+37 }
 0x34b   :  { %v3416_v22 = vadd.f32 %v4519_v47, %v3415_v42  ;;  %v2464_v63 = vadd.f32 1.0, %v4523_v48 }
 0x34c   :  { %v2940_v49 = vsel %vm2939_vm0, %v4517_v31, %v2936_v54 }
 0x34d   :  { %v2945_v13 = vsel %vm2942_vm2, %v2944_v7, %v2940_v49  ;;  %v3420_v26 = vsel %vm3419_vm3, %v4519_v47, %v3416_v22  ;;  %4528 = vrcp.f32 %v2464_v63  ;;  %v2973_v28 = vand.u32 2147483648, %v2464_v63 }
 0x34e   :  { %v4525_v33 = vpop.eup %4524  ;;  %v3425_v60 = vsel %vm3422_vm4, %v3424_v5, %v3420_v26  ;;  %v3487_v4 = vmul.f32 %v2945_v13, %v5087_v18  ;;  %vm2967_vm11 = vweird.f32 %v2464_v63 }
 0x34f   :  { %v4527_v8 = vpop.eup %4526  ;;  %v3519_v50 = vmul.f32 %v3425_v60, %v5087_v18  ;;  %v3428_v16 = vmul.f32 %v4525_v33, %v2495_v1  ;;  %vm3433_vm5 = vweird.f32 %v4525_v33  ;;  %v2974_v3 = vor.u32 1.1754944e-38, %v2973_v28 }
 0x350   :  { %v3551_v25 = vadd.f32 %v3487_v4, %v5091_v2  ;;  %v2496_v34 = vadd.f32 1.0, %v4527_v8  ;;  %vm3434_vm7 = vmor %vm3432_vm6, %vm3433_vm5 }
 0x351   :  { %v3583_v62 = vadd.f32 %v3519_v50, %v5091_v2  ;;  %v3429_v30 = vsub.f32 1.0, %v3428_v16 }
 0x352   :  { %v3617_v52 = vsel %vm3457_vm8, %v3551_v25, %v7942_v10  ;;  %4530 = vrcp.f32 %v2496_v34  ;;  %v3451_v11 = vand.u32 2147483647, %v2496_v34  ;;  %v3453_v31 = vand.u32 2147483648, %v2496_v34 }
 0x353   :  { %v3649_v39 = vsel %vm3457_vm8, %v3583_v62, %v7642_v29  ;;  %3681 = vst [vmem:[#allocation2 + $0xe8] sm:$0xff] %v3617_v52  ;;  %v3430_v20 = vmul.f32 %v4525_v33, %v3429_v30  ;;  %v4529_v27 = vpop.eup %4528  ;;  %v2971_v29 = vand.u32 2147483647, %v2464_v63  ;;  %vm3447_vm14 = vweird.f32 %v2496_v34 }
 0x354   :  { %3713 = vst [vmem:[#allocation2 + $0x1e8] sm:$0xff] %v3649_v39  ;;  %v2963_v53 = vmul.f32 %v4529_v27, %v2464_v63  ;;  %vm2968_vm10 = vweird.f32 %v4529_v27  ;;  %v3454_v41 = vor.u32 1.1754944e-38, %v3453_v31  ;;  %vm3452_vm1 = vcmp.eq.f32.partialorder %v3451_v11, 8.507059e+37 }
 0x355   :  { %v3431_v14 = vadd.f32 %v4525_v33, %v3430_v20  ;;  %vm2969_vm13 = vmor %vm2967_vm11, %vm2968_vm10  ;;  %vm2972_vm15 = vcmp.eq.f32.partialorder %v2971_v29, 8.507059e+37 }
 0x356   :  { %v2964_v36 = vsub.f32 1.0, %v2963_v53 }
 0x357   :  { %v3435_v44 = vsel %vm3434_vm7, %v4525_v33, %v3431_v14 }
 0x358   :  { %v4531_v10 = vpop.eup %4530  ;;  %v3440_v55 = vsel %vm3437_vm9, %v3439_v12, %v3435_v44  ;;  %v2965_v43 = vmul.f32 %v4529_v27, %v2964_v36 }
 0x359   :  { %v3520_v15 = vmul.f32 %v3440_v55, %v5087_v18  ;;  %v3443_v46 = vmul.f32 %v4531_v10, %v2496_v34  ;;  %vm3448_vm12 = vweird.f32 %v4531_v10 }
 0x35a   :  { %v2966_v47 = vadd.f32 %v4529_v27, %v2965_v43  ;;  %vm3449_vm0 = vmor %vm3447_vm14, %vm3448_vm12 }
 0x35b   :  { %v3584_v38 = vadd.f32 %v3520_v15, %v5091_v2  ;;  %v3444_v56 = vsub.f32 1.0, %v3443_v46 }
 0x35c   :  { %v2970_v24 = vsel %vm2969_vm13, %v4529_v27, %v2966_v47 }
 0x35d   :  { %v3650_v32 = vsel %vm3457_vm8, %v3584_v38, %v7673_v19  ;;  %v3445_v59 = vmul.f32 %v4531_v10, %v3444_v56  ;;  %v2975_v0 = vsel %vm2972_vm15, %v2974_v3, %v2970_v24 }
 0x35e   :  { %3714 = vst [vmem:[#allocation2 + $0x1f0] sm:$0xff] %v3650_v32  ;;  %v3489_v6 = vmul.f32 %v2975_v0, %v5087_v18 }
 0x35f   :  { %v3446_v21 = vadd.f32 %v4531_v10, %v3445_v59 }
 0x360   :  { %v3553_v40 = vadd.f32 %v3489_v6, %v5091_v2 }
 0x361   :  { %v3450_v1 = vsel %vm3449_vm0, %v4531_v10, %v3446_v21 }
 0x362   :  { %v3455_v57 = vsel %vm3452_vm1, %v3454_v41, %v3450_v1  ;;  %v3619_v37 = vsel %vm3457_vm8, %v3553_v40, %v6386_v45 }
 0x363   :  { %v3521_v19 = vmul.f32 %v3455_v57, %v5087_v18  ;;  %3683 = vst [vmem:[#allocation2 + $0xf8] sm:$0xff] %v3619_v37 }
 0x365   :  { %v3585_v23 = vadd.f32 %v3521_v19, %v5091_v2 }
 0x367   :  { %v3651_v9 = vsel %vm3457_vm8, %v3585_v23, %v7684_v17 }
 0x368   :  { %3715 = vst [vmem:[#allocation2 + $0x1f8] sm:$0xff] %v3651_v9 }
 0x369   :  { %3728 = dma.vmem_to_hbm [thread:$0]  %s3721_s16, 8192, %s3723_s19, [#allocation3], %s4566_s20, %s4566_s20, %s4567_s6  }
 0x36a   :  { %4561 = dma.done.wait [#allocation3], 8192  }
 0x36b   :  { %4562 = vsyncadd [#allocation3], 4294959104 }
 0x36c   :  { %3733 = vsyncpa [#allocation3], 1 }

</bundles_post_ra>
